<compile_context>
chip_gen: v7x
topology: tpu7x:2x2x1
jax: 0.10.0
libtpu: 0.0.40
codegen_flags: <defaults>
</compile_context>

<pallas_src>
import jax
import jax.numpy as jnp
from jax.experimental import pallas as pl
from jax.experimental.pallas import tpu as pltpu


def _decoder_block_kernel(xm_ref, xt_ref, xb_ref,
                          w1_ref, s1_ref, b1_ref,
                          w2_ref, s2_ref, b2_ref,
                          o_ref,
                          xc_ref, xl_ref, xr_ref,
                          mid_ref, ml_ref, mr_ref):
    # xm_ref: (1, TH, W2, C1)  bf16  current row tile of the conv1 input
    # xt_ref: (1, 2,  W2, C1)  bf16  2 rows directly above the tile (clamped)
    # xb_ref: (1, 2,  W2, C1)  bf16  2 rows directly below the tile (clamped)
    # w*_ref: (9, cin, Cout)   bf16  3x3 weights, taps flattened (dy*3+dx)
    # s*/b*_ref: (1, Cout)     f32   BatchNorm folded to per-channel affine
    # o_ref:  (1, TH, W2, Cout) bf16 output row tile
    # xc/xl/xr: (TH+4, W2, C1)   bf16 center / left-shift / right-shift conv1 input
    # mid/ml/mr:(TH+2, W2, Cout) bf16 center / left-shift / right-shift conv1 act.
    t = pl.program_id(1)
    nt = pl.num_programs(1)
    TH, W2, Cout = o_ref.shape[1], o_ref.shape[2], o_ref.shape[3]
    C1 = xm_ref.shape[3]

    # ---- assemble row-haloed conv1 input tile (image rows r0-2 .. r0+TH+1) ----
    xc_ref[2:TH + 2] = xm_ref[0]

    @pl.when(t == 0)
    def _():  # image top: "SAME" padding rows are zero
        xc_ref[0:2] = jnp.zeros((2, W2, C1), xc_ref.dtype)

    @pl.when(t > 0)
    def _():
        xc_ref[0:2] = xt_ref[0]

    @pl.when(t == nt - 1)
    def _():  # image bottom
        xc_ref[TH + 2:TH + 4] = jnp.zeros((2, W2, C1), xc_ref.dtype)

    @pl.when(t < nt - 1)
    def _():
        xc_ref[TH + 2:TH + 4] = xb_ref[0]

    def make_shifted(src_ref, left_ref, right_ref, rows, cin):
        # left_ref[:, w] = src[:, w-1] (zero col 0); right_ref[:, w] = src[:, w+1]
        left_ref[:, 1:, :] = src_ref[:, 0:W2 - 1, :]
        left_ref[:, 0:1, :] = jnp.zeros((rows, 1, cin), left_ref.dtype)
        right_ref[:, 0:W2 - 1, :] = src_ref[:, 1:, :]
        right_ref[:, W2 - 1:W2, :] = jnp.zeros((rows, 1, cin), right_ref.dtype)

    def conv3x3(left_ref, ctr_ref, right_ref, w_ref, rows_out, cin):
        # 9 bf16 MXU matmuls (K=cin), f32 value accumulation, single store by
        # the caller.  Every tap slice is contiguous (row stride == W2) so the
        # reshape to (M, cin) is free.
        m = rows_out * W2
        acc = None
        for dy in range(3):
            for dx, src in enumerate((left_ref, ctr_ref, right_ref)):
                patch = src[dy:dy + rows_out].reshape(m, cin)
                part = jnp.dot(patch, w_ref[dy * 3 + dx],
                               preferred_element_type=jnp.float32)
                acc = part if acc is None else acc + part
        return acc

    # ---- conv1 + BN + ReLU -> mid (bf16, activation rows r0-1 .. r0+TH) ----
    make_shifted(xc_ref, xl_ref, xr_ref, TH + 4, C1)
    acc1 = conv3x3(xl_ref, xc_ref, xr_ref, w1_ref, TH + 2, C1)
    y1 = jnp.maximum(acc1 * s1_ref[0][None, :] + b1_ref[0][None, :], 0.0)
    mid_ref[...] = y1.reshape(TH + 2, W2, Cout).astype(mid_ref.dtype)

    # conv2's zero-padding rows at the image top/bottom must be 0, not BN(conv(0))
    @pl.when(t == 0)
    def _():
        mid_ref[0:1] = jnp.zeros((1, W2, Cout), mid_ref.dtype)

    @pl.when(t == nt - 1)
    def _():
        mid_ref[TH + 1:TH + 2] = jnp.zeros((1, W2, Cout), mid_ref.dtype)

    # ---- conv2 + BN + ReLU -> output tile ----
    make_shifted(mid_ref, ml_ref, mr_ref, TH + 2, Cout)
    acc2 = conv3x3(ml_ref, mid_ref, mr_ref, w2_ref, TH, Cout)
    y2 = jnp.maximum(acc2 * s2_ref[0][None, :] + b2_ref[0][None, :], 0.0)
    o_ref[...] = y2.reshape(1, TH, W2, Cout).astype(o_ref.dtype)


def _pick_tile_rows(H2, W2, C1, Cout, budget_bytes=8 << 20):
    """Largest even divisor of H2 whose per-step VMEM footprint fits the budget."""
    divisors = [d for d in range(2, H2 + 1, 2) if H2 % d == 0]
    if not divisors:
        return H2

    def footprint(th):
        scratch = 2 * 3 * ((th + 4) * W2 * C1 + (th + 2) * W2 * Cout)   # bf16 scratches
        io = 2 * 2 * ((th + 4) * W2 * C1 + th * W2 * Cout)              # dbl-buffered bf16 blocks
        return scratch + io

    fitting = [d for d in divisors if footprint(d) <= budget_bytes]
    return max(fitting) if fitting else min(divisors)


def _fused_double_conv(x_bf16, w1, scale1, bias1, w2, scale2, bias2, tile_rows=None):
    """Fused conv1(+BN+ReLU) -> conv2(+BN+ReLU) on NHWC input (already upsampled+concat).

    x_bf16: (B, H2, W2, C1); w1: (3,3,C1,Cout); w2: (3,3,Cout,Cout); affine: (Cout,).
    Returns (B, H2, W2, Cout) bf16.
    """
    B, H2, W2, C1 = x_bf16.shape
    Cout = w1.shape[-1]
    TH = tile_rows if tile_rows is not None else _pick_tile_rows(H2, W2, C1, Cout)
    if H2 % TH != 0 or TH % 2 != 0:
        raise ValueError(f"tile_rows={TH} must be an even divisor of H2={H2}")
    NT = H2 // TH
    hb = TH // 2          # halo-block stride in units of 2-row blocks
    n_hblk = H2 // 2

    x_bf16 = x_bf16.astype(jnp.bfloat16)
    w1f = w1.reshape(9, C1, Cout).astype(jnp.bfloat16)
    w2f = w2.reshape(9, Cout, Cout).astype(jnp.bfloat16)
    s1 = scale1.reshape(1, Cout).astype(jnp.float32)
    b1 = bias1.reshape(1, Cout).astype(jnp.float32)
    s2 = scale2.reshape(1, Cout).astype(jnp.float32)
    b2 = bias2.reshape(1, Cout).astype(jnp.float32)

    return pl.pallas_call(
        _decoder_block_kernel,
        out_shape=jax.ShapeDtypeStruct((B, H2, W2, Cout), jnp.bfloat16),
        grid_spec=pltpu.PrefetchScalarGridSpec(
            num_scalar_prefetch=0,
            grid=(B, NT),
            in_specs=[
                # current row tile
                pl.BlockSpec((1, TH, W2, C1), lambda b, t: (b, t, 0, 0)),
                # 2-row halo above (clamped at the image top; zeroed in-kernel there)
                pl.BlockSpec((1, 2, W2, C1),
                             lambda b, t: (b, jnp.maximum(t * hb - 1, 0), 0, 0)),
                # 2-row halo below (clamped at the image bottom)
                pl.BlockSpec((1, 2, W2, C1),
                             lambda b, t: (b, jnp.minimum((t + 1) * hb, n_hblk - 1), 0, 0)),
                pl.BlockSpec((9, C1, Cout), lambda b, t: (0, 0, 0)),
                pl.BlockSpec((1, Cout), lambda b, t: (0, 0)),
                pl.BlockSpec((1, Cout), lambda b, t: (0, 0)),
                pl.BlockSpec((9, Cout, Cout), lambda b, t: (0, 0, 0)),
                pl.BlockSpec((1, Cout), lambda b, t: (0, 0)),
                pl.BlockSpec((1, Cout), lambda b, t: (0, 0)),
            ],
            out_specs=pl.BlockSpec((1, TH, W2, Cout), lambda b, t: (b, t, 0, 0)),
            scratch_shapes=[
                pltpu.VMEM((TH + 4, W2, C1), jnp.bfloat16),    # xc (row-haloed input)
                pltpu.VMEM((TH + 4, W2, C1), jnp.bfloat16),    # xl (dx=-1 shift)
                pltpu.VMEM((TH + 4, W2, C1), jnp.bfloat16),    # xr (dx=+1 shift)
                pltpu.VMEM((TH + 2, W2, Cout), jnp.bfloat16),  # mid (conv1 activation)
                pltpu.VMEM((TH + 2, W2, Cout), jnp.bfloat16),  # ml
                pltpu.VMEM((TH + 2, W2, Cout), jnp.bfloat16),  # mr
            ],
        ),
        compiler_params=pltpu.CompilerParams(
            dimension_semantics=("parallel", "parallel"),
            vmem_limit_bytes=48 * 1024 * 1024,
        ),
    )(x_bf16, x_bf16, x_bf16, w1f, s1, b1, w2f, s2, b2)


def init_decoder_block_params(key, in_channels, skip_channels, out_channels):
    """Deterministic synthetic parameters matching the module's shapes.

    BatchNorm2d in eval mode with fresh running stats (mean=0, var=1) folded into
    a per-channel (scale, bias).  Conv2dReLU with use_batchnorm=True has no conv bias.
    """
    c1_in = in_channels + skip_channels
    ks = jax.random.split(key, 6)
    eps = 1e-5

    def conv_w(k, cin, cout):
        fan_in = cin * 9
        bound = (1.0 / fan_in) ** 0.5
        # PyTorch layout (Cout, Cin, 3, 3) -> HWIO (3, 3, Cin, Cout)
        w = jax.random.uniform(k, (cout, cin, 3, 3), jnp.float32, -bound, bound)
        return jnp.transpose(w, (2, 3, 1, 0))

    def bn_affine(kg, kb, cout):
        gamma = jax.random.uniform(kg, (cout,), jnp.float32, 0.5, 1.5)
        beta = jax.random.uniform(kb, (cout,), jnp.float32, -0.5, 0.5)
        running_mean = jnp.zeros((cout,), jnp.float32)
        running_var = jnp.ones((cout,), jnp.float32)
        scale = gamma / jnp.sqrt(running_var + eps)
        bias = beta - running_mean * scale
        return scale, bias

    w1 = conv_w(ks[0], c1_in, out_channels)
    s1, b1 = bn_affine(ks[1], ks[2], out_channels)
    w2 = conv_w(ks[3], out_channels, out_channels)
    s2, b2 = bn_affine(ks[4], ks[5], out_channels)
    return dict(w1=w1, scale1=s1, bias1=b1, w2=w2, scale2=s2, bias2=b2)


def decoder_block_forward_nhwc(features_nhwc, skip_nhwc, params, tile_rows=None):
    """NHWC entry point (preferred when chaining decoder blocks, stays bf16)."""
    # nearest-2x upsample + channel concat: pure data movement in bf16.
    # TODO(synk): fold upsample+concat into the kernel (per-channel-group conv1
    # contraction) to remove this HBM-materialized intermediate.
    x = jnp.repeat(jnp.repeat(features_nhwc.astype(jnp.bfloat16), 2, axis=1), 2, axis=2)
    if skip_nhwc is not None:
        x = jnp.concatenate([x, skip_nhwc.astype(jnp.bfloat16)], axis=-1)
        # attention1 (attention_type=None) is identity
    # TODO(synk): only attention_type=None (Identity) is implemented; 'scse' not ported.
    out = _fused_double_conv(x, params["w1"], params["scale1"], params["bias1"],
                             params["w2"], params["scale2"], params["bias2"],
                             tile_rows=tile_rows)
    # attention2 (attention_type=None) is identity
    return out


def decoder_block_forward(features_nchw, skip_nchw, params, tile_rows=None):
    """NCHW wrapper matching the PyTorch module's interface (f32 out)."""
    f = jnp.transpose(features_nchw, (0, 2, 3, 1))
    s = jnp.transpose(skip_nchw, (0, 2, 3, 1)) if skip_nchw is not None else None
    out = decoder_block_forward_nhwc(f, s, params, tile_rows=tile_rows)
    return jnp.transpose(out, (0, 3, 1, 2)).astype(jnp.float32)


def _reference_forward(features_nchw, skip_nchw, params):
    """Pure-JAX reference mirroring the kernel's bf16 rounding points."""
    bf = lambda a: a.astype(jnp.bfloat16).astype(jnp.float32)
    x = jnp.transpose(features_nchw, (0, 2, 3, 1))
    x = jnp.repeat(jnp.repeat(x, 2, axis=1), 2, axis=2)
    if skip_nchw is not None:
        x = jnp.concatenate([x, jnp.transpose(skip_nchw, (0, 2, 3, 1))], axis=-1)
    x = bf(x)                       # kernel input is bf16 in HBM

    def conv(x, w, scale, bias):
        y = jax.lax.conv_general_dilated(
            x, bf(w), window_strides=(1, 1), padding="SAME",
            dimension_numbers=("NHWC", "HWIO", "NHWC"),
            precision=jax.lax.Precision.HIGHEST)
        return jnp.maximum(y * scale + bias, 0.0)

    x = conv(x, params["w1"], params["scale1"], params["bias1"])
    x = bf(x)                       # conv1 activation stored bf16 in the kernel
    x = conv(x, params["w2"], params["scale2"], params["bias2"])
    x = bf(x)                       # kernel emits bf16 output
    return jnp.transpose(x, (0, 3, 1, 2))


if __name__ == "__main__":
    key = jax.random.PRNGKey(0)
    k_feat, k_skip, k_par = jax.random.split(key, 3)

    B = 2
    in_channels, skip_channels, out_channels = 4, 4, 8
    H = W = 8  # encoder feature spatial size; skip / output are 2H x 2W

    features = jax.random.normal(k_feat, (B, in_channels, H, W), jnp.float32)
    skip = jax.random.normal(k_skip, (B, skip_channels, 2 * H, 2 * W), jnp.float32)
    params = init_decoder_block_params(k_par, in_channels, skip_channels, out_channels)

    ref = jax.block_until_ready(_reference_forward(features, skip, params))

    # Run once with the default tile choice and once with an explicit multi-tile
    # configuration so the row-halo path (interior + boundary tiles) is exercised.
    for tr in (None, 4):
        fwd = jax.jit(lambda f, s, p, tr=tr: decoder_block_forward(f, s, p, tile_rows=tr))
        out = jax.block_until_ready(fwd(features, skip, params))
        assert out.shape == (B, out_channels, 2 * H, 2 * W), out.shape
        max_err = float(jnp.max(jnp.abs(out - ref)))
        assert jnp.allclose(out, ref, atol=1e-2, rtol=1e-2), (tr, max_err)

    print("KERNEL_OK")
</pallas_src>

<mosaic_0001>
module attributes {stable_mosaic.version = 11 : i64} {
  func.func @_decoder_block_kernel(%arg0: i32, %arg1: i32, %arg2: memref<1x16x16x8xbf16, #tpu.memory_space<vmem>>, %arg3: memref<1x2x16x8xbf16, #tpu.memory_space<vmem>>, %arg4: memref<1x2x16x8xbf16, #tpu.memory_space<vmem>>, %arg5: memref<9x8x8xbf16, #tpu.memory_space<vmem>>, %arg6: memref<1x8xf32, #tpu.memory_space<vmem>>, %arg7: memref<1x8xf32, #tpu.memory_space<vmem>>, %arg8: memref<9x8x8xbf16, #tpu.memory_space<vmem>>, %arg9: memref<1x8xf32, #tpu.memory_space<vmem>>, %arg10: memref<1x8xf32, #tpu.memory_space<vmem>>, %arg11: memref<1x16x16x8xbf16, #tpu.memory_space<vmem>>, %arg12: memref<20x16x8xbf16, #tpu.memory_space<vmem>>, %arg13: memref<20x16x8xbf16, #tpu.memory_space<vmem>>, %arg14: memref<20x16x8xbf16, #tpu.memory_space<vmem>>, %arg15: memref<18x16x8xbf16, #tpu.memory_space<vmem>>, %arg16: memref<18x16x8xbf16, #tpu.memory_space<vmem>>, %arg17: memref<18x16x8xbf16, #tpu.memory_space<vmem>>) attributes {dimension_semantics = [#tpu.dimension_semantics<parallel>, #tpu.dimension_semantics<parallel>], iteration_bounds = array<i64: 2, 1>, scalar_prefetch = 0 : i64, scratch_operands = 6 : i64, tpu.core_type = #tpu.core_type<tc>, window_params = [{transform_indices = @transform_0, window_bounds = array<i64: 1, 16, 16, 8>}, {transform_indices = @transform_1, window_bounds = array<i64: 1, 2, 16, 8>}, {transform_indices = @transform_2, window_bounds = array<i64: 1, 2, 16, 8>}, {pipeline_mode = #tpu.pipeline_mode<synchronous>, transform_indices = @transform_3, window_bounds = array<i64: 9, 8, 8>}, {pipeline_mode = #tpu.pipeline_mode<synchronous>, transform_indices = @transform_4, window_bounds = array<i64: 1, 8>}, {pipeline_mode = #tpu.pipeline_mode<synchronous>, transform_indices = @transform_5, window_bounds = array<i64: 1, 8>}, {pipeline_mode = #tpu.pipeline_mode<synchronous>, transform_indices = @transform_6, window_bounds = array<i64: 9, 8, 8>}, {pipeline_mode = #tpu.pipeline_mode<synchronous>, transform_indices = @transform_7, window_bounds = array<i64: 1, 8>}, {pipeline_mode = #tpu.pipeline_mode<synchronous>, transform_indices = @transform_8, window_bounds = array<i64: 1, 8>}, {transform_indices = @transform_9, window_bounds = array<i64: 1, 16, 16, 8>}]} {
    %c0 = arith.constant 0 : index
    %c0_0 = arith.constant 0 : index
    %c0_1 = arith.constant 0 : index
    %c0_2 = arith.constant 0 : index
    %0 = vector.load %arg2[%c0, %c0_0, %c0_1, %c0_2] : memref<1x16x16x8xbf16, #tpu.memory_space<vmem>>, vector<1x16x16x8xbf16>
    %1 = vector.shape_cast %0 : vector<1x16x16x8xbf16> to vector<16x16x8xbf16>
    %c2 = arith.constant 2 : index
    %c0_3 = arith.constant 0 : index
    %c0_4 = arith.constant 0 : index
    %2 = vector.load %arg12[%c2, %c0_3, %c0_4] : memref<20x16x8xbf16, #tpu.memory_space<vmem>>, vector<16x16x8xbf16>
    tpu.vector_store %arg12[%c2, %c0_3, %c0_4], %1 {strides = array<i32>} : memref<20x16x8xbf16, #tpu.memory_space<vmem>>, vector<16x16x8xbf16>,
    %c0_i32 = arith.constant 0 : i32
    %3 = arith.cmpi eq, %arg1, %c0_i32 : i32
    %4 = arith.extui %3 : i1 to i32
    %c0_i32_5 = arith.constant 0 : i32
    %5 = arith.cmpi ne, %4, %c0_i32_5 : i32
    scf.if %5 {
      %cst_190 = arith.constant 0.000000e+00 : bf16
      %173 = vector.broadcast %cst_190 : bf16 to vector<2x16x8xbf16>
      %c0_191 = arith.constant 0 : index
      %c0_192 = arith.constant 0 : index
      %c0_193 = arith.constant 0 : index
      %174 = vector.load %arg12[%c0_191, %c0_192, %c0_193] : memref<20x16x8xbf16, #tpu.memory_space<vmem>>, vector<2x16x8xbf16>
      tpu.vector_store %arg12[%c0_191, %c0_192, %c0_193], %173 {strides = array<i32>} : memref<20x16x8xbf16, #tpu.memory_space<vmem>>, vector<2x16x8xbf16>,
    } else {
    }
    %c0_i32_6 = arith.constant 0 : i32
    %6 = arith.cmpi sgt, %arg1, %c0_i32_6 : i32
    %7 = arith.extui %6 : i1 to i32
    %c0_i32_7 = arith.constant 0 : i32
    %8 = arith.cmpi ne, %7, %c0_i32_7 : i32
    scf.if %8 {
      %c0_190 = arith.constant 0 : index
      %c0_191 = arith.constant 0 : index
      %c0_192 = arith.constant 0 : index
      %c0_193 = arith.constant 0 : index
      %173 = vector.load %arg3[%c0_190, %c0_191, %c0_192, %c0_193] : memref<1x2x16x8xbf16, #tpu.memory_space<vmem>>, vector<1x2x16x8xbf16>
      %174 = vector.shape_cast %173 : vector<1x2x16x8xbf16> to vector<2x16x8xbf16>
      %c0_194 = arith.constant 0 : index
      %c0_195 = arith.constant 0 : index
      %c0_196 = arith.constant 0 : index
      %175 = vector.load %arg12[%c0_194, %c0_195, %c0_196] : memref<20x16x8xbf16, #tpu.memory_space<vmem>>, vector<2x16x8xbf16>
      tpu.vector_store %arg12[%c0_194, %c0_195, %c0_196], %174 {strides = array<i32>} : memref<20x16x8xbf16, #tpu.memory_space<vmem>>, vector<2x16x8xbf16>,
    } else {
    }
    %c0_i32_8 = arith.constant 0 : i32
    %9 = arith.cmpi eq, %arg1, %c0_i32_8 : i32
    %10 = arith.extui %9 : i1 to i32
    %c0_i32_9 = arith.constant 0 : i32
    %11 = arith.cmpi ne, %10, %c0_i32_9 : i32
    scf.if %11 {
      %cst_190 = arith.constant 0.000000e+00 : bf16
      %173 = vector.broadcast %cst_190 : bf16 to vector<2x16x8xbf16>
      %c18 = arith.constant 18 : index
      %c0_191 = arith.constant 0 : index
      %c0_192 = arith.constant 0 : index
      %174 = vector.load %arg12[%c18, %c0_191, %c0_192] : memref<20x16x8xbf16, #tpu.memory_space<vmem>>, vector<2x16x8xbf16>
      tpu.vector_store %arg12[%c18, %c0_191, %c0_192], %173 {strides = array<i32>} : memref<20x16x8xbf16, #tpu.memory_space<vmem>>, vector<2x16x8xbf16>,
    } else {
    }
    %c0_i32_10 = arith.constant 0 : i32
    %12 = arith.cmpi slt, %arg1, %c0_i32_10 : i32
    %13 = arith.extui %12 : i1 to i32
    %c0_i32_11 = arith.constant 0 : i32
    %14 = arith.cmpi ne, %13, %c0_i32_11 : i32
    scf.if %14 {
      %c0_190 = arith.constant 0 : index
      %c0_191 = arith.constant 0 : index
      %c0_192 = arith.constant 0 : index
      %c0_193 = arith.constant 0 : index
      %173 = vector.load %arg4[%c0_190, %c0_191, %c0_192, %c0_193] : memref<1x2x16x8xbf16, #tpu.memory_space<vmem>>, vector<1x2x16x8xbf16>
      %174 = vector.shape_cast %173 : vector<1x2x16x8xbf16> to vector<2x16x8xbf16>
      %c18 = arith.constant 18 : index
      %c0_194 = arith.constant 0 : index
      %c0_195 = arith.constant 0 : index
      %175 = vector.load %arg12[%c18, %c0_194, %c0_195] : memref<20x16x8xbf16, #tpu.memory_space<vmem>>, vector<2x16x8xbf16>
      tpu.vector_store %arg12[%c18, %c0_194, %c0_195], %174 {strides = array<i32>} : memref<20x16x8xbf16, #tpu.memory_space<vmem>>, vector<2x16x8xbf16>,
    } else {
    }
    %c0_12 = arith.constant 0 : index
    %c0_13 = arith.constant 0 : index
    %c0_14 = arith.constant 0 : index
    %15 = vector.load %arg12[%c0_12, %c0_13, %c0_14] : memref<20x16x8xbf16, #tpu.memory_space<vmem>>, vector<20x15x8xbf16>
    %c0_15 = arith.constant 0 : index
    %c1 = arith.constant 1 : index
    %c0_16 = arith.constant 0 : index
    %16 = vector.load %arg13[%c0_15, %c1, %c0_16] : memref<20x16x8xbf16, #tpu.memory_space<vmem>>, vector<20x15x8xbf16>
    tpu.vector_store %arg13[%c0_15, %c1, %c0_16], %15 {strides = array<i32>} : memref<20x16x8xbf16, #tpu.memory_space<vmem>>, vector<20x15x8xbf16>,
    %cst = arith.constant 0.000000e+00 : bf16
    %17 = vector.broadcast %cst : bf16 to vector<20x1x8xbf16>
    %c0_17 = arith.constant 0 : index
    %c0_18 = arith.constant 0 : index
    %c0_19 = arith.constant 0 : index
    %18 = vector.load %arg13[%c0_17, %c0_18, %c0_19] : memref<20x16x8xbf16, #tpu.memory_space<vmem>>, vector<20x1x8xbf16>
    tpu.vector_store %arg13[%c0_17, %c0_18, %c0_19], %17 {strides = array<i32>} : memref<20x16x8xbf16, #tpu.memory_space<vmem>>, vector<20x1x8xbf16>,
    %c0_20 = arith.constant 0 : index
    %c1_21 = arith.constant 1 : index
    %c0_22 = arith.constant 0 : index
    %19 = vector.load %arg12[%c0_20, %c1_21, %c0_22] : memref<20x16x8xbf16, #tpu.memory_space<vmem>>, vector<20x15x8xbf16>
    %c0_23 = arith.constant 0 : index
    %c0_24 = arith.constant 0 : index
    %c0_25 = arith.constant 0 : index
    %20 = vector.load %arg14[%c0_23, %c0_24, %c0_25] : memref<20x16x8xbf16, #tpu.memory_space<vmem>>, vector<20x15x8xbf16>
    tpu.vector_store %arg14[%c0_23, %c0_24, %c0_25], %19 {strides = array<i32>} : memref<20x16x8xbf16, #tpu.memory_space<vmem>>, vector<20x15x8xbf16>,
    %cst_26 = arith.constant 0.000000e+00 : bf16
    %21 = vector.broadcast %cst_26 : bf16 to vector<20x1x8xbf16>
    %c0_27 = arith.constant 0 : index
    %c15 = arith.constant 15 : index
    %c0_28 = arith.constant 0 : index
    %22 = vector.load %arg14[%c0_27, %c15, %c0_28] : memref<20x16x8xbf16, #tpu.memory_space<vmem>>, vector<20x1x8xbf16>
    tpu.vector_store %arg14[%c0_27, %c15, %c0_28], %21 {strides = array<i32>} : memref<20x16x8xbf16, #tpu.memory_space<vmem>>, vector<20x1x8xbf16>,
    %c0_29 = arith.constant 0 : index
    %c0_30 = arith.constant 0 : index
    %c0_31 = arith.constant 0 : index
    %23 = vector.load %arg13[%c0_29, %c0_30, %c0_31] : memref<20x16x8xbf16, #tpu.memory_space<vmem>>, vector<18x16x8xbf16>
    %24 = vector.shape_cast %23 : vector<18x16x8xbf16> to vector<288x8xbf16>
    %c0_32 = arith.constant 0 : index
    %c0_33 = arith.constant 0 : index
    %c0_34 = arith.constant 0 : index
    %25 = vector.load %arg5[%c0_32, %c0_33, %c0_34] : memref<9x8x8xbf16, #tpu.memory_space<vmem>>, vector<1x8x8xbf16>
    %26 = vector.shape_cast %25 : vector<1x8x8xbf16> to vector<8x8xbf16>
    %cst_35 = arith.constant dense<0.000000e+00> : vector<288x8xf32>
    %27 = tpu.matmul %24, %26, %cst_35 {dimension_numbers = #tpu.dot_dimension_numbers<[1], [0], [0], [1], [0, 0, 1, 1], [], []>} : vector<288x8xbf16>, vector<8x8xbf16>, vector<288x8xf32> -> vector<288x8xf32>
    %c0_36 = arith.constant 0 : index
    %c0_37 = arith.constant 0 : index
    %c0_38 = arith.constant 0 : index
    %28 = vector.load %arg12[%c0_36, %c0_37, %c0_38] : memref<20x16x8xbf16, #tpu.memory_space<vmem>>, vector<18x16x8xbf16>
    %29 = vector.shape_cast %28 : vector<18x16x8xbf16> to vector<288x8xbf16>
    %c1_39 = arith.constant 1 : index
    %c0_40 = arith.constant 0 : index
    %c0_41 = arith.constant 0 : index
    %30 = vector.load %arg5[%c1_39, %c0_40, %c0_41] : memref<9x8x8xbf16, #tpu.memory_space<vmem>>, vector<1x8x8xbf16>
    %31 = vector.shape_cast %30 : vector<1x8x8xbf16> to vector<8x8xbf16>
    %cst_42 = arith.constant dense<0.000000e+00> : vector<288x8xf32>
    %32 = tpu.matmul %29, %31, %cst_42 {dimension_numbers = #tpu.dot_dimension_numbers<[1], [0], [0], [1], [0, 0, 1, 1], [], []>} : vector<288x8xbf16>, vector<8x8xbf16>, vector<288x8xf32> -> vector<288x8xf32>
    %33 = arith.addf %27, %32 : vector<288x8xf32>
    %c0_43 = arith.constant 0 : index
    %c0_44 = arith.constant 0 : index
    %c0_45 = arith.constant 0 : index
    %34 = vector.load %arg14[%c0_43, %c0_44, %c0_45] : memref<20x16x8xbf16, #tpu.memory_space<vmem>>, vector<18x16x8xbf16>
    %35 = vector.shape_cast %34 : vector<18x16x8xbf16> to vector<288x8xbf16>
    %c2_46 = arith.constant 2 : index
    %c0_47 = arith.constant 0 : index
    %c0_48 = arith.constant 0 : index
    %36 = vector.load %arg5[%c2_46, %c0_47, %c0_48] : memref<9x8x8xbf16, #tpu.memory_space<vmem>>, vector<1x8x8xbf16>
    %37 = vector.shape_cast %36 : vector<1x8x8xbf16> to vector<8x8xbf16>
    %cst_49 = arith.constant dense<0.000000e+00> : vector<288x8xf32>
    %38 = tpu.matmul %35, %37, %cst_49 {dimension_numbers = #tpu.dot_dimension_numbers<[1], [0], [0], [1], [0, 0, 1, 1], [], []>} : vector<288x8xbf16>, vector<8x8xbf16>, vector<288x8xf32> -> vector<288x8xf32>
    %39 = arith.addf %33, %38 : vector<288x8xf32>
    %c1_50 = arith.constant 1 : index
    %c0_51 = arith.constant 0 : index
    %c0_52 = arith.constant 0 : index
    %40 = vector.load %arg13[%c1_50, %c0_51, %c0_52] : memref<20x16x8xbf16, #tpu.memory_space<vmem>>, vector<18x16x8xbf16>
    %41 = vector.shape_cast %40 : vector<18x16x8xbf16> to vector<288x8xbf16>
    %c3 = arith.constant 3 : index
    %c0_53 = arith.constant 0 : index
    %c0_54 = arith.constant 0 : index
    %42 = vector.load %arg5[%c3, %c0_53, %c0_54] : memref<9x8x8xbf16, #tpu.memory_space<vmem>>, vector<1x8x8xbf16>
    %43 = vector.shape_cast %42 : vector<1x8x8xbf16> to vector<8x8xbf16>
    %cst_55 = arith.constant dense<0.000000e+00> : vector<288x8xf32>
    %44 = tpu.matmul %41, %43, %cst_55 {dimension_numbers = #tpu.dot_dimension_numbers<[1], [0], [0], [1], [0, 0, 1, 1], [], []>} : vector<288x8xbf16>, vector<8x8xbf16>, vector<288x8xf32> -> vector<288x8xf32>
    %45 = arith.addf %39, %44 : vector<288x8xf32>
    %c1_56 = arith.constant 1 : index
    %c0_57 = arith.constant 0 : index
    %c0_58 = arith.constant 0 : index
    %46 = vector.load %arg12[%c1_56, %c0_57, %c0_58] : memref<20x16x8xbf16, #tpu.memory_space<vmem>>, vector<18x16x8xbf16>
    %47 = vector.shape_cast %46 : vector<18x16x8xbf16> to vector<288x8xbf16>
    %c4 = arith.constant 4 : index
    %c0_59 = arith.constant 0 : index
    %c0_60 = arith.constant 0 : index
    %48 = vector.load %arg5[%c4, %c0_59, %c0_60] : memref<9x8x8xbf16, #tpu.memory_space<vmem>>, vector<1x8x8xbf16>
    %49 = vector.shape_cast %48 : vector<1x8x8xbf16> to vector<8x8xbf16>
    %cst_61 = arith.constant dense<0.000000e+00> : vector<288x8xf32>
    %50 = tpu.matmul %47, %49, %cst_61 {dimension_numbers = #tpu.dot_dimension_numbers<[1], [0], [0], [1], [0, 0, 1, 1], [], []>} : vector<288x8xbf16>, vector<8x8xbf16>, vector<288x8xf32> -> vector<288x8xf32>
    %51 = arith.addf %45, %50 : vector<288x8xf32>
    %c1_62 = arith.constant 1 : index
    %c0_63 = arith.constant 0 : index
    %c0_64 = arith.constant 0 : index
    %52 = vector.load %arg14[%c1_62, %c0_63, %c0_64] : memref<20x16x8xbf16, #tpu.memory_space<vmem>>, vector<18x16x8xbf16>
    %53 = vector.shape_cast %52 : vector<18x16x8xbf16> to vector<288x8xbf16>
    %c5 = arith.constant 5 : index
    %c0_65 = arith.constant 0 : index
    %c0_66 = arith.constant 0 : index
    %54 = vector.load %arg5[%c5, %c0_65, %c0_66] : memref<9x8x8xbf16, #tpu.memory_space<vmem>>, vector<1x8x8xbf16>
    %55 = vector.shape_cast %54 : vector<1x8x8xbf16> to vector<8x8xbf16>
    %cst_67 = arith.constant dense<0.000000e+00> : vector<288x8xf32>
    %56 = tpu.matmul %53, %55, %cst_67 {dimension_numbers = #tpu.dot_dimension_numbers<[1], [0], [0], [1], [0, 0, 1, 1], [], []>} : vector<288x8xbf16>, vector<8x8xbf16>, vector<288x8xf32> -> vector<288x8xf32>
    %57 = arith.addf %51, %56 : vector<288x8xf32>
    %c2_68 = arith.constant 2 : index
    %c0_69 = arith.constant 0 : index
    %c0_70 = arith.constant 0 : index
    %58 = vector.load %arg13[%c2_68, %c0_69, %c0_70] : memref<20x16x8xbf16, #tpu.memory_space<vmem>>, vector<18x16x8xbf16>
    %59 = vector.shape_cast %58 : vector<18x16x8xbf16> to vector<288x8xbf16>
    %c6 = arith.constant 6 : index
    %c0_71 = arith.constant 0 : index
    %c0_72 = arith.constant 0 : index
    %60 = vector.load %arg5[%c6, %c0_71, %c0_72] : memref<9x8x8xbf16, #tpu.memory_space<vmem>>, vector<1x8x8xbf16>
    %61 = vector.shape_cast %60 : vector<1x8x8xbf16> to vector<8x8xbf16>
    %cst_73 = arith.constant dense<0.000000e+00> : vector<288x8xf32>
    %62 = tpu.matmul %59, %61, %cst_73 {dimension_numbers = #tpu.dot_dimension_numbers<[1], [0], [0], [1], [0, 0, 1, 1], [], []>} : vector<288x8xbf16>, vector<8x8xbf16>, vector<288x8xf32> -> vector<288x8xf32>
    %63 = arith.addf %57, %62 : vector<288x8xf32>
    %c2_74 = arith.constant 2 : index
    %c0_75 = arith.constant 0 : index
    %c0_76 = arith.constant 0 : index
    %64 = vector.load %arg12[%c2_74, %c0_75, %c0_76] : memref<20x16x8xbf16, #tpu.memory_space<vmem>>, vector<18x16x8xbf16>
    %65 = vector.shape_cast %64 : vector<18x16x8xbf16> to vector<288x8xbf16>
    %c7 = arith.constant 7 : index
    %c0_77 = arith.constant 0 : index
    %c0_78 = arith.constant 0 : index
    %66 = vector.load %arg5[%c7, %c0_77, %c0_78] : memref<9x8x8xbf16, #tpu.memory_space<vmem>>, vector<1x8x8xbf16>
    %67 = vector.shape_cast %66 : vector<1x8x8xbf16> to vector<8x8xbf16>
    %cst_79 = arith.constant dense<0.000000e+00> : vector<288x8xf32>
    %68 = tpu.matmul %65, %67, %cst_79 {dimension_numbers = #tpu.dot_dimension_numbers<[1], [0], [0], [1], [0, 0, 1, 1], [], []>} : vector<288x8xbf16>, vector<8x8xbf16>, vector<288x8xf32> -> vector<288x8xf32>
    %69 = arith.addf %63, %68 : vector<288x8xf32>
    %c2_80 = arith.constant 2 : index
    %c0_81 = arith.constant 0 : index
    %c0_82 = arith.constant 0 : index
    %70 = vector.load %arg14[%c2_80, %c0_81, %c0_82] : memref<20x16x8xbf16, #tpu.memory_space<vmem>>, vector<18x16x8xbf16>
    %71 = vector.shape_cast %70 : vector<18x16x8xbf16> to vector<288x8xbf16>
    %c8 = arith.constant 8 : index
    %c0_83 = arith.constant 0 : index
    %c0_84 = arith.constant 0 : index
    %72 = vector.load %arg5[%c8, %c0_83, %c0_84] : memref<9x8x8xbf16, #tpu.memory_space<vmem>>, vector<1x8x8xbf16>
    %73 = vector.shape_cast %72 : vector<1x8x8xbf16> to vector<8x8xbf16>
    %cst_85 = arith.constant dense<0.000000e+00> : vector<288x8xf32>
    %74 = tpu.matmul %71, %73, %cst_85 {dimension_numbers = #tpu.dot_dimension_numbers<[1], [0], [0], [1], [0, 0, 1, 1], [], []>} : vector<288x8xbf16>, vector<8x8xbf16>, vector<288x8xf32> -> vector<288x8xf32>
    %75 = arith.addf %69, %74 : vector<288x8xf32>
    %c0_86 = arith.constant 0 : index
    %c0_87 = arith.constant 0 : index
    %76 = vector.load %arg6[%c0_86, %c0_87] : memref<1x8xf32, #tpu.memory_space<vmem>>, vector<1x8xf32>
    %77 = vector.shape_cast %76 : vector<1x8xf32> to vector<8xf32>
    %78 = vector.shape_cast %77 : vector<8xf32> to vector<1x8xf32>
    %79 = vector.broadcast %78 : vector<1x8xf32> to vector<288x8xf32>
    %80 = arith.mulf %75, %79 : vector<288x8xf32>
    %c0_88 = arith.constant 0 : index
    %c0_89 = arith.constant 0 : index
    %81 = vector.load %arg7[%c0_88, %c0_89] : memref<1x8xf32, #tpu.memory_space<vmem>>, vector<1x8xf32>
    %82 = vector.shape_cast %81 : vector<1x8xf32> to vector<8xf32>
    %83 = vector.shape_cast %82 : vector<8xf32> to vector<1x8xf32>
    %84 = vector.broadcast %83 : vector<1x8xf32> to vector<288x8xf32>
    %85 = arith.addf %80, %84 : vector<288x8xf32>
    %cst_90 = arith.constant 0.000000e+00 : f32
    %86 = vector.broadcast %cst_90 : f32 to vector<288x8xf32>
    %87 = arith.maximumf %85, %86 : vector<288x8xf32>
    %88 = vector.shape_cast %87 : vector<288x8xf32> to vector<18x16x8xf32>
    %89 = arith.truncf %88 : vector<18x16x8xf32> to vector<18x16x8xbf16>
    %c0_91 = arith.constant 0 : index
    %c0_92 = arith.constant 0 : index
    %c0_93 = arith.constant 0 : index
    %90 = vector.load %arg15[%c0_91, %c0_92, %c0_93] : memref<18x16x8xbf16, #tpu.memory_space<vmem>>, vector<18x16x8xbf16>
    tpu.vector_store %arg15[%c0_91, %c0_92, %c0_93], %89 {strides = array<i32>} : memref<18x16x8xbf16, #tpu.memory_space<vmem>>, vector<18x16x8xbf16>,
    %c0_i32_94 = arith.constant 0 : i32
    %91 = arith.cmpi eq, %arg1, %c0_i32_94 : i32
    %92 = arith.extui %91 : i1 to i32
    %c0_i32_95 = arith.constant 0 : i32
    %93 = arith.cmpi ne, %92, %c0_i32_95 : i32
    scf.if %93 {
      %cst_190 = arith.constant 0.000000e+00 : bf16
      %173 = vector.broadcast %cst_190 : bf16 to vector<1x16x8xbf16>
      %c0_191 = arith.constant 0 : index
      %c0_192 = arith.constant 0 : index
      %c0_193 = arith.constant 0 : index
      %174 = vector.load %arg15[%c0_191, %c0_192, %c0_193] : memref<18x16x8xbf16, #tpu.memory_space<vmem>>, vector<1x16x8xbf16>
      tpu.vector_store %arg15[%c0_191, %c0_192, %c0_193], %173 {strides = array<i32>} : memref<18x16x8xbf16, #tpu.memory_space<vmem>>, vector<1x16x8xbf16>,
    } else {
    }
    %c0_i32_96 = arith.constant 0 : i32
    %94 = arith.cmpi eq, %arg1, %c0_i32_96 : i32
    %95 = arith.extui %94 : i1 to i32
    %c0_i32_97 = arith.constant 0 : i32
    %96 = arith.cmpi ne, %95, %c0_i32_97 : i32
    scf.if %96 {
      %cst_190 = arith.constant 0.000000e+00 : bf16
      %173 = vector.broadcast %cst_190 : bf16 to vector<1x16x8xbf16>
      %c17 = arith.constant 17 : index
      %c0_191 = arith.constant 0 : index
      %c0_192 = arith.constant 0 : index
      %174 = vector.load %arg15[%c17, %c0_191, %c0_192] : memref<18x16x8xbf16, #tpu.memory_space<vmem>>, vector<1x16x8xbf16>
      tpu.vector_store %arg15[%c17, %c0_191, %c0_192], %173 {strides = array<i32>} : memref<18x16x8xbf16, #tpu.memory_space<vmem>>, vector<1x16x8xbf16>,
    } else {
    }
    %c0_98 = arith.constant 0 : index
    %c0_99 = arith.constant 0 : index
    %c0_100 = arith.constant 0 : index
    %97 = vector.load %arg15[%c0_98, %c0_99, %c0_100] : memref<18x16x8xbf16, #tpu.memory_space<vmem>>, vector<18x15x8xbf16>
    %c0_101 = arith.constant 0 : index
    %c1_102 = arith.constant 1 : index
    %c0_103 = arith.constant 0 : index
    %98 = vector.load %arg16[%c0_101, %c1_102, %c0_103] : memref<18x16x8xbf16, #tpu.memory_space<vmem>>, vector<18x15x8xbf16>
    tpu.vector_store %arg16[%c0_101, %c1_102, %c0_103], %97 {strides = array<i32>} : memref<18x16x8xbf16, #tpu.memory_space<vmem>>, vector<18x15x8xbf16>,
    %cst_104 = arith.constant 0.000000e+00 : bf16
    %99 = vector.broadcast %cst_104 : bf16 to vector<18x1x8xbf16>
    %c0_105 = arith.constant 0 : index
    %c0_106 = arith.constant 0 : index
    %c0_107 = arith.constant 0 : index
    %100 = vector.load %arg16[%c0_105, %c0_106, %c0_107] : memref<18x16x8xbf16, #tpu.memory_space<vmem>>, vector<18x1x8xbf16>
    tpu.vector_store %arg16[%c0_105, %c0_106, %c0_107], %99 {strides = array<i32>} : memref<18x16x8xbf16, #tpu.memory_space<vmem>>, vector<18x1x8xbf16>,
    %c0_108 = arith.constant 0 : index
    %c1_109 = arith.constant 1 : index
    %c0_110 = arith.constant 0 : index
    %101 = vector.load %arg15[%c0_108, %c1_109, %c0_110] : memref<18x16x8xbf16, #tpu.memory_space<vmem>>, vector<18x15x8xbf16>
    %c0_111 = arith.constant 0 : index
    %c0_112 = arith.constant 0 : index
    %c0_113 = arith.constant 0 : index
    %102 = vector.load %arg17[%c0_111, %c0_112, %c0_113] : memref<18x16x8xbf16, #tpu.memory_space<vmem>>, vector<18x15x8xbf16>
    tpu.vector_store %arg17[%c0_111, %c0_112, %c0_113], %101 {strides = array<i32>} : memref<18x16x8xbf16, #tpu.memory_space<vmem>>, vector<18x15x8xbf16>,
    %cst_114 = arith.constant 0.000000e+00 : bf16
    %103 = vector.broadcast %cst_114 : bf16 to vector<18x1x8xbf16>
    %c0_115 = arith.constant 0 : index
    %c15_116 = arith.constant 15 : index
    %c0_117 = arith.constant 0 : index
    %104 = vector.load %arg17[%c0_115, %c15_116, %c0_117] : memref<18x16x8xbf16, #tpu.memory_space<vmem>>, vector<18x1x8xbf16>
    tpu.vector_store %arg17[%c0_115, %c15_116, %c0_117], %103 {strides = array<i32>} : memref<18x16x8xbf16, #tpu.memory_space<vmem>>, vector<18x1x8xbf16>,
    %c0_118 = arith.constant 0 : index
    %c0_119 = arith.constant 0 : index
    %c0_120 = arith.constant 0 : index
    %105 = vector.load %arg16[%c0_118, %c0_119, %c0_120] : memref<18x16x8xbf16, #tpu.memory_space<vmem>>, vector<16x16x8xbf16>
    %106 = vector.shape_cast %105 : vector<16x16x8xbf16> to vector<256x8xbf16>
    %c0_121 = arith.constant 0 : index
    %c0_122 = arith.constant 0 : index
    %c0_123 = arith.constant 0 : index
    %107 = vector.load %arg8[%c0_121, %c0_122, %c0_123] : memref<9x8x8xbf16, #tpu.memory_space<vmem>>, vector<1x8x8xbf16>
    %108 = vector.shape_cast %107 : vector<1x8x8xbf16> to vector<8x8xbf16>
    %cst_124 = arith.constant dense<0.000000e+00> : vector<256x8xf32>
    %109 = tpu.matmul %106, %108, %cst_124 {dimension_numbers = #tpu.dot_dimension_numbers<[1], [0], [0], [1], [0, 0, 1, 1], [], []>} : vector<256x8xbf16>, vector<8x8xbf16>, vector<256x8xf32> -> vector<256x8xf32>
    %c0_125 = arith.constant 0 : index
    %c0_126 = arith.constant 0 : index
    %c0_127 = arith.constant 0 : index
    %110 = vector.load %arg15[%c0_125, %c0_126, %c0_127] : memref<18x16x8xbf16, #tpu.memory_space<vmem>>, vector<16x16x8xbf16>
    %111 = vector.shape_cast %110 : vector<16x16x8xbf16> to vector<256x8xbf16>
    %c1_128 = arith.constant 1 : index
    %c0_129 = arith.constant 0 : index
    %c0_130 = arith.constant 0 : index
    %112 = vector.load %arg8[%c1_128, %c0_129, %c0_130] : memref<9x8x8xbf16, #tpu.memory_space<vmem>>, vector<1x8x8xbf16>
    %113 = vector.shape_cast %112 : vector<1x8x8xbf16> to vector<8x8xbf16>
    %cst_131 = arith.constant dense<0.000000e+00> : vector<256x8xf32>
    %114 = tpu.matmul %111, %113, %cst_131 {dimension_numbers = #tpu.dot_dimension_numbers<[1], [0], [0], [1], [0, 0, 1, 1], [], []>} : vector<256x8xbf16>, vector<8x8xbf16>, vector<256x8xf32> -> vector<256x8xf32>
    %115 = arith.addf %109, %114 : vector<256x8xf32>
    %c0_132 = arith.constant 0 : index
    %c0_133 = arith.constant 0 : index
    %c0_134 = arith.constant 0 : index
    %116 = vector.load %arg17[%c0_132, %c0_133, %c0_134] : memref<18x16x8xbf16, #tpu.memory_space<vmem>>, vector<16x16x8xbf16>
    %117 = vector.shape_cast %116 : vector<16x16x8xbf16> to vector<256x8xbf16>
    %c2_135 = arith.constant 2 : index
    %c0_136 = arith.constant 0 : index
    %c0_137 = arith.constant 0 : index
    %118 = vector.load %arg8[%c2_135, %c0_136, %c0_137] : memref<9x8x8xbf16, #tpu.memory_space<vmem>>, vector<1x8x8xbf16>
    %119 = vector.shape_cast %118 : vector<1x8x8xbf16> to vector<8x8xbf16>
    %cst_138 = arith.constant dense<0.000000e+00> : vector<256x8xf32>
    %120 = tpu.matmul %117, %119, %cst_138 {dimension_numbers = #tpu.dot_dimension_numbers<[1], [0], [0], [1], [0, 0, 1, 1], [], []>} : vector<256x8xbf16>, vector<8x8xbf16>, vector<256x8xf32> -> vector<256x8xf32>
    %121 = arith.addf %115, %120 : vector<256x8xf32>
    %c1_139 = arith.constant 1 : index
    %c0_140 = arith.constant 0 : index
    %c0_141 = arith.constant 0 : index
    %122 = vector.load %arg16[%c1_139, %c0_140, %c0_141] : memref<18x16x8xbf16, #tpu.memory_space<vmem>>, vector<16x16x8xbf16>
    %123 = vector.shape_cast %122 : vector<16x16x8xbf16> to vector<256x8xbf16>
    %c3_142 = arith.constant 3 : index
    %c0_143 = arith.constant 0 : index
    %c0_144 = arith.constant 0 : index
    %124 = vector.load %arg8[%c3_142, %c0_143, %c0_144] : memref<9x8x8xbf16, #tpu.memory_space<vmem>>, vector<1x8x8xbf16>
    %125 = vector.shape_cast %124 : vector<1x8x8xbf16> to vector<8x8xbf16>
    %cst_145 = arith.constant dense<0.000000e+00> : vector<256x8xf32>
    %126 = tpu.matmul %123, %125, %cst_145 {dimension_numbers = #tpu.dot_dimension_numbers<[1], [0], [0], [1], [0, 0, 1, 1], [], []>} : vector<256x8xbf16>, vector<8x8xbf16>, vector<256x8xf32> -> vector<256x8xf32>
    %127 = arith.addf %121, %126 : vector<256x8xf32>
    %c1_146 = arith.constant 1 : index
    %c0_147 = arith.constant 0 : index
    %c0_148 = arith.constant 0 : index
    %128 = vector.load %arg15[%c1_146, %c0_147, %c0_148] : memref<18x16x8xbf16, #tpu.memory_space<vmem>>, vector<16x16x8xbf16>
    %129 = vector.shape_cast %128 : vector<16x16x8xbf16> to vector<256x8xbf16>
    %c4_149 = arith.constant 4 : index
    %c0_150 = arith.constant 0 : index
    %c0_151 = arith.constant 0 : index
    %130 = vector.load %arg8[%c4_149, %c0_150, %c0_151] : memref<9x8x8xbf16, #tpu.memory_space<vmem>>, vector<1x8x8xbf16>
    %131 = vector.shape_cast %130 : vector<1x8x8xbf16> to vector<8x8xbf16>
    %cst_152 = arith.constant dense<0.000000e+00> : vector<256x8xf32>
    %132 = tpu.matmul %129, %131, %cst_152 {dimension_numbers = #tpu.dot_dimension_numbers<[1], [0], [0], [1], [0, 0, 1, 1], [], []>} : vector<256x8xbf16>, vector<8x8xbf16>, vector<256x8xf32> -> vector<256x8xf32>
    %133 = arith.addf %127, %132 : vector<256x8xf32>
    %c1_153 = arith.constant 1 : index
    %c0_154 = arith.constant 0 : index
    %c0_155 = arith.constant 0 : index
    %134 = vector.load %arg17[%c1_153, %c0_154, %c0_155] : memref<18x16x8xbf16, #tpu.memory_space<vmem>>, vector<16x16x8xbf16>
    %135 = vector.shape_cast %134 : vector<16x16x8xbf16> to vector<256x8xbf16>
    %c5_156 = arith.constant 5 : index
    %c0_157 = arith.constant 0 : index
    %c0_158 = arith.constant 0 : index
    %136 = vector.load %arg8[%c5_156, %c0_157, %c0_158] : memref<9x8x8xbf16, #tpu.memory_space<vmem>>, vector<1x8x8xbf16>
    %137 = vector.shape_cast %136 : vector<1x8x8xbf16> to vector<8x8xbf16>
    %cst_159 = arith.constant dense<0.000000e+00> : vector<256x8xf32>
    %138 = tpu.matmul %135, %137, %cst_159 {dimension_numbers = #tpu.dot_dimension_numbers<[1], [0], [0], [1], [0, 0, 1, 1], [], []>} : vector<256x8xbf16>, vector<8x8xbf16>, vector<256x8xf32> -> vector<256x8xf32>
    %139 = arith.addf %133, %138 : vector<256x8xf32>
    %c2_160 = arith.constant 2 : index
    %c0_161 = arith.constant 0 : index
    %c0_162 = arith.constant 0 : index
    %140 = vector.load %arg16[%c2_160, %c0_161, %c0_162] : memref<18x16x8xbf16, #tpu.memory_space<vmem>>, vector<16x16x8xbf16>
    %141 = vector.shape_cast %140 : vector<16x16x8xbf16> to vector<256x8xbf16>
    %c6_163 = arith.constant 6 : index
    %c0_164 = arith.constant 0 : index
    %c0_165 = arith.constant 0 : index
    %142 = vector.load %arg8[%c6_163, %c0_164, %c0_165] : memref<9x8x8xbf16, #tpu.memory_space<vmem>>, vector<1x8x8xbf16>
    %143 = vector.shape_cast %142 : vector<1x8x8xbf16> to vector<8x8xbf16>
    %cst_166 = arith.constant dense<0.000000e+00> : vector<256x8xf32>
    %144 = tpu.matmul %141, %143, %cst_166 {dimension_numbers = #tpu.dot_dimension_numbers<[1], [0], [0], [1], [0, 0, 1, 1], [], []>} : vector<256x8xbf16>, vector<8x8xbf16>, vector<256x8xf32> -> vector<256x8xf32>
    %145 = arith.addf %139, %144 : vector<256x8xf32>
    %c2_167 = arith.constant 2 : index
    %c0_168 = arith.constant 0 : index
    %c0_169 = arith.constant 0 : index
    %146 = vector.load %arg15[%c2_167, %c0_168, %c0_169] : memref<18x16x8xbf16, #tpu.memory_space<vmem>>, vector<16x16x8xbf16>
    %147 = vector.shape_cast %146 : vector<16x16x8xbf16> to vector<256x8xbf16>
    %c7_170 = arith.constant 7 : index
    %c0_171 = arith.constant 0 : index
    %c0_172 = arith.constant 0 : index
    %148 = vector.load %arg8[%c7_170, %c0_171, %c0_172] : memref<9x8x8xbf16, #tpu.memory_space<vmem>>, vector<1x8x8xbf16>
    %149 = vector.shape_cast %148 : vector<1x8x8xbf16> to vector<8x8xbf16>
    %cst_173 = arith.constant dense<0.000000e+00> : vector<256x8xf32>
    %150 = tpu.matmul %147, %149, %cst_173 {dimension_numbers = #tpu.dot_dimension_numbers<[1], [0], [0], [1], [0, 0, 1, 1], [], []>} : vector<256x8xbf16>, vector<8x8xbf16>, vector<256x8xf32> -> vector<256x8xf32>
    %151 = arith.addf %145, %150 : vector<256x8xf32>
    %c2_174 = arith.constant 2 : index
    %c0_175 = arith.constant 0 : index
    %c0_176 = arith.constant 0 : index
    %152 = vector.load %arg17[%c2_174, %c0_175, %c0_176] : memref<18x16x8xbf16, #tpu.memory_space<vmem>>, vector<16x16x8xbf16>
    %153 = vector.shape_cast %152 : vector<16x16x8xbf16> to vector<256x8xbf16>
    %c8_177 = arith.constant 8 : index
    %c0_178 = arith.constant 0 : index
    %c0_179 = arith.constant 0 : index
    %154 = vector.load %arg8[%c8_177, %c0_178, %c0_179] : memref<9x8x8xbf16, #tpu.memory_space<vmem>>, vector<1x8x8xbf16>
    %155 = vector.shape_cast %154 : vector<1x8x8xbf16> to vector<8x8xbf16>
    %cst_180 = arith.constant dense<0.000000e+00> : vector<256x8xf32>
    %156 = tpu.matmul %153, %155, %cst_180 {dimension_numbers = #tpu.dot_dimension_numbers<[1], [0], [0], [1], [0, 0, 1, 1], [], []>} : vector<256x8xbf16>, vector<8x8xbf16>, vector<256x8xf32> -> vector<256x8xf32>
    %157 = arith.addf %151, %156 : vector<256x8xf32>
    %c0_181 = arith.constant 0 : index
    %c0_182 = arith.constant 0 : index
    %158 = vector.load %arg9[%c0_181, %c0_182] : memref<1x8xf32, #tpu.memory_space<vmem>>, vector<1x8xf32>
    %159 = vector.shape_cast %158 : vector<1x8xf32> to vector<8xf32>
    %160 = vector.shape_cast %159 : vector<8xf32> to vector<1x8xf32>
    %161 = vector.broadcast %160 : vector<1x8xf32> to vector<256x8xf32>
    %162 = arith.mulf %157, %161 : vector<256x8xf32>
    %c0_183 = arith.constant 0 : index
    %c0_184 = arith.constant 0 : index
    %163 = vector.load %arg10[%c0_183, %c0_184] : memref<1x8xf32, #tpu.memory_space<vmem>>, vector<1x8xf32>
    %164 = vector.shape_cast %163 : vector<1x8xf32> to vector<8xf32>
    %165 = vector.shape_cast %164 : vector<8xf32> to vector<1x8xf32>
    %166 = vector.broadcast %165 : vector<1x8xf32> to vector<256x8xf32>
    %167 = arith.addf %162, %166 : vector<256x8xf32>
    %cst_185 = arith.constant 0.000000e+00 : f32
    %168 = vector.broadcast %cst_185 : f32 to vector<256x8xf32>
    %169 = arith.maximumf %167, %168 : vector<256x8xf32>
    %170 = vector.shape_cast %169 : vector<256x8xf32> to vector<1x16x16x8xf32>
    %171 = arith.truncf %170 : vector<1x16x16x8xf32> to vector<1x16x16x8xbf16>
    %c0_186 = arith.constant 0 : index
    %c0_187 = arith.constant 0 : index
    %c0_188 = arith.constant 0 : index
    %c0_189 = arith.constant 0 : index
    %172 = vector.load %arg11[%c0_186, %c0_187, %c0_188, %c0_189] : memref<1x16x16x8xbf16, #tpu.memory_space<vmem>>, vector<1x16x16x8xbf16>
    tpu.vector_store %arg11[%c0_186, %c0_187, %c0_188, %c0_189], %171 {strides = array<i32>} : memref<1x16x16x8xbf16, #tpu.memory_space<vmem>>, vector<1x16x16x8xbf16>,
    return
  }
  func.func @transform_0(%arg0: i32, %arg1: i32) -> (i32, i32, i32, i32) {
    %c0_i32 = arith.constant 0 : i32
    %c0_i32_0 = arith.constant 0 : i32
    %c0_i32_1 = arith.constant 0 : i32
    return %arg0, %arg1, %c0_i32, %c0_i32_0 : i32, i32, i32, i32
  }
  func.func @transform_1(%arg0: i32, %arg1: i32) -> (i32, i32, i32, i32) {
    %c8_i32 = arith.constant 8 : i32
    %0 = arith.muli %arg1, %c8_i32 : i32
    %c1_i32 = arith.constant 1 : i32
    %1 = arith.subi %0, %c1_i32 : i32
    %c0_i32 = arith.constant 0 : i32
    %2 = arith.maxsi %1, %c0_i32 : i32
    %c0_i32_0 = arith.constant 0 : i32
    %c0_i32_1 = arith.constant 0 : i32
    %c0_i32_2 = arith.constant 0 : i32
    return %arg0, %2, %c0_i32_0, %c0_i32_1 : i32, i32, i32, i32
  }
  func.func @transform_2(%arg0: i32, %arg1: i32) -> (i32, i32, i32, i32) {
    %c1_i32 = arith.constant 1 : i32
    %0 = arith.addi %arg1, %c1_i32 : i32
    %c8_i32 = arith.constant 8 : i32
    %1 = arith.muli %0, %c8_i32 : i32
    %c7_i32 = arith.constant 7 : i32
    %2 = arith.minsi %1, %c7_i32 : i32
    %c0_i32 = arith.constant 0 : i32
    %c0_i32_0 = arith.constant 0 : i32
    %c0_i32_1 = arith.constant 0 : i32
    return %arg0, %2, %c0_i32, %c0_i32_0 : i32, i32, i32, i32
  }
  func.func @transform_3(%arg0: i32, %arg1: i32) -> (i32, i32, i32) {
    %c0_i32 = arith.constant 0 : i32
    %c0_i32_0 = arith.constant 0 : i32
    %c0_i32_1 = arith.constant 0 : i32
    %c0_i32_2 = arith.constant 0 : i32
    return %c0_i32, %c0_i32_0, %c0_i32_1 : i32, i32, i32
  }
  func.func @transform_4(%arg0: i32, %arg1: i32) -> (i32, i32) {
    %c0_i32 = arith.constant 0 : i32
    %c0_i32_0 = arith.constant 0 : i32
    %c0_i32_1 = arith.constant 0 : i32
    return %c0_i32, %c0_i32_0 : i32, i32
  }
  func.func @transform_5(%arg0: i32, %arg1: i32) -> (i32, i32) {
    %c0_i32 = arith.constant 0 : i32
    %c0_i32_0 = arith.constant 0 : i32
    %c0_i32_1 = arith.constant 0 : i32
    return %c0_i32, %c0_i32_0 : i32, i32
  }
  func.func @transform_6(%arg0: i32, %arg1: i32) -> (i32, i32, i32) {
    %c0_i32 = arith.constant 0 : i32
    %c0_i32_0 = arith.constant 0 : i32
    %c0_i32_1 = arith.constant 0 : i32
    %c0_i32_2 = arith.constant 0 : i32
    return %c0_i32, %c0_i32_0, %c0_i32_1 : i32, i32, i32
  }
  func.func @transform_7(%arg0: i32, %arg1: i32) -> (i32, i32) {
    %c0_i32 = arith.constant 0 : i32
    %c0_i32_0 = arith.constant 0 : i32
    %c0_i32_1 = arith.constant 0 : i32
    return %c0_i32, %c0_i32_0 : i32, i32
  }
  func.func @transform_8(%arg0: i32, %arg1: i32) -> (i32, i32) {
    %c0_i32 = arith.constant 0 : i32
    %c0_i32_0 = arith.constant 0 : i32
    %c0_i32_1 = arith.constant 0 : i32
    return %c0_i32, %c0_i32_0 : i32, i32
  }
  func.func @transform_9(%arg0: i32, %arg1: i32) -> (i32, i32, i32, i32) {
    %c0_i32 = arith.constant 0 : i32
    %c0_i32_0 = arith.constant 0 : i32
    %c0_i32_1 = arith.constant 0 : i32
    return %arg0, %arg1, %c0_i32, %c0_i32_0 : i32, i32, i32, i32
  }
}

</mosaic_0001>

<bundles_post_ra>
// kernel: _lambda_.1
= control target key start
LH: loop header
LB: loop body
LE: loop exit
PB: predicated region body
PF: predicated region fallthrough
CT: control target
= control target key end

     0   :  { %s9364_s28 = smov 0   ;;  %s9366_s29 = smov 0   ;;  %s11295_s0 = inlined_call_operand.vmem [shape: bf16[2,16,16,8], index: 0, kind: input, shape index: {}, may-alias: {0,1,2}]   ;;  %s11296_s1 = inlined_call_operand.vmem [shape: bf16[2,16,16,8], index: 1, kind: input, shape index: {}, may-alias: {0,1,2}]   ;;  %s11297_s2 = inlined_call_operand.vmem [shape: bf16[2,16,16,8], index: 2, kind: input, shape index: {}, may-alias: {0,1,2}]   ;;  %s11298_s3 = inlined_call_operand.vmem [shape: bf16[9,8,8], index: 3, kind: input, shape index: {}]   ;;  %s11299_s4 = inlined_call_operand.vmem [shape: f32[1,8], index: 4, kind: input, shape index: {}]   ;;  %s11300_s5 = inlined_call_operand.vmem [shape: f32[1,8], index: 5, kind: input, shape index: {}]   ;;  %s11301_s6 = inlined_call_operand.vmem [shape: bf16[9,8,8], index: 6, kind: input, shape index: {}]   ;;  %s11302_s7 = inlined_call_operand.vmem [shape: f32[1,8], index: 7, kind: input, shape index: {}]   ;;  %s11303_s8 = inlined_call_operand.vmem [shape: f32[1,8], index: 8, kind: input, shape index: {}]   ;;  %s11304_s9 = inlined_call_operand.vmem [shape: bf16[2,16,16,8], index: 9, kind: output, shape index: {}]  }
   0x1   :  { %s9368_s30 = smov 0  }
   0x2 LB: > { %s31_s10 = sadd.s32 1, %s9307_s29  ;;  %p7285_p0 = scmp.ge.s32.totalorder %s9311_s30, 1  ;;  %s9311_s30 = sphi %s9368_s30, %s19_s30   ;;  %s9307_s29 = sphi %s9366_s29, %s11314_s29   ;;  %s9303_s28 = sphi %s9364_s28, %s11313_s28  }
   0x3   : > { %p33_p1 = scmp.ge.s32.totalorder %s31_s10, 2  ;;  %p377_p2 = scmp.lt.s32.totalorder %s9311_s30, 3 }
   0x5   : > { %s11316_s10 = smov (%p33_p1, %s31_s10), 0  ;;  %p378_p3 = pnand %p7285_p0, %p377_p2 }
   0x6   : > { %v7314_v0 = vld [vmem:[%s11298_s3 + $0x4] sm:$0xf] (!%p378_p3)  ;;  %vm1419_vm0 = vcmask (!%p378_p3), 1043456   ;;  %vm641_vm1 = vcmask (!%p378_p3), 64512   ;;  %p452_p4 = scmp.lt.s32.totalorder (!%p378_p3), %s9303_s28, 1  ;;  %v9313_v2 = vmov (!%p378_p3), 0  }
   0x7   : > { %381 = sbr.rel (%p378_p3) target bundleno = 1592 (0x638), region = 56  ;;  %9229 = vmatprep.subr.msk.bf16.mxu0 (!%p378_p3), %vm1419_vm0, %v7314_v0  ;;  %v1421_v1 = vsel (!%p378_p3), %vm1419_vm0, %v7314_v0, 0  ;;  %662 = vst.msk [vmem:[#allocation2] sm:$0xff] (!%p378_p3), %vm641_vm1, %v9313_v2  ;;  %690 = vst.msk [vmem:[#allocation2 + $0x90] sm:$0xff] (!%p378_p3), %vm641_vm1, %v9313_v2  ;;  %v1344_v3 = vld [vmem:[%s11298_s3] sm:$0xf] (!%p378_p3)  ;;  %9230 = vmatprep.subr.msk.bf16.mxu1 (!%p378_p3), %vm1419_vm0, %v7314_v0 }
   0x8   : > { %691 = vst.msk [vmem:[#allocation2 + $0x98] sm:$0xff] (!%p378_p3), %vm641_vm1, %v9313_v2  ;;  %663 = vst.msk [vmem:[#allocation2 + $0x8] sm:$0xff] (!%p378_p3), %vm641_vm1, %v9313_v2  ;;  %8036 = vmatpush3.bf16.msra.mxu0 (!%p378_p3), %v1421_v1  ;;  %vm896_vm2 = vsmask.f32 (!%p378_p3), 7938  ;;  %8684 = vmatpush3.bf16.msra.mxu1 (!%p378_p3), %v1421_v1  ;;  %v1655_v6 = vsel (!%p378_p3), %vm1419_vm0, %v1344_v3, 0  ;;  %v898_v15 = vld [vmem:[#allocation3] sm:$0xff] (!%p378_p3) }
   0x9   : > { %9231 = vmatprep.subr.msk.bf16.mxu0 (!%p378_p3), %vm1419_vm0, %v1344_v3  ;;  %vm9411_vm3 = vmand (!%p378_p3), %vm641_vm1, %vm896_vm2  ;;  %v9421_v8 = vld [vmem:[%s11298_s3 + $0x8] sm:$0xf] (!%p378_p3)  ;;  %vm959_vm4 = vsmask.f32 (!%p378_p3), 256  ;;  %vm958_vm5 = vcmask (!%p378_p3), 57344   ;;  %v904_v34 = vld [vmem:[#allocation3 + $0x10] sm:$0xff] (!%p378_p3) }
   0xa   : > { %v901_v25 = vld [vmem:[#allocation3 + $0x8] sm:$0xff] (!%p378_p3)  ;;  %v907_v40 = vld [vmem:[#allocation3 + $0x18] sm:$0xff] (!%p378_p3)  ;;  %vm9490_vm6 = vmand (!%p378_p3), %vm958_vm5, %vm959_vm4  ;;  %vm1201_vm7 = vsmask.f32 (!%p378_p3), 7424  ;;  %vm1263_vm9 = vcmask (!%p378_p3), 64519   ;;  %vm7110_vm12 = vcmask (!%p378_p3), 60416  }
   0xb   : > { %v910_v51 = vld [vmem:[#allocation3 + $0x20] sm:$0xff] (!%p378_p3)  ;;  %v913_v58 = vld [vmem:[#allocation3 + $0x28] sm:$0xff] (!%p378_p3)  ;;  %v916_v1 = vld [vmem:[#allocation3 + $0x30] sm:$0xff] (!%p378_p3)  ;;  %vm1264_vm10 = vsmask.f32 (!%p378_p3), 7966 }
   0xc   : > { %vm9615_vm8 = vmand (!%p378_p3), %vm641_vm1, %vm1201_vm7 }
   0xd   : > { %vm9716_vm11 = vmand (!%p378_p3), %vm1263_vm9, %vm1264_vm10 }
   0xe   : > { %s11318_s28 = smov (!%p452_p4, %s9303_s28), 1  ;;  %v9423_v9 = vld [vmem:[#allocation2] sm:$0xff] }
   0xf   : > { %s7674_s15 = sshll.u32 %s11318_s28, 7  ;;  %v9425_v10 = vld [vmem:[#allocation2 + $0x8] sm:$0xff]  ;;  %8037 = vmatprep.mubr.msk.bf16.mxu0 %vm641_vm1, %v9423_v9  ;;  %v736_v12 = vshrl.u32 %v9423_v9, 16  ;;  %v739_v14 = vshll.u32 %v9423_v9, 16 }
  0x10   : > { %s9408_s18 = scalar_lea.vmem %s11295_s0, %s7674_s15  ;;  %8038 = vmatmul.mubr.msk.bf16.vlgmr.msra.gmra.mrb[0].mxu0 %vm641_vm1, %v9425_v10  ;;  %v743_v19 = vshrl.u32 %v9425_v10, 16  ;;  %v746_v22 = vshll.u32 %v9425_v10, 16  ;;  %v937_v10 = vld [vmem:[#allocation3 + $0x68] sm:$0xff]  ;;  %s11163_s25 = scalar_lea.vmem %s11304_s9, %s7674_s15 }
  0x11   : > { %v9273_v5 = vld [vmem:[%s9408_s18] sm:$0xff]   ;;  %v9274_v7 = vld [vmem:[%s9408_s18 + $0x8] sm:$0xff]   ;;  %v9275_v11 = vld [vmem:[%s9408_s18 + $0x10] sm:$0xff]   ;;  %8074 = vmatpush3.bf16.msra.mxu0 %v1655_v6  ;;  %v738_v17 = vrot.slane %v736_v12, 7  ;;  %v9466_v33 = vrot.slane %v739_v14, 1 }
  0x12   : > { %642 = vst.msk [vmem:[#allocation2 + $0x10] sm:$0xff] %vm641_vm1, %v9273_v5  ;;  %643 = vst.msk [vmem:[#allocation2 + $0x18] sm:$0xff] %vm641_vm1, %v9274_v7  ;;  %v9276_v13 = vld [vmem:[%s9408_s18 + $0x18] sm:$0xff]   ;;  %v9277_v16 = vld [vmem:[%s9408_s18 + $0x20] sm:$0xff]   ;;  %9232 = vmatprep.subr.msk.bf16.mxu0 %vm1419_vm0, %v9421_v8  ;;  %v745_v24 = vrot.slane %v743_v19, 7  ;;  %v9480_v42 = vrot.slane %v746_v22, 1 }
  0x13   : > { %644 = vst.msk [vmem:[#allocation2 + $0x20] sm:$0xff] %vm641_vm1, %v9275_v11  ;;  %645 = vst.msk [vmem:[#allocation2 + $0x28] sm:$0xff] %vm641_vm1, %v9276_v13  ;;  %v9278_v18 = vld [vmem:[%s9408_s18 + $0x28] sm:$0xff]   ;;  %v9279_v20 = vld [vmem:[%s9408_s18 + $0x30] sm:$0xff]   ;;  %v741_v21 = vor.u32 %v739_v14, %v738_v17 }
  0x14   : > { %646 = vst.msk [vmem:[#allocation2 + $0x30] sm:$0xff] %vm641_vm1, %v9277_v16  ;;  %647 = vst.msk [vmem:[#allocation2 + $0x38] sm:$0xff] %vm641_vm1, %v9278_v18  ;;  %v9280_v23 = vld [vmem:[%s9408_s18 + $0x38] sm:$0xff]   ;;  %v748_v29 = vor.u32 %v746_v22, %v745_v24  ;;  %v9281_v32 = vld [vmem:[%s9408_s18 + $0x40] sm:$0xff]  }
  0x15   : > { %648 = vst.msk [vmem:[#allocation2 + $0x40] sm:$0xff] %vm641_vm1, %v9279_v20  ;;  %v899_v27 = vsel %vm9411_vm3, %v741_v21, %v898_v15  ;;  %649 = vst.msk [vmem:[#allocation2 + $0x48] sm:$0xff] %vm641_vm1, %v9280_v23  ;;  %v9282_v41 = vld [vmem:[%s9408_s18 + $0x48] sm:$0xff]   ;;  %v9283_v54 = vld [vmem:[%s9408_s18 + $0x50] sm:$0xff]  }
  0x16   : > { %900 = vst [vmem:[#allocation3] sm:$0xff] %v899_v27  ;;  %v902_v38 = vsel %vm9411_vm3, %v748_v29, %v901_v25  ;;  %650 = vst.msk [vmem:[#allocation2 + $0x50] sm:$0xff] %vm641_vm1, %v9281_v32  ;;  %v9284_v61 = vld [vmem:[%s9408_s18 + $0x58] sm:$0xff]   ;;  %v9285_v22 = vld [vmem:[%s9408_s18 + $0x60] sm:$0xff]  }
  0x17   : > { %903 = vst [vmem:[#allocation3 + $0x8] sm:$0xff] %v902_v38  ;;  %651 = vst.msk [vmem:[#allocation2 + $0x58] sm:$0xff] %vm641_vm1, %v9282_v41  ;;  %v919_v15 = vld [vmem:[#allocation3 + $0x38] sm:$0xff]  ;;  %v922_v27 = vld [vmem:[#allocation3 + $0x40] sm:$0xff] }
  0x18   : > { %652 = vst.msk [vmem:[#allocation2 + $0x60] sm:$0xff] %vm641_vm1, %v9283_v54  ;;  %653 = vst.msk [vmem:[#allocation2 + $0x68] sm:$0xff] %vm641_vm1, %v9284_v61 }
  0x19   : > { %v9453_v26 = vld [vmem:[#allocation2 + $0x10] sm:$0xff]  ;;  %v9460_v28 = vld [vmem:[#allocation2 + $0x18] sm:$0xff]  ;;  %654 = vst.msk [vmem:[#allocation2 + $0x70] sm:$0xff] %vm641_vm1, %v9285_v22 }
  0x1a   : > { %8041 = vmatprep.mubr.msk.bf16.mxu0 %vm641_vm1, %v9453_v26  ;;  %v750_v30 = vshrl.u32 %v9453_v26, 16  ;;  %v753_v31 = vshll.u32 %v9453_v26, 16  ;;  %v757_v35 = vshrl.u32 %v9460_v28, 16  ;;  %v760_v36 = vshll.u32 %v9460_v28, 16  ;;  %v9472_v37 = vld [vmem:[#allocation2 + $0x20] sm:$0xff]  ;;  %v9486_v44 = vld [vmem:[#allocation2 + $0x28] sm:$0xff] }
  0x1b   : > { %8042 = vmatmul.mubr.msk.bf16.gmra.mrb[4].mxu0 %vm641_vm1, %v9460_v28  ;;  %v764_v47 = vshrl.u32 %v9472_v37, 16  ;;  %v767_v48 = vshll.u32 %v9472_v37, 16  ;;  %v9498_v49 = vld [vmem:[#allocation2 + $0x30] sm:$0xff]  ;;  %v771_v52 = vshrl.u32 %v9486_v44, 16  ;;  %v774_v53 = vshll.u32 %v9486_v44, 16  ;;  %v9504_v55 = vld [vmem:[#allocation2 + $0x38] sm:$0xff] }
  0x1c   : > { %v752_v39 = vrot.slane %v750_v30, 7  ;;  %v9482_v43 = vrot.slane %v753_v31, 1  ;;  %8045 = vmatprep.mubr.msk.bf16.mxu0 %vm641_vm1, %v9472_v37  ;;  %v759_v46 = vrot.slane %v757_v35, 7  ;;  %v778_v59 = vshrl.u32 %v9498_v49, 16  ;;  %v9513_v62 = vld [vmem:[#allocation2 + $0x40] sm:$0xff]  ;;  %v9522_v6 = vld [vmem:[#allocation2 + $0x48] sm:$0xff] }
  0x1d   : > { %v766_v57 = vrot.slane %v764_v47, 7  ;;  %v781_v60 = vshll.u32 %v9498_v49, 16  ;;  %v773_v0 = vrot.slane %v771_v52, 7  ;;  %v785_v3 = vshrl.u32 %v9504_v55, 16  ;;  %v961_v7 = vld [vmem:[#allocation3] sm:$0x1] }
  0x1e   : > { %v755_v50 = vor.u32 %v753_v31, %v752_v39  ;;  %v762_v56 = vor.u32 %v760_v36, %v759_v46  ;;  %v788_v5 = vshll.u32 %v9504_v55, 16  ;;  %v780_v14 = vrot.slane %v778_v59, 7  ;;  %v9547_v31 = vld [vmem:[#allocation2 + $0x50] sm:$0xff]  ;;  %v964_v32 = vld [vmem:[#allocation3 + $0x8] sm:$0x1] }
  0x1f   : > { %v769_v13 = vor.u32 %v767_v48, %v766_v57  ;;  %v792_v16 = vshrl.u32 %v9513_v62, 16  ;;  %v962_v17 = vsel %vm9490_vm6, 0, %v961_v7  ;;  %v776_v18 = vor.u32 %v774_v53, %v773_v0  ;;  %v9286_v57 = vld [vmem:[%s9408_s18 + $0x68] sm:$0xff]   ;;  %v928_v0 = vld [vmem:[#allocation3 + $0x50] sm:$0xff] }
  0x20   : > { %v905_v63 = vsel %vm9411_vm3, %v755_v50, %v904_v34  ;;  %v908_v11 = vsel %vm9411_vm3, %v762_v56, %v907_v40  ;;  %v787_v20 = vrot.slane %v785_v3, 7  ;;  %v795_v21 = vshll.u32 %v9513_v62, 16  ;;  %963 = vst [vmem:[#allocation3] sm:$0x1] %v962_v17  ;;  %v925_v40 = vld [vmem:[#allocation3 + $0x48] sm:$0xff]  ;;  %v9568_v56 = vld [vmem:[#allocation2 + $0x58] sm:$0xff] }
  0x21   : > { %906 = vst [vmem:[#allocation3 + $0x10] sm:$0xff] %v905_v63  ;;  %909 = vst [vmem:[#allocation3 + $0x18] sm:$0xff] %v908_v11  ;;  %v911_v23 = vsel %vm9411_vm3, %v769_v13, %v910_v51  ;;  %v783_v24 = vor.u32 %v781_v60, %v780_v14  ;;  %v794_v25 = vrot.slane %v792_v16, 7  ;;  %v799_v29 = vshrl.u32 %v9522_v6, 16  ;;  %v931_v14 = vld [vmem:[#allocation3 + $0x58] sm:$0xff] }
  0x22   : > { %912 = vst [vmem:[#allocation3 + $0x20] sm:$0xff] %v911_v23  ;;  %v914_v34 = vsel %vm9411_vm3, %v776_v18, %v913_v58  ;;  %v790_v38 = vor.u32 %v788_v5, %v787_v20  ;;  %v802_v39 = vshll.u32 %v9522_v6, 16  ;;  %v806_v41 = vshrl.u32 %v9547_v31, 16  ;;  %655 = vst.msk [vmem:[#allocation2 + $0x78] sm:$0xff] %vm641_vm1, %v9286_v57 }
  0x23   : > { %8046 = vmatmul.mubr.msk.bf16.gmra.mrb[8].mxu0 %vm641_vm1, %v9486_v44  ;;  %v965_v46 = vsel %vm9490_vm6, 0, %v964_v32  ;;  %915 = vst [vmem:[#allocation3 + $0x28] sm:$0xff] %v914_v34  ;;  %v917_v50 = vsel %vm9411_vm3, %v783_v24, %v916_v1  ;;  %v797_v51 = vor.u32 %v795_v21, %v794_v25  ;;  %v801_v54 = vrot.slane %v799_v29, 7  ;;  %v9596_v25 = vld [vmem:[#allocation2 + $0x68] sm:$0xff]  ;;  %v9287_v34 = vld [vmem:[%s9408_s18 + $0x70] sm:$0xff]  }
  0x24   : > { %8049 = vmatprep.mubr.msk.bf16.mxu0 %vm641_vm1, %v9498_v49  ;;  %966 = vst [vmem:[#allocation3 + $0x8] sm:$0x1] %v965_v46  ;;  %918 = vst [vmem:[#allocation3 + $0x30] sm:$0xff] %v917_v50  ;;  %v920_v58 = vsel %vm9411_vm3, %v790_v38, %v919_v15  ;;  %v808_v61 = vrot.slane %v806_v41, 7  ;;  %v809_v63 = vshll.u32 %v9547_v31, 16  ;;  %v813_v1 = vshrl.u32 %v9568_v56, 16 }
  0x25   : > { %921 = vst [vmem:[#allocation3 + $0x38] sm:$0xff] %v920_v58  ;;  %v923_v7 = vsel %vm9411_vm3, %v797_v51, %v922_v27  ;;  %v804_v11 = vor.u32 %v802_v39, %v801_v54  ;;  %v816_v13 = vshll.u32 %v9568_v56, 16  ;;  %v9582_v15 = vld [vmem:[#allocation2 + $0x60] sm:$0xff]  ;;  %v9588_v17 = vor.u32 %v9466_v33, %v736_v12  ;;  %656 = vst.msk [vmem:[#allocation2 + $0x80] sm:$0xff] %vm641_vm1, %v9287_v34 }
  0x26   : > { %924 = vst [vmem:[#allocation3 + $0x40] sm:$0xff] %v923_v7  ;;  %v811_v20 = vor.u32 %v809_v63, %v808_v61  ;;  %v815_v22 = vrot.slane %v813_v1, 7  ;;  %v820_v23 = vshrl.u32 %v9582_v15, 16  ;;  %v823_v24 = vshll.u32 %v9582_v15, 16  ;;  %v9621_v61 = vld [vmem:[#allocation2 + $0x70] sm:$0xff] }
  0x27   : > { %v926_v12 = vsel %vm9411_vm3, %v804_v11, %v925_v40  ;;  %v827_v33 = vshrl.u32 %v9596_v25, 16  ;;  %v830_v32 = vshll.u32 %v9596_v25, 16  ;;  %v934_v40 = vld [vmem:[#allocation3 + $0x60] sm:$0xff]  ;;  %v1061_v7 = vor.u32 %v9482_v43, %v750_v30 }
  0x28   : > { %v967_v18 = vld [vmem:[#allocation3 + $0x10] sm:$0x1]  ;;  %v970_v27 = vld [vmem:[#allocation3 + $0x18] sm:$0x1]  ;;  %927 = vst [vmem:[#allocation3 + $0x48] sm:$0xff] %v926_v12  ;;  %v929_v46 = vsel %vm9411_vm3, %v811_v20, %v928_v0  ;;  %v818_v50 = vor.u32 %v816_v13, %v815_v22  ;;  %v822_v51 = vrot.slane %v820_v23, 7  ;;  %v1054_v0 = vor.u32 %v9480_v42, %v743_v19 }
  0x29   : > { %v968_v9 = vsel %vm9490_vm6, 0, %v967_v18  ;;  %v971_v38 = vsel %vm9490_vm6, 0, %v970_v27  ;;  %v973_v57 = vld [vmem:[#allocation3 + $0x20] sm:$0x1]  ;;  %930 = vst [vmem:[#allocation3 + $0x50] sm:$0xff] %v929_v46  ;;  %v829_v58 = vrot.slane %v827_v33, 7 }
  0x2a   : > { %969 = vst [vmem:[#allocation3 + $0x10] sm:$0x1] %v968_v9  ;;  %972 = vst [vmem:[#allocation3 + $0x18] sm:$0x1] %v971_v38  ;;  %v974_v11 = vsel %vm9490_vm6, 0, %v973_v57  ;;  %v932_v20 = vsel %vm9411_vm3, %v818_v50, %v931_v14  ;;  %v825_v22 = vor.u32 %v823_v24, %v822_v51  ;;  %v834_v19 = vshrl.u32 %v9621_v61, 16 }
  0x2b   : > { %8050 = vmatmul.mubr.msk.bf16.gmra.mrb[12].mxu0 %vm641_vm1, %v9504_v55  ;;  %v976_v18 = vld [vmem:[#allocation3 + $0x28] sm:$0x1]  ;;  %v9288_v42 = vld [vmem:[%s9408_s18 + $0x78] sm:$0xff]   ;;  %975 = vst [vmem:[#allocation3 + $0x20] sm:$0x1] %v974_v11  ;;  %933 = vst [vmem:[#allocation3 + $0x58] sm:$0xff] %v932_v20  ;;  %v832_v43 = vor.u32 %v830_v32, %v829_v58 }
  0x2c   : > { %8053 = vmatprep.mubr.msk.bf16.mxu0 %vm641_vm1, %v9513_v62  ;;  %v977_v26 = vsel %vm9490_vm6, 0, %v976_v18  ;;  %v979_v30 = vld [vmem:[#allocation3 + $0x30] sm:$0x1]  ;;  %v837_v14 = vshll.u32 %v9621_v61, 16  ;;  %v1203_v27 = vld [vmem:[#allocation4] sm:$0xff]  ;;  %v935_v38 = vsel %vm9411_vm3, %v825_v22, %v934_v40  ;;  %v836_v46 = vrot.slane %v834_v19, 7 }
  0x2d   : > { %v940_v9 = vld [vmem:[#allocation3 + $0x70] sm:$0xff]  ;;  %978 = vst [vmem:[#allocation3 + $0x28] sm:$0x1] %v977_v26  ;;  %v980_v12 = vsel %vm9490_vm6, 0, %v979_v30  ;;  %v982_v34 = vld [vmem:[#allocation3 + $0x38] sm:$0x1]  ;;  %v1204_v51 = vsel %vm9615_vm8, %v9588_v17, %v1203_v27  ;;  %v938_v40 = vsel %vm9411_vm3, %v832_v43, %v937_v10 }
  0x2e   : > { %v9653_v50 = vld [vmem:[#allocation2 + $0x78] sm:$0xff]  ;;  %657 = vst.msk [vmem:[#allocation2 + $0x88] sm:$0xff] %vm641_vm1, %v9288_v42  ;;  %v1206_v57 = vld [vmem:[#allocation4 + $0x8] sm:$0xff]  ;;  %981 = vst [vmem:[#allocation3 + $0x30] sm:$0x1] %v980_v12  ;;  %v983_v58 = vsel %vm9490_vm6, 0, %v982_v34  ;;  %v839_v42 = vor.u32 %v837_v14, %v836_v46 }
  0x2f   : > { %v985_v11 = vld [vmem:[#allocation3 + $0x40] sm:$0x1]  ;;  %936 = vst [vmem:[#allocation3 + $0x60] sm:$0xff] %v935_v38  ;;  %v841_v18 = vshrl.u32 %v9653_v50, 16  ;;  %v844_v20 = vshll.u32 %v9653_v50, 16  ;;  %1205 = vst [vmem:[#allocation4] sm:$0xff] %v1204_v51  ;;  %v1207_v26 = vsel %vm9615_vm8, %v1054_v0, %v1206_v57 }
  0x30   : > { %v1209_v22 = vld [vmem:[#allocation4 + $0x10] sm:$0xff]  ;;  %984 = vst [vmem:[#allocation3 + $0x38] sm:$0x1] %v983_v58  ;;  %v986_v17 = vsel %vm9490_vm6, 0, %v985_v11  ;;  %939 = vst [vmem:[#allocation3 + $0x68] sm:$0xff] %v938_v40  ;;  %v9675_v30 = vsel %vm1419_vm0, %v9421_v8, 0  ;;  %v941_v8 = vsel %vm9411_vm3, %v839_v42, %v940_v9 }
  0x31   : > { %v1210_v10 = vsel %vm9615_vm8, %v1061_v7, %v1209_v22  ;;  %987 = vst [vmem:[#allocation3 + $0x40] sm:$0x1] %v986_v17  ;;  %v988_v43 = vld [vmem:[#allocation3 + $0x48] sm:$0x1]  ;;  %v843_v27 = vrot.slane %v841_v18, 7  ;;  %v943_v12 = vld [vmem:[#allocation3 + $0x78] sm:$0xff] }
  0x32   : > { %1208 = vst [vmem:[#allocation4 + $0x8] sm:$0xff] %v1207_v26  ;;  %1211 = vst [vmem:[#allocation4 + $0x10] sm:$0xff] %v1210_v10  ;;  %v1067_v34 = vrot.slane %v760_v36, 1  ;;  %v1326_v38 = vld [vmem:[#allocation3] sm:$0xff]  ;;  %v989_v0 = vsel %vm9490_vm6, 0, %v988_v43  ;;  %v1074_v51 = vrot.slane %v767_v48, 1 }
  0x33   : > { %v991_v7 = vld [vmem:[#allocation3 + $0x50] sm:$0x1]  ;;  %v9685_v46 = vld [vmem:[#allocation2 + $0x80] sm:$0xff]  ;;  %990 = vst [vmem:[#allocation3 + $0x48] sm:$0x1] %v989_v0  ;;  %942 = vst [vmem:[#allocation3 + $0x70] sm:$0xff] %v941_v8  ;;  %v846_v36 = vor.u32 %v844_v20, %v843_v27  ;;  %8054 = vmatmul.mubr.msk.bf16.gmra.mrb[16].mxu0 %vm641_vm1, %v9522_v6 }
  0x34   : > { %v992_v57 = vsel %vm9490_vm6, 0, %v991_v7  ;;  %v848_v58 = vshrl.u32 %v9685_v46, 16  ;;  %v851_v11 = vshll.u32 %v9685_v46, 16  ;;  %v1212_v40 = vld [vmem:[#allocation4 + $0x18] sm:$0xff]  ;;  %v1215_v22 = vld [vmem:[#allocation4 + $0x20] sm:$0xff]  ;;  %v1068_v48 = vor.u32 %v1067_v34, %v757_v35  ;;  %8075 = vmatprep.mubr.msk.bf16.mxu0 %vm641_vm1, %v1326_v38  ;;  %v1218_v0 = vld [vmem:[#allocation4 + $0x28] sm:$0xff] }
  0x35   : > { %993 = vst [vmem:[#allocation3 + $0x50] sm:$0x1] %v992_v57  ;;  %v994_v9 = vld [vmem:[#allocation3 + $0x58] sm:$0x1]  ;;  %v1075_v17 = vor.u32 %v1074_v51, %v764_v47  ;;  %v1081_v42 = vrot.slane %v774_v53, 1  ;;  %v1088_v26 = vrot.slane %v781_v60, 1  ;;  %v944_v43 = vsel %vm9411_vm3, %v846_v36, %v943_v12 }
  0x36   : > { %v995_v10 = vsel %vm9490_vm6, 0, %v994_v9  ;;  %v850_v28 = vrot.slane %v848_v58, 7  ;;  %v946_v35 = vld [vmem:[#allocation3 + $0x80] sm:$0xff]  ;;  %v9712_v37 = vld [vmem:[#allocation2 + $0x88] sm:$0xff]  ;;  %v1095_v53 = vrot.slane %v788_v5, 1  ;;  %945 = vst [vmem:[#allocation3 + $0x78] sm:$0xff] %v944_v43  ;;  %v1213_v34 = vsel %vm9615_vm8, %v1068_v48, %v1212_v40 }
  0x37   : > { %996 = vst [vmem:[#allocation3 + $0x58] sm:$0x1] %v995_v10  ;;  %v997_v60 = vld [vmem:[#allocation3 + $0x60] sm:$0x1]  ;;  %v855_v27 = vshrl.u32 %v9712_v37, 16  ;;  %v858_v12 = vshll.u32 %v9712_v37, 16  ;;  %v1216_v38 = vsel %vm9615_vm8, %v1075_v17, %v1215_v22  ;;  %v1082_v36 = vor.u32 %v1081_v42, %v771_v52 }
  0x38   : > { %v1221_v7 = vld [vmem:[#allocation4 + $0x30] sm:$0xff]  ;;  %v998_v8 = vsel %vm9490_vm6, 0, %v997_v60  ;;  %v1000_v51 = vld [vmem:[#allocation3 + $0x68] sm:$0x1]  ;;  %v853_v5 = vor.u32 %v851_v11, %v850_v28  ;;  %v1266_v57 = vld [vmem:[#allocation4] sm:$0x80]  ;;  %v1089_v40 = vor.u32 %v1088_v26, %v778_v59  ;;  %v1096_v44 = vor.u32 %v1095_v53, %v785_v3 }
  0x39   : > { %1214 = vst [vmem:[#allocation4 + $0x18] sm:$0xff] %v1213_v34  ;;  %1217 = vst [vmem:[#allocation4 + $0x20] sm:$0xff] %v1216_v38  ;;  %v1224_v9 = vld [vmem:[#allocation4 + $0x38] sm:$0xff]  ;;  %v1001_v22 = vsel %vm9490_vm6, 0, %v1000_v51  ;;  %v857_v48 = vrot.slane %v855_v27, 7  ;;  %v949_v17 = vld [vmem:[#allocation3 + $0x88] sm:$0xff]  ;;  %v1219_v55 = vsel %vm9615_vm8, %v1082_v36, %v1218_v0 }
  0x3a   : > { %999 = vst [vmem:[#allocation3 + $0x60] sm:$0x1] %v998_v8  ;;  %v1267_v10 = vsel %vm9716_vm11, 0, %v1266_v57  ;;  %v1269_v43 = vld [vmem:[#allocation4 + $0x8] sm:$0x80]  ;;  %v947_v49 = vsel %vm9411_vm3, %v853_v5, %v946_v35  ;;  %v1222_v3 = vsel %vm9615_vm8, %v1089_v40, %v1221_v7  ;;  %v9759_v28 = vld [vmem:[#allocation3 + $0x10] sm:$0xff]  ;;  %v1225_v34 = vsel %vm9615_vm8, %v1096_v44, %v1224_v9 }
  0x3b   : > { %v9744_v52 = vld [vmem:[#allocation3 + $0x8] sm:$0xff]  ;;  %1002 = vst [vmem:[#allocation3 + $0x68] sm:$0x1] %v1001_v22  ;;  %1268 = vst [vmem:[#allocation4] sm:$0x80] %v1267_v10  ;;  %v1270_v42 = vsel %vm9716_vm11, 0, %v1269_v43  ;;  %v860_v35 = vor.u32 %v858_v12, %v857_v48 }
  0x3c   : > { %v9751_v59 = vld [vmem:[%s11298_s3 + $0xc] sm:$0xf]  ;;  %v1272_v26 = vld [vmem:[#allocation4 + $0x10] sm:$0x80]  ;;  %v1003_v53 = vld [vmem:[#allocation3 + $0x70] sm:$0x1]  ;;  %8076 = vmatmul.mubr.msk.bf16.vlgmr.msra.gmra.mrb[0].mxu0 %vm641_vm1, %v9744_v52 }
  0x3d   : > { %948 = vst [vmem:[#allocation3 + $0x80] sm:$0xff] %v947_v49  ;;  %1271 = vst [vmem:[#allocation4 + $0x8] sm:$0x80] %v1270_v42  ;;  %v1273_v60 = vsel %vm9716_vm11, 0, %v1272_v26  ;;  %v1102_v38 = vrot.slane %v795_v21, 1  ;;  %v1004_v0 = vsel %vm9490_vm6, 0, %v1003_v53  ;;  %v950_v21 = vsel %vm9411_vm3, %v860_v35, %v949_v17  ;;  %8112 = vmatpush3.bf16.msra.mxu0 %v9675_v30  ;;  %8079 = vmatprep.mubr.msk.bf16.mxu0 %vm641_vm1, %v9759_v28 }
  0x3e   : > { %1220 = vst [vmem:[#allocation4 + $0x28] sm:$0xff] %v1219_v55  ;;  %1223 = vst [vmem:[#allocation4 + $0x30] sm:$0xff] %v1222_v3  ;;  %v1227_v7 = vld [vmem:[#allocation4 + $0x40] sm:$0xff]  ;;  %v1109_v8 = vrot.slane %v802_v39, 1  ;;  %v1116_v51 = vrot.slane %v809_v63, 1  ;;  %v1123_v5 = vrot.slane %v816_v13, 1  ;;  %9233 = vmatprep.subr.msk.bf16.mxu0 %vm1419_vm0, %v9751_v59 }
  0x3f   : > { %1274 = vst [vmem:[#allocation4 + $0x10] sm:$0x80] %v1273_v60  ;;  %1226 = vst [vmem:[#allocation4 + $0x38] sm:$0xff] %v1225_v34  ;;  %v1103_v57 = vor.u32 %v1102_v38, %v792_v16  ;;  %v1230_v36 = vld [vmem:[#allocation4 + $0x48] sm:$0xff]  ;;  %v1233_v40 = vld [vmem:[#allocation4 + $0x50] sm:$0xff]  ;;  %v1130_v39 = vrot.slane %v823_v24, 1 }
  0x40   : > { %1005 = vst [vmem:[#allocation3 + $0x70] sm:$0x1] %v1004_v0  ;;  %v1236_v9 = vld [vmem:[#allocation4 + $0x58] sm:$0xff]  ;;  %v1137_v63 = vrot.slane %v830_v32, 1  ;;  %951 = vst [vmem:[#allocation3 + $0x88] sm:$0xff] %v950_v21  ;;  %v1110_v62 = vor.u32 %v1109_v8, %v799_v29  ;;  %v1117_v16 = vor.u32 %v1116_v51, %v806_v41  ;;  %v1124_v22 = vor.u32 %v1123_v5, %v813_v1  ;;  %v1239_v24 = vld [vmem:[#allocation4 + $0x60] sm:$0xff] }
  0x41   : > { %v1006_v13 = vld [vmem:[#allocation3 + $0x78] sm:$0x1]  ;;  %v1242_v48 = vld [vmem:[#allocation4 + $0x68] sm:$0xff]  ;;  %v1144_v32 = vrot.slane %v837_v14, 1  ;;  %v1275_v17 = vld [vmem:[#allocation4 + $0x18] sm:$0x80]  ;;  %v1228_v29 = vsel %vm9615_vm8, %v1103_v57, %v1227_v7  ;;  %v1131_v41 = vor.u32 %v1130_v39, %v820_v23 }
  0x42   : > { %v1007_v30 = vsel %vm9490_vm6, 0, %v1006_v13  ;;  %v1278_v6 = vld [vmem:[#allocation4 + $0x20] sm:$0x80]  ;;  %v1138_v1 = vor.u32 %v1137_v63, %v827_v33  ;;  %v1276_v14 = vsel %vm9716_vm11, 0, %v1275_v17  ;;  %1229 = vst [vmem:[#allocation4 + $0x40] sm:$0xff] %v1228_v29  ;;  %v1231_v43 = vsel %vm9615_vm8, %v1110_v62, %v1230_v36  ;;  %v1245_v49 = vld [vmem:[#allocation4 + $0x70] sm:$0xff] }
  0x43   : > { %1008 = vst [vmem:[#allocation3 + $0x78] sm:$0x1] %v1007_v30  ;;  %v1279_v10 = vsel %vm9716_vm11, 0, %v1278_v6  ;;  %v1234_v44 = vsel %vm9615_vm8, %v1117_v16, %v1233_v40  ;;  %v9816_v42 = vld [vmem:[#allocation3 + $0x18] sm:$0xff]  ;;  %1277 = vst [vmem:[#allocation4 + $0x18] sm:$0x80] %v1276_v14  ;;  %v1237_v23 = vsel %vm9615_vm8, %v1124_v22, %v1236_v9  ;;  %v1240_v33 = vsel %vm9615_vm8, %v1131_v41, %v1239_v24 }
  0x44   : > { %1280 = vst [vmem:[#allocation4 + $0x20] sm:$0x80] %v1279_v10  ;;  %1232 = vst [vmem:[#allocation4 + $0x48] sm:$0xff] %v1231_v43  ;;  %v1243_v26 = vsel %vm9615_vm8, %v1138_v1, %v1242_v48  ;;  %v1145_v55 = vor.u32 %v1144_v32, %v834_v19  ;;  %v9826_v3 = vld [vmem:[#allocation3 + $0x20] sm:$0xff]  ;;  %v1151_v60 = vrot.slane %v844_v20, 1  ;;  %v1248_v7 = vld [vmem:[#allocation4 + $0x78] sm:$0xff]  ;;  %8080 = vmatmul.mubr.msk.bf16.gmra.mrb[4].mxu0 %vm641_vm1, %v9816_v42 }
  0x45   : > { %1235 = vst [vmem:[#allocation4 + $0x50] sm:$0xff] %v1234_v44  ;;  %v1009_v53 = vld [vmem:[#allocation3 + $0x80] sm:$0x1]  ;;  %v1281_v35 = vld [vmem:[#allocation4 + $0x28] sm:$0x80]  ;;  %1238 = vst [vmem:[#allocation4 + $0x58] sm:$0xff] %v1237_v23  ;;  %8083 = vmatprep.mubr.msk.bf16.mxu0 %vm641_vm1, %v9826_v3 }
  0x46   : > { %1241 = vst [vmem:[#allocation4 + $0x60] sm:$0xff] %v1240_v33  ;;  %1244 = vst [vmem:[#allocation4 + $0x68] sm:$0xff] %v1243_v26  ;;  %v1010_v34 = vsel %vm9490_vm6, 0, %v1009_v53  ;;  %v1282_v38 = vsel %vm9716_vm11, 0, %v1281_v35  ;;  %v1284_v0 = vld [vmem:[#allocation4 + $0x30] sm:$0x80]  ;;  %v1246_v19 = vsel %vm9615_vm8, %v1145_v55, %v1245_v49  ;;  %v1152_v5 = vor.u32 %v1151_v60, %v841_v18 }
  0x47   : > { %v1158_v8 = vrot.slane %v851_v11, 1  ;;  %1011 = vst [vmem:[#allocation3 + $0x80] sm:$0x1] %v1010_v34  ;;  %1283 = vst [vmem:[#allocation4 + $0x28] sm:$0x80] %v1282_v38  ;;  %v1285_v51 = vsel %vm9716_vm11, 0, %v1284_v0 }
  0x48   : > { %v1287_v20 = vld [vmem:[#allocation4 + $0x38] sm:$0x80]  ;;  %1247 = vst [vmem:[#allocation4 + $0x70] sm:$0xff] %v1246_v19  ;;  %v1251_v21 = vld [vmem:[#allocation4 + $0x80] sm:$0xff]  ;;  %v1165_v57 = vrot.slane %v858_v12, 1  ;;  %v1254_v9 = vld [vmem:[#allocation4 + $0x88] sm:$0xff]  ;;  %v1249_v12 = vsel %vm9615_vm8, %v1152_v5, %v1248_v7 }
  0x49   : > { %v1012_v36 = vld [vmem:[#allocation3 + $0x88] sm:$0x1]  ;;  %1286 = vst [vmem:[#allocation4 + $0x30] sm:$0x80] %v1285_v51  ;;  %v1288_v11 = vsel %vm9716_vm11, 0, %v1287_v20  ;;  %v1159_v40 = vor.u32 %v1158_v8, %v848_v58  ;;  %1250 = vst [vmem:[#allocation4 + $0x78] sm:$0xff] %v1249_v12 }
  0x4a   : > { %v1013_v18 = vsel %vm9490_vm6, 0, %v1012_v36  ;;  %1289 = vst [vmem:[#allocation4 + $0x38] sm:$0x80] %v1288_v11  ;;  %v1166_v39 = vor.u32 %v1165_v57, %v855_v27  ;;  %v1290_v63 = vld [vmem:[#allocation4 + $0x40] sm:$0x80]  ;;  %v9864_v22 = vld [vmem:[#allocation3 + $0x28] sm:$0xff] }
  0x4b   : > { %1014 = vst [vmem:[#allocation3 + $0x88] sm:$0x1] %v1013_v18  ;;  %v1252_v58 = vsel %vm9615_vm8, %v1159_v40, %v1251_v21  ;;  %v1291_v13 = vsel %vm9716_vm11, 0, %v1290_v63  ;;  %v1293_v62 = vld [vmem:[#allocation4 + $0x48] sm:$0x80]  ;;  %v9872_v29 = vld [vmem:[#allocation3 + $0x30] sm:$0xff] }
  0x4c   : > { %1253 = vst [vmem:[#allocation4 + $0x80] sm:$0xff] %v1252_v58  ;;  %v1255_v16 = vsel %vm9615_vm8, %v1166_v39, %v1254_v9  ;;  %1292 = vst [vmem:[#allocation4 + $0x40] sm:$0x80] %v1291_v13  ;;  %v1294_v27 = vsel %vm9716_vm11, 0, %v1293_v62  ;;  %v1296_v24 = vld [vmem:[#allocation4 + $0x50] sm:$0x80]  ;;  %8084 = vmatmul.mubr.msk.bf16.gmra.mrb[8].mxu0 %vm641_vm1, %v9864_v22 }
  0x4d   : > { %v1299_v48 = vld [vmem:[#allocation4 + $0x58] sm:$0x80]  ;;  %1256 = vst [vmem:[#allocation4 + $0x88] sm:$0xff] %v1255_v16  ;;  %1295 = vst [vmem:[#allocation4 + $0x48] sm:$0x80] %v1294_v27  ;;  %v1297_v32 = vsel %vm9716_vm11, 0, %v1296_v24  ;;  %8087 = vmatprep.mubr.msk.bf16.mxu0 %vm641_vm1, %v9872_v29 }
  0x4e   : > { %v1300_v30 = vsel %vm9716_vm11, 0, %v1299_v48  ;;  %v1302_v17 = vld [vmem:[#allocation4 + $0x60] sm:$0x80]  ;;  %v1305_v6 = vld [vmem:[#allocation4 + $0x68] sm:$0x80]  ;;  %v9890_v55 = vld [vmem:[#allocation3 + $0x38] sm:$0xff] }
  0x4f   : > { %1298 = vst [vmem:[#allocation4 + $0x50] sm:$0x80] %v1297_v32  ;;  %1301 = vst [vmem:[#allocation4 + $0x58] sm:$0x80] %v1300_v30  ;;  %v1303_v41 = vsel %vm9716_vm11, 0, %v1302_v17  ;;  %v1306_v1 = vsel %vm9716_vm11, 0, %v1305_v6 }
  0x50   : > { %v1308_v14 = vld [vmem:[#allocation4 + $0x70] sm:$0x80]  ;;  %1304 = vst [vmem:[#allocation4 + $0x60] sm:$0x80] %v1303_v41  ;;  %1307 = vst [vmem:[#allocation4 + $0x68] sm:$0x80] %v1306_v1 }
  0x51   : > { %v1309_v10 = vsel %vm9716_vm11, 0, %v1308_v14  ;;  %v1311_v43 = vld [vmem:[#allocation4 + $0x78] sm:$0x80]  ;;  %v9892_v53 = vld [vmem:[#allocation3 + $0x40] sm:$0xff]  ;;  %v9898_v35 = vld [vmem:[#allocation3 + $0x48] sm:$0xff]  ;;  %v2200_v12 = vsel %vm1419_vm0, %v9751_v59, 0 }
  0x52   : > { %1310 = vst [vmem:[#allocation4 + $0x70] sm:$0x80] %v1309_v10  ;;  %v1312_v44 = vsel %vm9716_vm11, 0, %v1311_v43  ;;  %v9900_v60 = vld [vmem:[#allocation3 + $0x50] sm:$0xff]  ;;  %v9906_v34 = vld [vmem:[#allocation3 + $0x58] sm:$0xff]  ;;  %v9908_v38 = vld [vmem:[#allocation3 + $0x60] sm:$0xff] }
  0x53   : > { %v1314_v49 = vld [vmem:[#allocation4 + $0x80] sm:$0x80]  ;;  %1313 = vst [vmem:[#allocation4 + $0x78] sm:$0x80] %v1312_v44  ;;  %v9914_v0 = vld [vmem:[#allocation3 + $0x68] sm:$0xff]  ;;  %v9916_v19 = vld [vmem:[#allocation3 + $0x70] sm:$0xff] }
  0x54   : > { %v1315_v23 = vsel %vm9716_vm11, 0, %v1314_v49  ;;  %v1317_v33 = vld [vmem:[#allocation4 + $0x88] sm:$0x80]  ;;  %8088 = vmatmul.mubr.msk.bf16.gmra.mrb[12].mxu0 %vm641_vm1, %v9890_v55  ;;  %v9922_v7 = vld [vmem:[#allocation3 + $0x78] sm:$0xff]  ;;  %v9924_v8 = vld [vmem:[#allocation3 + $0x80] sm:$0xff] }
  0x55   : > { %1316 = vst [vmem:[#allocation4 + $0x80] sm:$0x80] %v1315_v23  ;;  %v1318_v26 = vsel %vm9716_vm11, 0, %v1317_v33  ;;  %8091 = vmatprep.mubr.msk.bf16.mxu0 %vm641_vm1, %v9892_v53  ;;  %v9926_v51 = vld [vmem:[#allocation2 + $0x90] sm:$0xff]  ;;  %v9938_v36 = vld [vmem:[#allocation3 + $0x88] sm:$0xff]  ;;  %v1834_v40 = vld [vmem:[#allocation4] sm:$0xff] }
  0x56   : > { %1319 = vst [vmem:[#allocation4 + $0x88] sm:$0x80] %v1318_v26  ;;  %v862_v20 = vshrl.u32 %v9926_v51, 16  ;;  %v865_v21 = vshll.u32 %v9926_v51, 16  ;;  %v952_v11 = vld [vmem:[#allocation3 + $0x90] sm:$0xff]  ;;  %v9945_v18 = vld [vmem:[#allocation4 + $0x8] sm:$0xff] }
  0x57   : > { %v9949_v39 = vld [vmem:[#allocation4 + $0x10] sm:$0xff]  ;;  %v9961_v59 = vld [vmem:[#allocation4 + $0x18] sm:$0xff]  ;;  %v9963_v62 = vld [vmem:[#allocation4 + $0x20] sm:$0xff] }
  0x58   : > { %v864_v5 = vrot.slane %v862_v20, 7  ;;  %v7389_v58 = vld [vmem:[%s11298_s3 + $0x10] sm:$0xf]  ;;  %v9969_v16 = vld [vmem:[#allocation4 + $0x28] sm:$0xff]  ;;  %v9977_v24 = vld [vmem:[#allocation4 + $0x38] sm:$0xff] }
  0x59   : > { %v9971_v27 = vld [vmem:[#allocation4 + $0x30] sm:$0xff]  ;;  %v9979_v48 = vld [vmem:[#allocation4 + $0x40] sm:$0xff]  ;;  %v9985_v32 = vld [vmem:[#allocation4 + $0x48] sm:$0xff]  ;;  %v2491_v44 = vsel %vm1419_vm0, %v7389_v58, 0 }
  0x5a   : > { %v867_v57 = vor.u32 %v865_v21, %v864_v5  ;;  %v9987_v30 = vld [vmem:[#allocation4 + $0x50] sm:$0xff]  ;;  %v9993_v17 = vld [vmem:[#allocation4 + $0x58] sm:$0xff]  ;;  %v9995_v6 = vld [vmem:[#allocation4 + $0x60] sm:$0xff] }
  0x5b   : > { %v10001_v41 = vld [vmem:[#allocation4 + $0x68] sm:$0xff]  ;;  %v10003_v1 = vld [vmem:[#allocation4 + $0x70] sm:$0xff]  ;;  %v10009_v14 = vld [vmem:[#allocation4 + $0x78] sm:$0xff] }
  0x5c   : > { %8092 = vmatmul.mubr.msk.bf16.gmra.mrb[16].mxu0 %vm641_vm1, %v9898_v35  ;;  %v953_v9 = vsel %vm9411_vm3, %v867_v57, %v952_v11  ;;  %v10011_v10 = vld [vmem:[#allocation4 + $0x80] sm:$0xff]  ;;  %v7408_v49 = vld [vmem:[%s11298_s3 + $0x14] sm:$0xf]  ;;  %v10074_v26 = vld [vmem:[#allocation2 + $0x18] sm:$0xff] }
  0x5d   : > { %8095 = vmatprep.mubr.msk.bf16.mxu0 %vm641_vm1, %v9900_v60  ;;  %954 = vst [vmem:[#allocation3 + $0x90] sm:$0xff] %v953_v9  ;;  %v10017_v43 = vld [vmem:[#allocation4 + $0x88] sm:$0xff]  ;;  %v10071_v23 = vld [vmem:[#allocation2 + $0x10] sm:$0xff]  ;;  %v2782_v33 = vsel %vm1419_vm0, %v7408_v49, 0  ;;  %v10102_v57 = vld [vmem:[#allocation2 + $0x40] sm:$0xff] }
  0x5e   : > { %v10094_v5 = vld [vmem:[#allocation2 + $0x30] sm:$0xff]  ;;  %v10104_v11 = vld [vmem:[#allocation2 + $0x48] sm:$0xff] }
  0x64   : > { %8096 = vmatmul.mubr.msk.bf16.gmra.mrb[20].mxu0 %vm641_vm1, %v9906_v34  ;;  %v1015_v63 = vld [vmem:[#allocation3 + $0x90] sm:$0x1] }
  0x65   : > { %8099 = vmatprep.mubr.msk.bf16.mxu0 %vm641_vm1, %v9908_v38  ;;  %v1016_v13 = vsel %vm9490_vm6, 0, %v1015_v63  ;;  %v7446_v63 = vld [vmem:[%s11298_s3 + $0x1c] sm:$0xf] }
  0x66   : > { %1017 = vst [vmem:[#allocation3 + $0x90] sm:$0x1] %v1016_v13  ;;  %v10173_v13 = vld [vmem:[#allocation2 + $0x58] sm:$0xff] }
  0x6c   : > { %8100 = vmatmul.mubr.msk.bf16.gmra.mrb[24].mxu0 %vm641_vm1, %v9914_v0 }
  0x6d   : > { %8103 = vmatprep.mubr.msk.bf16.mxu0 %vm641_vm1, %v9916_v19 }
  0x74   : > { %8104 = vmatmul.mubr.msk.bf16.gmra.mrb[28].mxu0 %vm641_vm1, %v9922_v7 }
  0x75   : > { %8107 = vmatprep.mubr.msk.bf16.mxu0 %vm641_vm1, %v9924_v8 }
  0x7c   : > { %8108 = vmatmul.mubr.msk.bf16.gmra.mrb[32].mxu0 %vm641_vm1, %v9938_v36 }
  0x7d   : > { %8113 = vmatprep.mubr.msk.bf16.mxu0 %vm641_vm1, %v1834_v40  ;;  %v10122_v40 = vld [vmem:[#allocation2 + $0x98] sm:$0xff] }
  0x84   : > { %8114 = vmatmul.mubr.msk.bf16.vlgmr.msra.gmra.mrb[0].mxu0 %vm641_vm1, %v9945_v18 }
  0x85   : > { %8150 = vmatpush3.bf16.msra.mxu0 %v2200_v12  ;;  %8117 = vmatprep.mubr.msk.bf16.mxu0 %vm641_vm1, %v9949_v39 }
  0x86   : > { %9234 = vmatprep.subr.msk.bf16.mxu0 %vm1419_vm0, %v7389_v58 }
  0x8c   : > { %8118 = vmatmul.mubr.msk.bf16.gmra.mrb[4].mxu0 %vm641_vm1, %v9961_v59 }
  0x8d   : > { %8121 = vmatprep.mubr.msk.bf16.mxu0 %vm641_vm1, %v9963_v62 }
  0x94   : > { %8122 = vmatmul.mubr.msk.bf16.gmra.mrb[8].mxu0 %vm641_vm1, %v9969_v16 }
  0x95   : > { %8125 = vmatprep.mubr.msk.bf16.mxu0 %vm641_vm1, %v9971_v27 }
  0x9c   : > { %8126 = vmatmul.mubr.msk.bf16.gmra.mrb[12].mxu0 %vm641_vm1, %v9977_v24 }
  0x9d   : > { %8129 = vmatprep.mubr.msk.bf16.mxu0 %vm641_vm1, %v9979_v48 }
  0xa4   : > { %8130 = vmatmul.mubr.msk.bf16.gmra.mrb[16].mxu0 %vm641_vm1, %v9985_v32 }
  0xa5   : > { %8133 = vmatprep.mubr.msk.bf16.mxu0 %vm641_vm1, %v9987_v30 }
  0xac   : > { %8134 = vmatmul.mubr.msk.bf16.gmra.mrb[20].mxu0 %vm641_vm1, %v9993_v17 }
  0xad   : > { %8137 = vmatprep.mubr.msk.bf16.mxu0 %vm641_vm1, %v9995_v6 }
  0xb4   : > { %8138 = vmatmul.mubr.msk.bf16.gmra.mrb[24].mxu0 %vm641_vm1, %v10001_v41 }
  0xb5   : > { %8141 = vmatprep.mubr.msk.bf16.mxu0 %vm641_vm1, %v10003_v1 }
  0xbc   : > { %8142 = vmatmul.mubr.msk.bf16.gmra.mrb[28].mxu0 %vm641_vm1, %v10009_v14 }
  0xbd   : > { %8145 = vmatprep.mubr.msk.bf16.mxu0 %vm641_vm1, %v10011_v10 }
  0xc4   : > { %8146 = vmatmul.mubr.msk.bf16.gmra.mrb[32].mxu0 %vm641_vm1, %v10017_v43 }
  0xc5   : > { %8151 = vmatprep.mubr.msk.bf16.mxu0 %vm641_vm1, %v9744_v52  ;;  %v1172_v52 = vrot.slane %v865_v21, 1  ;;  %v10096_v21 = vld [vmem:[#allocation2 + $0x38] sm:$0xff] }
  0xcc   : > { %8152 = vmatmul.mubr.msk.bf16.vlgmr.msra.gmra.mrb[0].mxu0 %vm641_vm1, %v9759_v28  ;;  %v1173_v28 = vor.u32 %v1172_v52, %v862_v20  ;;  %v10088_v20 = vld [vmem:[#allocation2 + $0x28] sm:$0xff]  ;;  %v10193_v52 = vld [vmem:[#allocation2 + $0x70] sm:$0xff] }
  0xcd   : > { %8188 = vmatpush3.bf16.msra.mxu0 %v2491_v44  ;;  %8155 = vmatprep.mubr.msk.bf16.mxu0 %vm641_vm1, %v9816_v42  ;;  %v10064_v42 = vld [vmem:[#allocation3 + $0x90] sm:$0xff]  ;;  %v10181_v44 = vld [vmem:[#allocation2 + $0x60] sm:$0xff] }
  0xce   : > { %9235 = vmatprep.subr.msk.bf16.mxu0 %vm1419_vm0, %v7408_v49  ;;  %v10185_v49 = vld [vmem:[#allocation2 + $0x68] sm:$0xff] }
  0xd4   : > { %8156 = vmatmul.mubr.msk.bf16.gmra.mrb[4].mxu0 %vm641_vm1, %v9826_v3  ;;  %v1257_v3 = vld [vmem:[#allocation4 + $0x90] sm:$0xff] }
  0xd5   : > { %8159 = vmatprep.mubr.msk.bf16.mxu0 %vm641_vm1, %v9864_v22  ;;  %v2416_v22 = vld [vmem:[#allocation2 + $0x8] sm:$0xff] }
  0xdc   : > { %8160 = vmatmul.mubr.msk.bf16.gmra.mrb[8].mxu0 %vm641_vm1, %v9872_v29  ;;  %v1258_v29 = vsel %vm9615_vm8, %v1173_v28, %v1257_v3  ;;  %v10197_v28 = vld [vmem:[#allocation2 + $0x78] sm:$0xff] }
  0xdd   : > { %8163 = vmatprep.mubr.msk.bf16.mxu0 %vm641_vm1, %v9890_v55  ;;  %1259 = vst [vmem:[#allocation4 + $0x90] sm:$0xff] %v1258_v29  ;;  %v2999_v29 = vld [vmem:[#allocation3 + $0x18] sm:$0xff] }
  0xe4   : > { %8164 = vmatmul.mubr.msk.bf16.gmra.mrb[12].mxu0 %vm641_vm1, %v9892_v53  ;;  %v1320_v55 = vld [vmem:[#allocation4 + $0x90] sm:$0x80]  ;;  %v7427_v53 = vld [vmem:[%s11298_s3 + $0x18] sm:$0xf] }
  0xe5   : > { %8167 = vmatprep.mubr.msk.bf16.mxu0 %vm641_vm1, %v9898_v35  ;;  %v1321_v35 = vsel %vm9716_vm11, 0, %v1320_v55  ;;  %v3073_v9 = vsel %vm1419_vm0, %v7427_v53, 0  ;;  %v3000_v55 = vld [vmem:[#allocation3 + $0x20] sm:$0xff] }
  0xe6   : > { %1322 = vst [vmem:[#allocation4 + $0x90] sm:$0x80] %v1321_v35  ;;  %v3001_v35 = vld [vmem:[#allocation3 + $0x28] sm:$0xff] }
  0xec   : > { %8168 = vmatmul.mubr.msk.bf16.gmra.mrb[16].mxu0 %vm641_vm1, %v9900_v60  ;;  %v10086_v60 = vld [vmem:[#allocation2 + $0x20] sm:$0xff] }
  0xed   : > { %8171 = vmatprep.mubr.msk.bf16.mxu0 %vm641_vm1, %v9906_v34  ;;  %v10203_v3 = vld [vmem:[#allocation4 + $0x90] sm:$0xff] }
  0xf4   : > { %8172 = vmatmul.mubr.msk.bf16.gmra.mrb[20].mxu0 %vm641_vm1, %v9908_v38 }
  0xf5   : > { %8175 = vmatprep.mubr.msk.bf16.mxu0 %vm641_vm1, %v9914_v0 }
  0xfc   : > { %8176 = vmatmul.mubr.msk.bf16.gmra.mrb[24].mxu0 %vm641_vm1, %v9916_v19 }
  0xfd   : > { %8179 = vmatprep.mubr.msk.bf16.mxu0 %vm641_vm1, %v9922_v7 }
 0x104   : > { %8180 = vmatmul.mubr.msk.bf16.gmra.mrb[28].mxu0 %vm641_vm1, %v9924_v8 }
 0x105   : > { %8183 = vmatprep.mubr.msk.bf16.mxu0 %vm641_vm1, %v9938_v36 }
 0x10c   : > { %8184 = vmatmul.mubr.msk.bf16.gmra.mrb[32].mxu0 %vm641_vm1, %v10064_v42 }
 0x10d   : > { %8189 = vmatprep.mubr.msk.bf16.mxu0 %vm641_vm1, %v2416_v22  ;;  %v2998_v22 = vld [vmem:[#allocation3 + $0x10] sm:$0xff] }
 0x114   : > { %8190 = vmatmul.mubr.msk.bf16.vlgmr.msra.gmra.mrb[0].mxu0 %vm641_vm1, %v10071_v23 }
 0x115   : > { %8226 = vmatpush3.bf16.msra.mxu0 %v2782_v33  ;;  %8193 = vmatprep.mubr.msk.bf16.mxu0 %vm641_vm1, %v10074_v26  ;;  %v3363_v33 = vsel %vm1419_vm0, %v7446_v63, 0 }
 0x116   : > { %9236 = vmatprep.subr.msk.bf16.mxu0 %vm1419_vm0, %v7427_v53  ;;  %v7465_v53 = vld [vmem:[%s11298_s3 + $0x20] sm:$0xf] }
 0x11c   : > { %8194 = vmatmul.mubr.msk.bf16.gmra.mrb[4].mxu0 %vm641_vm1, %v10086_v60 }
 0x11d   : > { %8197 = vmatprep.mubr.msk.bf16.mxu0 %vm641_vm1, %v10088_v20 }
 0x124   : > { %8198 = vmatmul.mubr.msk.bf16.gmra.mrb[8].mxu0 %vm641_vm1, %v10094_v5 }
 0x125   : > { %8201 = vmatprep.mubr.msk.bf16.mxu0 %vm641_vm1, %v10096_v21 }
 0x12c   : > { %8202 = vmatmul.mubr.msk.bf16.gmra.mrb[12].mxu0 %vm641_vm1, %v10102_v57 }
 0x12d   : > { %8205 = vmatprep.mubr.msk.bf16.mxu0 %vm641_vm1, %v10104_v11 }
 0x134   : > { %8206 = vmatmul.mubr.msk.bf16.gmra.mrb[16].mxu0 %vm641_vm1, %v9547_v31  ;;  %v869_v31 = vshrl.u32 %v10122_v40, 16 }
 0x135   : > { %8209 = vmatprep.mubr.msk.bf16.mxu0 %vm641_vm1, %v9568_v56 }
 0x136   : > { %v871_v56 = vrot.slane %v869_v31, 7 }
 0x13c   : > { %8210 = vmatmul.mubr.msk.bf16.gmra.mrb[20].mxu0 %vm641_vm1, %v9582_v15  ;;  %v872_v15 = vshll.u32 %v10122_v40, 16 }
 0x13d   : > { %8213 = vmatprep.mubr.msk.bf16.mxu0 %vm641_vm1, %v9596_v25 }
 0x13e   : > { %v874_v25 = vor.u32 %v872_v15, %v871_v56  ;;  %v3002_v56 = vld [vmem:[#allocation3 + $0x30] sm:$0xff] }
 0x144   : > { %8214 = vmatmul.mubr.msk.bf16.gmra.mrb[24].mxu0 %vm641_vm1, %v9621_v61  ;;  %v955_v61 = vld [vmem:[#allocation3 + $0x98] sm:$0xff] }
 0x145   : > { %8217 = vmatprep.mubr.msk.bf16.mxu0 %vm641_vm1, %v9653_v50  ;;  %v956_v50 = vsel %vm9411_vm3, %v874_v25, %v955_v61  ;;  %v3003_v25 = vld [vmem:[#allocation3 + $0x38] sm:$0xff]  ;;  %v3004_v61 = vld [vmem:[#allocation3 + $0x40] sm:$0xff] }
 0x146   : > { %957 = vst [vmem:[#allocation3 + $0x98] sm:$0xff] %v956_v50  ;;  %v3005_v50 = vld [vmem:[#allocation3 + $0x48] sm:$0xff] }
 0x14c   : > { %8218 = vmatmul.mubr.msk.bf16.gmra.mrb[28].mxu0 %vm641_vm1, %v9685_v46 }
 0x14d   : > { %8221 = vmatprep.mubr.msk.bf16.mxu0 %vm641_vm1, %v9712_v37  ;;  %v1018_v12 = vld [vmem:[#allocation3 + $0x98] sm:$0x1] }
 0x14e   : > { %v1019_v58 = vsel %vm9490_vm6, 0, %v1018_v12 }
 0x14f   : > { %1020 = vst [vmem:[#allocation3 + $0x98] sm:$0x1] %v1019_v58 }
 0x154   : > { %8222 = vmatmul.mubr.msk.bf16.gmra.mrb[32].mxu0 %vm641_vm1, %v9926_v51 }
 0x155   : > { %8227 = vmatprep.mubr.msk.bf16.mxu0 %vm641_vm1, %v9945_v18  ;;  %v10169_v18 = vld [vmem:[#allocation2 + $0x50] sm:$0xff] }
 0x156   : > { %8057 = vmatprep.mubr.msk.bf16.mxu1 %vm641_vm1, %v10169_v18 }
 0x157   : > { %8058 = vmatmul.mubr.msk.bf16.vlgmr.msra.gmra.mrb[0].mxu1 %vm641_vm1, %v10173_v13 }
 0x158   : > { %8061 = vmatprep.mubr.msk.bf16.mxu1 %vm641_vm1, %v10181_v44 }
 0x15c   : > { %8228 = vmatmul.mubr.msk.bf16.vlgmr.msra.gmra.mrb[0].mxu0 %vm641_vm1, %v9949_v39 }
 0x15d   : > { %8264 = vmatpush3.bf16.msra.mxu0 %v3073_v9  ;;  %8231 = vmatprep.mubr.msk.bf16.mxu0 %vm641_vm1, %v9961_v59  ;;  %v3006_v9 = vld [vmem:[#allocation3 + $0x50] sm:$0xff] }
 0x15e   : > { %9237 = vmatprep.subr.msk.bf16.mxu0 %vm1419_vm0, %v7446_v63 }
 0x15f   : > { %8062 = vmatmul.mubr.msk.bf16.gmra.mrb[4].mxu1 %vm641_vm1, %v10185_v49 }
 0x160   : > { %8065 = vmatprep.mubr.msk.bf16.mxu1 %vm641_vm1, %v10193_v52 }
 0x164   : > { %8232 = vmatmul.mubr.msk.bf16.gmra.mrb[4].mxu0 %vm641_vm1, %v9963_v62 }
 0x165   : > { %8235 = vmatprep.mubr.msk.bf16.mxu0 %vm641_vm1, %v9969_v16 }
 0x167   : > { %8066 = vmatmul.mubr.msk.bf16.gmra.mrb[8].mxu1 %vm641_vm1, %v10197_v28 }
 0x16c   : > { %8236 = vmatmul.mubr.msk.bf16.gmra.mrb[8].mxu0 %vm641_vm1, %v9971_v27 }
 0x16d   : > { %8239 = vmatprep.mubr.msk.bf16.mxu0 %vm641_vm1, %v9977_v24 }
 0x174   : > { %8240 = vmatmul.mubr.msk.bf16.gmra.mrb[12].mxu0 %vm641_vm1, %v9979_v48 }
 0x175   : > { %8243 = vmatprep.mubr.msk.bf16.mxu0 %vm641_vm1, %v9985_v32 }
 0x17c   : > { %8244 = vmatmul.mubr.msk.bf16.gmra.mrb[16].mxu0 %vm641_vm1, %v9987_v30 }
 0x17d   : > { %8247 = vmatprep.mubr.msk.bf16.mxu0 %vm641_vm1, %v9993_v17 }
 0x184   : > { %8248 = vmatmul.mubr.msk.bf16.gmra.mrb[20].mxu0 %vm641_vm1, %v9995_v6 }
 0x185   : > { %8251 = vmatprep.mubr.msk.bf16.mxu0 %vm641_vm1, %v10001_v41 }
 0x18c   : > { %8252 = vmatmul.mubr.msk.bf16.gmra.mrb[24].mxu0 %vm641_vm1, %v10003_v1 }
 0x18d   : > { %8255 = vmatprep.mubr.msk.bf16.mxu0 %vm641_vm1, %v10009_v14 }
 0x194   : > { %8256 = vmatmul.mubr.msk.bf16.gmra.mrb[28].mxu0 %vm641_vm1, %v10011_v10 }
 0x195   : > { %8259 = vmatprep.mubr.msk.bf16.mxu0 %vm641_vm1, %v10017_v43 }
 0x19c   : > { %8260 = vmatmul.mubr.msk.bf16.gmra.mrb[32].mxu0 %vm641_vm1, %v10203_v3 }
 0x19d   : > { %8265 = vmatprep.mubr.msk.bf16.mxu0 %vm641_vm1, %v2998_v22 }
 0x1a4   : > { %8266 = vmatmul.mubr.msk.bf16.vlgmr.msra.gmra.mrb[0].mxu0 %vm641_vm1, %v2999_v29 }
 0x1a5   : > { %8302 = vmatpush3.bf16.msra.mxu0 %v3363_v33  ;;  %8269 = vmatprep.mubr.msk.bf16.mxu0 %vm641_vm1, %v3000_v55 }
 0x1a6   : > { %9238 = vmatprep.subr.msk.bf16.mxu0 %vm1419_vm0, %v7465_v53 }
 0x1ac   : > { %8270 = vmatmul.mubr.msk.bf16.gmra.mrb[4].mxu0 %vm641_vm1, %v3001_v35 }
 0x1ad   : > { %8273 = vmatprep.mubr.msk.bf16.mxu0 %vm641_vm1, %v3002_v56 }
 0x1b4   : > { %8274 = vmatmul.mubr.msk.bf16.gmra.mrb[8].mxu0 %vm641_vm1, %v3003_v25 }
 0x1b5   : > { %8277 = vmatprep.mubr.msk.bf16.mxu0 %vm641_vm1, %v3004_v61 }
 0x1bc   : > { %8278 = vmatmul.mubr.msk.bf16.gmra.mrb[12].mxu0 %vm641_vm1, %v3005_v50 }
 0x1bd   : > { %8281 = vmatprep.mubr.msk.bf16.mxu0 %vm641_vm1, %v3006_v9 }
 0x1c4   : > { %8282 = vmatmul.mubr.msk.bf16.gmra.mrb[16].mxu0 %vm641_vm1, %v9906_v34  ;;  %v1179_v34 = vrot.slane %v872_v15, 1  ;;  %v1362_v15 = vld [vmem:[#allocation2 + $0x88] sm:$0xff] }
 0x1c5   : > { %8285 = vmatprep.mubr.msk.bf16.mxu0 %vm641_vm1, %v9908_v38 }
 0x1c6   : > { %v1180_v38 = vor.u32 %v1179_v34, %v869_v31  ;;  %v1361_v31 = vld [vmem:[#allocation2 + $0x80] sm:$0xff] }
 0x1c7   : > { %8069 = vmatprep.mubr.msk.bf16.mxu1 %vm641_vm1, %v1361_v31 }
 0x1c8   : > { %8070 = vmatmul.mubr.msk.bf16.gmra.mrb[12].mxu1 %vm641_vm1, %v1362_v15 }
 0x1cc   : > { %8286 = vmatmul.mubr.msk.bf16.gmra.mrb[20].mxu0 %vm641_vm1, %v9914_v0  ;;  %v3015_v0 = vld [vmem:[#allocation3 + $0x98] sm:$0xff] }
 0x1cd   : > { %8289 = vmatprep.mubr.msk.bf16.mxu0 %vm641_vm1, %v9916_v19  ;;  %v1260_v19 = vld [vmem:[#allocation4 + $0x98] sm:$0xff] }
 0x1d4   : > { %8290 = vmatmul.mubr.msk.bf16.gmra.mrb[24].mxu0 %vm641_vm1, %v9922_v7  ;;  %v1261_v7 = vsel %vm9615_vm8, %v1180_v38, %v1260_v19 }
 0x1d5   : > { %8293 = vmatprep.mubr.msk.bf16.mxu0 %vm641_vm1, %v9924_v8  ;;  %1262 = vst [vmem:[#allocation4 + $0x98] sm:$0xff] %v1261_v7  ;;  %v3654_v8 = vsel %vm1419_vm0, %v7465_v53, 0 }
 0x1dc   : > { %8294 = vmatmul.mubr.msk.bf16.gmra.mrb[28].mxu0 %vm641_vm1, %v9938_v36  ;;  %v1323_v36 = vld [vmem:[#allocation4 + $0x98] sm:$0x80] }
 0x1dd   : > { %8297 = vmatprep.mubr.msk.bf16.mxu0 %vm641_vm1, %v10064_v42  ;;  %v1324_v42 = vsel %vm9716_vm11, 0, %v1323_v36 }
 0x1de   : > { %1325 = vst [vmem:[#allocation4 + $0x98] sm:$0x80] %v1324_v42 }
 0x1e4   : > { %8298 = vmatmul.mubr.msk.bf16.gmra.mrb[32].mxu0 %vm641_vm1, %v3015_v0 }
 0x1e5   : > { %8303 = vmatprep.mubr.msk.bf16.mxu0 %vm641_vm1, %v10071_v23  ;;  %v7486_v23 = vld [vmem:[%s11301_s6 + $0x4] sm:$0xf] }
 0x1e6   : > { %9239 = vmatprep.subr.msk.bf16.mxu1 %vm1419_vm0, %v7486_v23 }
 0x1ec   : > { %8304 = vmatmul.mubr.msk.bf16.vlgmr.msra.gmra.mrb[0].mxu0 %vm641_vm1, %v10074_v26  ;;  %v4657_v26 = vsel %vm1419_vm0, %v7486_v23, 0 }
 0x1ed   : > { %8340 = vmatpush3.bf16.msra.mxu0 %v3654_v8  ;;  %8307 = vmatprep.mubr.msk.bf16.mxu0 %vm641_vm1, %v10086_v60 }
 0x1ee   : > { %8378 = vmatpush3.bf16.msra.mxu1 %v4657_v26 }
 0x1f4   : > { %8308 = vmatmul.mubr.msk.bf16.gmra.mrb[4].mxu0 %vm641_vm1, %v10088_v20  ;;  %v10372_v20 = vld [vmem:[%s11300_s5] ss:$0 sm:$0xff] }
 0x1f5   : > { %8311 = vmatprep.mubr.msk.bf16.mxu0 %vm641_vm1, %v10094_v5 }
 0x1fc   : > { %8312 = vmatmul.mubr.msk.bf16.gmra.mrb[8].mxu0 %vm641_vm1, %v10096_v21 }
 0x1fd   : > { %8315 = vmatprep.mubr.msk.bf16.mxu0 %vm641_vm1, %v10102_v57 }
 0x204   : > { %8316 = vmatmul.mubr.msk.bf16.gmra.mrb[12].mxu0 %vm641_vm1, %v10104_v11 }
 0x205   : > { %8319 = vmatprep.mubr.msk.bf16.mxu0 %vm641_vm1, %v10169_v18 }
 0x20c   : > { %8320 = vmatmul.mubr.msk.bf16.gmra.mrb[16].mxu0 %vm641_vm1, %v10173_v13 }
 0x20d   : > { %8323 = vmatprep.mubr.msk.bf16.mxu0 %vm641_vm1, %v10181_v44 }
 0x214   : > { %8324 = vmatmul.mubr.msk.bf16.gmra.mrb[20].mxu0 %vm641_vm1, %v10185_v49 }
 0x215   : > { %8327 = vmatprep.mubr.msk.bf16.mxu0 %vm641_vm1, %v10193_v52 }
 0x21c   : > { %8328 = vmatmul.mubr.msk.bf16.gmra.mrb[24].mxu0 %vm641_vm1, %v10197_v28 }
 0x21d   : > { %8331 = vmatprep.mubr.msk.bf16.mxu0 %vm641_vm1, %v9685_v46  ;;  %v3596_v46 = vld [vmem:[#allocation4 + $0x98] sm:$0xff] }
 0x224   : > { %8332 = vmatmul.mubr.msk.bf16.gmra.mrb[28].mxu0 %vm641_vm1, %v9712_v37  ;;  %v10328_v37 = vld [vmem:[%s11301_s6] sm:$0xf] }
 0x225   : > { %8335 = vmatprep.mubr.msk.bf16.mxu0 %vm641_vm1, %v9926_v51  ;;  %9240 = vmatprep.subr.msk.bf16.mxu1 %vm1419_vm0, %v10328_v37 }
 0x22a   : > { %v10330_v51 = vpop.f32.mrb[0].mxu1 }
 0x22c   : > { %8336 = vmatmul.mubr.msk.bf16.gmra.mrb[32].mxu0 %vm641_vm1, %v10122_v40 }
 0x22d   : > { %8341 = vmatprep.mubr.msk.bf16.mxu0 %vm641_vm1, %v9949_v39  ;;  %v10334_v39 = vpop.f32.mrb[1].mxu1 }
 0x234   : > { %8342 = vmatmul.mubr.msk.bf16.vlgmr.msra.gmra.mrb[0].mxu0 %vm641_vm1, %v9961_v59  ;;  %v10336_v59 = vpop.f32.mrb[2].mxu1 }
 0x235   : > { %8345 = vmatprep.mubr.msk.bf16.mxu0 %vm641_vm1, %v9963_v62  ;;  %v10338_v62 = vpop.f32.mrb[3].mxu1 }
 0x23c   : > { %8346 = vmatmul.mubr.msk.bf16.gmra.mrb[4].mxu0 %vm641_vm1, %v9969_v16  ;;  %v10340_v16 = vpop.f32.mrb[4].mxu1 }
 0x23d   : > { %8349 = vmatprep.mubr.msk.bf16.mxu0 %vm641_vm1, %v9971_v27  ;;  %v10342_v27 = vpop.f32.mrb[5].mxu1 }
 0x244   : > { %8350 = vmatmul.mubr.msk.bf16.gmra.mrb[8].mxu0 %vm641_vm1, %v9977_v24  ;;  %v10344_v24 = vpop.f32.mrb[6].mxu1 }
 0x245   : > { %8353 = vmatprep.mubr.msk.bf16.mxu0 %vm641_vm1, %v9979_v48  ;;  %v10346_v48 = vpop.f32.mrb[7].mxu1 }
 0x24c   : > { %8354 = vmatmul.mubr.msk.bf16.gmra.mrb[12].mxu0 %vm641_vm1, %v9985_v32  ;;  %v10348_v32 = vpop.f32.mrb[8].mxu1 }
 0x24d   : > { %8357 = vmatprep.mubr.msk.bf16.mxu0 %vm641_vm1, %v9987_v30  ;;  %v10350_v30 = vpop.f32.mrb[9].mxu1 }
 0x254   : > { %8358 = vmatmul.mubr.msk.bf16.gmra.mrb[16].mxu0 %vm641_vm1, %v9993_v17  ;;  %v10352_v17 = vpop.f32.mrb[10].mxu1 }
 0x255   : > { %8361 = vmatprep.mubr.msk.bf16.mxu0 %vm641_vm1, %v9995_v6  ;;  %v10354_v6 = vpop.f32.mrb[11].mxu1 }
 0x25c   : > { %8362 = vmatmul.mubr.msk.bf16.gmra.mrb[20].mxu0 %vm641_vm1, %v10001_v41 }
 0x25d   : > { %8365 = vmatprep.mubr.msk.bf16.mxu0 %vm641_vm1, %v10003_v1 }
 0x264   : > { %8366 = vmatmul.mubr.msk.bf16.gmra.mrb[24].mxu0 %vm641_vm1, %v10009_v14 }
 0x265   : > { %8369 = vmatprep.mubr.msk.bf16.mxu0 %vm641_vm1, %v10011_v10 }
 0x26c   : > { %8370 = vmatmul.mubr.msk.bf16.gmra.mrb[28].mxu0 %vm641_vm1, %v10017_v43  ;;  %v10367_v43 = vld [vmem:[%s11299_s4] ss:$0 sm:$0xff] }
 0x26d   : > { %8373 = vmatprep.mubr.msk.bf16.mxu0 %vm641_vm1, %v10203_v3 }
 0x274   : > { %8374 = vmatmul.mubr.msk.bf16.gmra.mrb[32].mxu0 %vm641_vm1, %v3596_v46 }
 0x29b   : > { %v10356_v41 = vpop.f32.mrb[12].mxu1 }
 0x29c   : > { %v10358_v1 = vpop.f32.mrb[13].mxu1 }
 0x29d   : > { %v10360_v14 = vpop.f32.mrb[14].mxu1 }
 0x29e   : > { %v10362_v10 = vpop.f32.mrb[15].mxu1 }
 0x307   : > { %v8343_v60 = vpop.f32.mrb[0].mxu0 }
 0x308   : > { %v3878_v5 = vmul.f32 %v8343_v60, %v10367_v43  ;;  %v3690_v21 = vpop.f32.mrb[1].mxu0 }
 0x309   : > { %v3876_v57 = vmul.f32 %v10367_v43, %v3690_v21  ;;  %v8344_v11 = vpop.f32.mrb[2].mxu0 }
 0x30a   : > { %v3921_v40 = vadd.f32 %v10372_v20, %v3878_v5  ;;  %v3879_v12 = vmul.f32 %v8344_v11, %v10367_v43  ;;  %v3693_v63 = vpop.f32.mrb[3].mxu0 }
 0x30b   : > { %v3919_v58 = vadd.f32 %v10372_v20, %v3876_v57  ;;  %v3877_v18 = vmul.f32 %v10367_v43, %v3693_v63 }
 0x30c   : > { %v3922_v13 = vadd.f32 %v10372_v20, %v3879_v12  ;;  %v3957_v49 = vmax.f32 %v3921_v40, 0.0 }
 0x30d   : > { %v3920_v44 = vadd.f32 %v10372_v20, %v3877_v18  ;;  %v3955_v28 = vmax.f32 %v3919_v58, 0.0 }
 0x30e   : > { %v3958_v52 = vmax.f32 %v3922_v13, 0.0  ;;  %v4869_v13 = vsel %vm1419_vm0, %v10328_v37, 0 }
 0x30f   : > { %v3956_v3 = vmax.f32 %v3920_v44, 0.0  ;;  %v8347_v22 = vpop.f32.mrb[4].mxu0 }
 0x310   : > { %v3992_v29 = vpack.c.bf16 %v3958_v52, %v3957_v49  ;;  %v3882_v33 = vmul.f32 %v8347_v22, %v10367_v43  ;;  %v3706_v55 = vpop.f32.mrb[5].mxu0 }
 0x311   : > { %v3991_v53 = vpack.c.bf16 %v3956_v3, %v3955_v28  ;;  %v3880_v35 = vmul.f32 %v10367_v43, %v3706_v55  ;;  %v8348_v56 = vpop.f32.mrb[6].mxu0  ;;  %v10408_v3 = vld [vmem:[%s11301_s6 + $0x8] sm:$0xf] }
 0x312   : > { %4010 = vst.msk [vmem:[#allocation5 + $0x8] sm:$0xff] %vm641_vm1, %v3992_v29  ;;  %v3925_v25 = vadd.f32 %v10372_v20, %v3882_v33  ;;  %v3883_v61 = vmul.f32 %v8348_v56, %v10367_v43  ;;  %v3709_v50 = vpop.f32.mrb[7].mxu0  ;;  %v4198_v33 = vld [vmem:[#allocation6 + $0x8] sm:$0xff]  ;;  %v4468_v56 = vld [vmem:[#allocation7 + $0x8] sm:$0xff] }
 0x313   : > { %4009 = vst.msk [vmem:[#allocation5] sm:$0xff] %vm641_vm1, %v3991_v53  ;;  %v3923_v9 = vadd.f32 %v10372_v20, %v3880_v35  ;;  %v3881_v34 = vmul.f32 %v10367_v43, %v3709_v50 }
 0x314   : > { %4030 = vst.msk [vmem:[#allocation5] sm:$0xff] %vm641_vm1, %v9313_v2  ;;  %v3926_v38 = vadd.f32 %v10372_v20, %v3883_v61  ;;  %v3961_v19 = vmax.f32 %v3925_v25, 0.0 }
 0x315   : > { %v3924_v0 = vadd.f32 %v10372_v20, %v3881_v34  ;;  %v3959_v8 = vmax.f32 %v3923_v9, 0.0 }
 0x316   : > { %v3962_v7 = vmax.f32 %v3926_v38, 0.0 }
 0x317   : > { %v3960_v36 = vmax.f32 %v3924_v0, 0.0  ;;  %v8351_v42 = vpop.f32.mrb[8].mxu0 }
 0x318   : > { %v3994_v31 = vpack.c.bf16 %v3962_v7, %v3961_v19  ;;  %v3886_v15 = vmul.f32 %v8351_v42, %v10367_v43  ;;  %v3722_v23 = vpop.f32.mrb[9].mxu0 }
 0x319   : > { %v4034_v26 = vld [vmem:[#allocation5 + $0x8] sm:$0xff]  ;;  %v3993_v46 = vpack.c.bf16 %v3960_v36, %v3959_v8  ;;  %v3884_v60 = vmul.f32 %v10367_v43, %v3722_v23  ;;  %v8352_v5 = vpop.f32.mrb[10].mxu0 }
 0x31a   : > { %v4059_v21 = vshrl.u32 %v4034_v26, 16  ;;  %v4062_v57 = vshll.u32 %v4034_v26, 16  ;;  %4012 = vst.msk [vmem:[#allocation5 + $0x18] sm:$0xff] %vm641_vm1, %v3994_v31  ;;  %v3887_v11 = vmul.f32 %v8352_v5, %v10367_v43  ;;  %v3725_v40 = vpop.f32.mrb[11].mxu0  ;;  %v3929_v63 = vadd.f32 %v10372_v20, %v3886_v15 }
 0x31b   : > { %v4033_v12 = vld [vmem:[#allocation5] sm:$0xff]  ;;  %4011 = vst.msk [vmem:[#allocation5 + $0x10] sm:$0xff] %vm641_vm1, %v3993_v46  ;;  %v3927_v58 = vadd.f32 %v10372_v20, %v3884_v60  ;;  %v3885_v18 = vmul.f32 %v10367_v43, %v3725_v40 }
 0x31c   : > { %v4061_v44 = vrot.slane %v4059_v21, 7  ;;  %v4333_v49 = vrot.slane %v4062_v57, 1  ;;  %v4052_v52 = vshrl.u32 %v4033_v12, 16  ;;  %v4055_v28 = vshll.u32 %v4033_v12, 16  ;;  %8379 = vmatprep.mubr.msk.bf16.mxu1 %vm641_vm1, %v4033_v12 }
 0x31d   : > { %v3930_v22 = vadd.f32 %v10372_v20, %v3887_v11  ;;  %v3928_v29 = vadd.f32 %v10372_v20, %v3885_v18  ;;  %8380 = vmatmul.mubr.msk.bf16.vlgmr.msra.gmra.mrb[16].mxu1 %vm641_vm1, %v4034_v26  ;;  %v3965_v25 = vmax.f32 %v3929_v63, 0.0  ;;  %v3963_v61 = vmax.f32 %v3927_v58, 0.0  ;;  %v4195_v18 = vld [vmem:[#allocation6] sm:$0xff] }
 0x31e   : > { %v4064_v55 = vor.u32 %v4062_v57, %v4061_v44  ;;  %v4334_v37 = vor.u32 %v4333_v49, %v4059_v21  ;;  %v4054_v53 = vrot.slane %v4052_v52, 7  ;;  %v4326_v35 = vrot.slane %v4055_v28, 1  ;;  %8412 = vmatpush3.bf16.msra.mxu1 %v4869_v13  ;;  %v4465_v13 = vld [vmem:[#allocation7] sm:$0xff] }
 0x31f   : > { %v3966_v50 = vmax.f32 %v3930_v22, 0.0  ;;  %v3964_v9 = vmax.f32 %v3928_v29, 0.0  ;;  %v8355_v34 = vpop.f32.mrb[12].mxu0  ;;  %9241 = vmatprep.subr.msk.bf16.mxu1 %vm1419_vm0, %v10408_v3 }
 0x320   : > { %v3890_v38 = vmul.f32 %v8355_v34, %v10367_v43  ;;  %v3738_v0 = vpop.f32.mrb[13].mxu0  ;;  %v4057_v19 = vor.u32 %v4055_v28, %v4054_v53  ;;  %v4199_v7 = vsel %vm9411_vm3, %v4064_v55, %v4198_v33  ;;  %v4327_v8 = vor.u32 %v4326_v35, %v4052_v52  ;;  %v4204_v55 = vld [vmem:[#allocation6 + $0x18] sm:$0xff]  ;;  %v4201_v35 = vld [vmem:[#allocation6 + $0x10] sm:$0xff] }
 0x321   : > { %v4036_v36 = vld [vmem:[#allocation5 + $0x18] sm:$0xff]  ;;  %v3996_v42 = vpack.c.bf16 %v3966_v50, %v3965_v25  ;;  %v3995_v31 = vpack.c.bf16 %v3964_v9, %v3963_v61  ;;  %v3888_v15 = vmul.f32 %v10367_v43, %v3738_v0  ;;  %v8356_v23 = vpop.f32.mrb[14].mxu0  ;;  %4200 = vst [vmem:[#allocation6 + $0x8] sm:$0xff] %v4199_v7  ;;  %v4469_v26 = vsel %vm9615_vm8, %v4334_v37, %v4468_v56  ;;  %v4471_v0 = vld [vmem:[#allocation7 + $0x10] sm:$0xff] }
 0x322   : > { %v4073_v46 = vshrl.u32 %v4036_v36, 16  ;;  %v4076_v60 = vshll.u32 %v4036_v36, 16  ;;  %v4035_v5 = vld [vmem:[#allocation5 + $0x10] sm:$0xff]  ;;  %v3933_v21 = vadd.f32 %v10372_v20, %v3890_v38  ;;  %v3891_v57 = vmul.f32 %v8356_v23, %v10367_v43  ;;  %v3741_v11 = vpop.f32.mrb[15].mxu0  ;;  %4470 = vst [vmem:[#allocation7 + $0x8] sm:$0xff] %v4469_v26 }
 0x323   : > { %v4066_v40 = vshrl.u32 %v4035_v5, 16  ;;  %v4069_v12 = vshll.u32 %v4035_v5, 16  ;;  %4014 = vst.msk [vmem:[#allocation5 + $0x28] sm:$0xff] %vm641_vm1, %v3996_v42  ;;  %4013 = vst.msk [vmem:[#allocation5 + $0x20] sm:$0xff] %vm641_vm1, %v3995_v31  ;;  %v3931_v63 = vadd.f32 %v10372_v20, %v3888_v15  ;;  %v3889_v58 = vmul.f32 %v10367_v43, %v3741_v11  ;;  %8383 = vmatprep.mubr.msk.bf16.mxu1 %vm641_vm1, %v4035_v5 }
 0x324   : > { %v4075_v44 = vrot.slane %v4073_v46, 7  ;;  %v4347_v49 = vrot.slane %v4076_v60, 1  ;;  %v3934_v52 = vadd.f32 %v10372_v20, %v3891_v57  ;;  %v3969_v29 = vmax.f32 %v3933_v21, 0.0 }
 0x325   : > { %v4068_v28 = vrot.slane %v4066_v40, 7  ;;  %v4340_v22 = vrot.slane %v4069_v12, 1  ;;  %v3932_v33 = vadd.f32 %v10372_v20, %v3889_v58  ;;  %8384 = vmatmul.mubr.msk.bf16.gmra.mrb[20].mxu1 %vm641_vm1, %v4036_v36  ;;  %v4196_v53 = vsel %vm9411_vm3, %v4057_v19, %v4195_v18 }
 0x326   : > { %v3970_v37 = vmax.f32 %v3934_v52, 0.0  ;;  %v4078_v56 = vor.u32 %v4076_v60, %v4075_v44  ;;  %v4466_v25 = vsel %vm9615_vm8, %v4327_v8, %v4465_v13  ;;  %v3967_v61 = vmax.f32 %v3931_v63, 0.0  ;;  %4197 = vst [vmem:[#allocation6] sm:$0xff] %v4196_v53  ;;  %v4474_v52 = vld [vmem:[#allocation7 + $0x18] sm:$0xff] }
 0x327   : > { %v3968_v50 = vmax.f32 %v3932_v33, 0.0  ;;  %v8359_v9 = vpop.f32.mrb[16].mxu0  ;;  %v4071_v34 = vor.u32 %v4069_v12, %v4068_v28  ;;  %4467 = vst [vmem:[#allocation7] sm:$0xff] %v4466_v25  ;;  %v4341_v38 = vor.u32 %v4340_v22, %v4066_v40  ;;  %v4348_v15 = vor.u32 %v4347_v49, %v4073_v46  ;;  %v4210_v25 = vld [vmem:[#allocation6 + $0x28] sm:$0xff] }
 0x328   : > { %v3998_v7 = vpack.c.bf16 %v3970_v37, %v3969_v29  ;;  %v3894_v36 = vmul.f32 %v8359_v9, %v10367_v43  ;;  %v3754_v42 = vpop.f32.mrb[17].mxu0  ;;  %v4252_v31 = vld [vmem:[#allocation6 + $0x8] sm:$0x1]  ;;  %v4205_v19 = vsel %vm9411_vm3, %v4078_v56, %v4204_v55  ;;  %v4207_v56 = vld [vmem:[#allocation6 + $0x20] sm:$0xff] }
 0x329   : > { %v3997_v23 = vpack.c.bf16 %v3968_v50, %v3967_v61  ;;  %v3892_v8 = vmul.f32 %v10367_v43, %v3754_v42  ;;  %v8360_v26 = vpop.f32.mrb[18].mxu0  ;;  %v4253_v60 = vsel %vm9490_vm6, 0, %v4252_v31  ;;  %v4202_v5 = vsel %vm9411_vm3, %v4071_v34, %v4201_v35  ;;  %4206 = vst [vmem:[#allocation6 + $0x18] sm:$0xff] %v4205_v19  ;;  %v4522_v21 = vld [vmem:[#allocation7 + $0x8] sm:$0x80] }
 0x32a   : > { %v10443_v57 = vld [vmem:[#allocation5 + $0x28] sm:$0xff]  ;;  %v4037_v11 = vld [vmem:[#allocation5 + $0x20] sm:$0xff]  ;;  %4016 = vst.msk [vmem:[#allocation5 + $0x38] sm:$0xff] %vm641_vm1, %v3998_v7  ;;  %v3937_v40 = vadd.f32 %v10372_v20, %v3894_v36  ;;  %v3895_v46 = vmul.f32 %v8360_v26, %v10367_v43  ;;  %v3757_v12 = vpop.f32.mrb[19].mxu0  ;;  %4254 = vst [vmem:[#allocation6 + $0x8] sm:$0x1] %v4253_v60  ;;  %v4472_v58 = vsel %vm9615_vm8, %v4341_v38, %v4471_v0 }
 0x32b   : > { %4203 = vst [vmem:[#allocation6 + $0x10] sm:$0xff] %v4202_v5  ;;  %v4523_v63 = vsel %vm9716_vm11, 0, %v4522_v21  ;;  %v4087_v18 = vshrl.u32 %v10443_v57, 16  ;;  %v4090_v13 = vshll.u32 %v10443_v57, 16  ;;  %v4080_v44 = vshrl.u32 %v4037_v11, 16  ;;  %4015 = vst.msk [vmem:[#allocation5 + $0x30] sm:$0xff] %vm641_vm1, %v3997_v23  ;;  %8387 = vmatprep.mubr.msk.bf16.mxu1 %vm641_vm1, %v4037_v11 }
 0x32c   : > { %v4083_v49 = vshll.u32 %v4037_v11, 16  ;;  %4524 = vst [vmem:[#allocation7 + $0x8] sm:$0x80] %v4523_v63  ;;  %4473 = vst [vmem:[#allocation7 + $0x10] sm:$0xff] %v4472_v58  ;;  %v3973_v28 = vmax.f32 %v3937_v40, 0.0  ;;  %v3935_v22 = vadd.f32 %v10372_v20, %v3892_v8  ;;  %v3938_v29 = vadd.f32 %v10372_v20, %v3895_v46 }
 0x32d   : > { %v3893_v33 = vmul.f32 %v10367_v43, %v3757_v12  ;;  %v4089_v55 = vrot.slane %v4087_v18, 7  ;;  %v10461_v37 = vrot.slane %v4090_v13, 1  ;;  %v4082_v53 = vrot.slane %v4080_v44, 7  ;;  %8388 = vmatmul.mubr.msk.bf16.gmra.mrb[24].mxu1 %vm641_vm1, %v10443_v57  ;;  %v4249_v34 = vld [vmem:[#allocation6] sm:$0x1] }
 0x32e   : > { %v4354_v35 = vrot.slane %v4083_v49, 1  ;;  %v3971_v61 = vmax.f32 %v3935_v22, 0.0  ;;  %v3974_v50 = vmax.f32 %v3938_v29, 0.0  ;;  %v4519_v38 = vld [vmem:[#allocation7] sm:$0x80]  ;;  %v4475_v0 = vsel %vm9615_vm8, %v4348_v15, %v4474_v52 }
 0x32f   : > { %v3936_v9 = vadd.f32 %v10372_v20, %v3893_v33  ;;  %v8363_v7 = vpop.f32.mrb[20].mxu0  ;;  %v4250_v36 = vsel %vm9490_vm6, 0, %v4249_v34  ;;  %v4085_v42 = vor.u32 %v4083_v49, %v4082_v53  ;;  %v4092_v31 = vor.u32 %v4090_v13, %v4089_v55  ;;  %4476 = vst [vmem:[#allocation7 + $0x18] sm:$0xff] %v4475_v0  ;;  %v4216_v34 = vld [vmem:[#allocation6 + $0x38] sm:$0xff] }
 0x330   : > { %v4520_v19 = vsel %vm9716_vm11, 0, %v4519_v38  ;;  %v4000_v23 = vpack.c.bf16 %v3974_v50, %v3973_v28  ;;  %v8685_v26 = vadd.f32 %v8363_v7, %v10330_v51  ;;  %v3770_v60 = vpop.f32.mrb[21].mxu0  ;;  %4251 = vst [vmem:[#allocation6] sm:$0x1] %v4250_v36  ;;  %v4258_v5 = vld [vmem:[#allocation6 + $0x18] sm:$0x1]  ;;  %v10473_v21 = vor.u32 %v4354_v35, %v4080_v44 }
 0x331   : > { %v3972_v8 = vmax.f32 %v3936_v9, 0.0  ;;  %4521 = vst [vmem:[#allocation7] sm:$0x80] %v4520_v19  ;;  %v10475_v15 = vld [vmem:[#allocation5 + $0x38] sm:$0xff]  ;;  %v8686_v11 = vadd.f32 %v3770_v60, %v10334_v39  ;;  %v8364_v40 = vpop.f32.mrb[22].mxu0  ;;  %v4259_v46 = vsel %vm9490_vm6, 0, %v4258_v5  ;;  %v4208_v12 = vsel %vm9411_vm3, %v4085_v42, %v4207_v56 }
 0x332   : > { %v4211_v51 = vsel %vm9411_vm3, %v4092_v31, %v4210_v25  ;;  %v4101_v63 = vshrl.u32 %v10475_v15, 16  ;;  %v4104_v58 = vshll.u32 %v10475_v15, 16  ;;  %v10486_v13 = vld [vmem:[#allocation5 + $0x30] sm:$0xff]  ;;  %4018 = vst.msk [vmem:[#allocation5 + $0x48] sm:$0xff] %vm641_vm1, %v4000_v23  ;;  %v3898_v39 = vmul.f32 %v8685_v26, %v10367_v43  ;;  %v3773_v49 = vpop.f32.mrb[23].mxu0  ;;  %4209 = vst [vmem:[#allocation6 + $0x20] sm:$0xff] %v4208_v12 }
 0x333   : > { %v3999_v44 = vpack.c.bf16 %v3972_v8, %v3971_v61  ;;  %4260 = vst [vmem:[#allocation6 + $0x18] sm:$0x1] %v4259_v46  ;;  %4212 = vst [vmem:[#allocation6 + $0x28] sm:$0xff] %v4211_v51  ;;  %v4094_v52 = vshrl.u32 %v10486_v13, 16  ;;  %v4097_v28 = vshll.u32 %v10486_v13, 16  ;;  %v3896_v22 = vmul.f32 %v8686_v11, %v10367_v43  ;;  %8391 = vmatprep.mubr.msk.bf16.mxu1 %vm641_vm1, %v10486_v13  ;;  %v4213_v7 = vld [vmem:[#allocation6 + $0x30] sm:$0xff] }
 0x334   : > { %v8687_v29 = vadd.f32 %v8364_v40, %v10336_v59  ;;  %v4255_v33 = vld [vmem:[#allocation6 + $0x10] sm:$0x1]  ;;  %v4103_v55 = vrot.slane %v4101_v63, 7  ;;  %v10498_v53 = vrot.slane %v4104_v58, 1  ;;  %v3941_v35 = vadd.f32 %v10372_v20, %v3898_v39  ;;  %v4525_v25 = vld [vmem:[#allocation7 + $0x10] sm:$0x80] }
 0x335   : > { %4017 = vst.msk [vmem:[#allocation5 + $0x40] sm:$0xff] %vm641_vm1, %v3999_v44  ;;  %v8688_v56 = vadd.f32 %v3773_v49, %v10338_v62  ;;  %v4096_v61 = vrot.slane %v4094_v52, 7  ;;  %v10505_v59 = vrot.slane %v4097_v28, 1  ;;  %v3939_v50 = vadd.f32 %v10372_v20, %v3896_v22  ;;  %8392 = vmatmul.mubr.msk.bf16.gmra.mrb[28].mxu1 %vm641_vm1, %v10475_v15  ;;  %v4477_v31 = vld [vmem:[#allocation7 + $0x20] sm:$0xff] }
 0x336   : > { %v3899_v9 = vmul.f32 %v8687_v29, %v10367_v43  ;;  %v3977_v38 = vmax.f32 %v3941_v35, 0.0  ;;  %v4256_v62 = vsel %vm9490_vm6, 0, %v4255_v33  ;;  %v4106_v36 = vor.u32 %v4104_v58, %v4103_v55  ;;  %v4528_v42 = vld [vmem:[#allocation7 + $0x18] sm:$0x80] }
 0x337   : > { %v3897_v0 = vmul.f32 %v8688_v56, %v10367_v43  ;;  %v3975_v19 = vmax.f32 %v3939_v50, 0.0  ;;  %v8367_v8 = vpop.f32.mrb[24].mxu0  ;;  %4257 = vst [vmem:[#allocation6 + $0x10] sm:$0x1] %v4256_v62  ;;  %v4099_v26 = vor.u32 %v4097_v28, %v4096_v61  ;;  %v4526_v60 = vsel %vm9716_vm11, 0, %v4525_v25 }
 0x338   : > { %v3942_v23 = vadd.f32 %v10372_v20, %v3899_v9  ;;  %v8689_v11 = vadd.f32 %v8367_v8, %v10340_v16  ;;  %v3786_v40 = vpop.f32.mrb[25].mxu0  ;;  %v4217_v46 = vsel %vm9411_vm3, %v4106_v36, %v4216_v34  ;;  %4527 = vst [vmem:[#allocation7 + $0x10] sm:$0x80] %v4526_v60  ;;  %v4529_v12 = vsel %vm9716_vm11, 0, %v4528_v42 }
 0x339   : > { %v3940_v5 = vadd.f32 %v10372_v20, %v3897_v0  ;;  %v10523_v51 = vld [vmem:[#allocation5 + $0x48] sm:$0xff]  ;;  %v8690_v44 = vadd.f32 %v3786_v40, %v10342_v27  ;;  %v8368_v39 = vpop.f32.mrb[26].mxu0  ;;  %v4214_v49 = vsel %vm9411_vm3, %v4099_v26, %v4213_v7  ;;  %4218 = vst [vmem:[#allocation6 + $0x38] sm:$0xff] %v4217_v46  ;;  %4530 = vst [vmem:[#allocation7 + $0x18] sm:$0x80] %v4529_v12 }
 0x33a   : > { %v3978_v58 = vmax.f32 %v3942_v23, 0.0  ;;  %v4478_v16 = vsel %vm9615_vm8, %v10473_v21, %v4477_v31  ;;  %v4115_v28 = vshrl.u32 %v10523_v51, 16  ;;  %v4118_v22 = vshll.u32 %v10523_v51, 16  ;;  %v3789_v55 = vpop.f32.mrb[27].mxu0  ;;  %4215 = vst [vmem:[#allocation6 + $0x30] sm:$0xff] %v4214_v49 }
 0x33b   : > { %v3976_v29 = vmax.f32 %v3940_v5, 0.0  ;;  %v3902_v33 = vmul.f32 %v8689_v11, %v10367_v43  ;;  %4479 = vst [vmem:[#allocation7 + $0x20] sm:$0xff] %v4478_v16  ;;  %v3900_v56 = vmul.f32 %v8690_v44, %v10367_v43  ;;  %v8691_v25 = vadd.f32 %v8368_v39, %v10344_v24  ;;  %v4261_v21 = vld [vmem:[#allocation6 + $0x20] sm:$0x1] }
 0x33c   : > { %v10534_v27 = vld [vmem:[#allocation5 + $0x40] sm:$0xff]  ;;  %v4002_v35 = vpack.c.bf16 %v3978_v58, %v3977_v38  ;;  %v8692_v61 = vadd.f32 %v3789_v55, %v10346_v48  ;;  %v4117_v50 = vrot.slane %v4115_v28, 7  ;;  %v10541_v9 = vrot.slane %v4118_v22, 1  ;;  %v4264_v38 = vld [vmem:[#allocation6 + $0x28] sm:$0x1]  ;;  %v4219_v44 = vld [vmem:[#allocation6 + $0x40] sm:$0xff] }
 0x33d   : > { %v4108_v34 = vshrl.u32 %v10534_v27, 16  ;;  %v4111_v0 = vshll.u32 %v10534_v27, 16  ;;  %8395 = vmatprep.mubr.msk.bf16.mxu1 %vm641_vm1, %v10534_v27  ;;  %v4001_v62 = vpack.c.bf16 %v3976_v29, %v3975_v19  ;;  %v3945_v24 = vadd.f32 %v10372_v20, %v3902_v33  ;;  %v4498_v27 = vld [vmem:[#allocation7 + $0x58] sm:$0xff] }
 0x33e   : > { %4020 = vst.msk [vmem:[#allocation5 + $0x58] sm:$0xff] %vm641_vm1, %v4002_v35  ;;  %v3943_v48 = vadd.f32 %v10372_v20, %v3900_v56  ;;  %v3903_v7 = vmul.f32 %v8691_v25, %v10367_v43  ;;  %8396 = vmatmul.mubr.msk.bf16.gmra.mrb[32].mxu1 %vm641_vm1, %v10523_v51  ;;  %v3901_v31 = vmul.f32 %v8692_v61, %v10367_v43  ;;  %v4262_v23 = vsel %vm9490_vm6, 0, %v4261_v21  ;;  %v4222_v35 = vld [vmem:[#allocation6 + $0x48] sm:$0xff] }
 0x33f   : > { %v4110_v36 = vrot.slane %v4108_v34, 7  ;;  %v10555_v42 = vrot.slane %v4111_v0, 1  ;;  %4019 = vst.msk [vmem:[#allocation5 + $0x50] sm:$0xff] %vm641_vm1, %v4001_v62  ;;  %v3981_v19 = vmax.f32 %v3945_v24, 0.0  ;;  %v8371_v60 = vpop.f32.mrb[28].mxu0  ;;  %v4265_v5 = vsel %vm9490_vm6, 0, %v4264_v38 }
 0x340   : > { %v3979_v8 = vmax.f32 %v3943_v48, 0.0  ;;  %v3946_v26 = vadd.f32 %v10372_v20, %v3903_v7  ;;  %4263 = vst [vmem:[#allocation6 + $0x20] sm:$0x1] %v4262_v23  ;;  %v3944_v11 = vadd.f32 %v10372_v20, %v3901_v31  ;;  %v8693_v40 = vadd.f32 %v8371_v60, %v10348_v32  ;;  %v3802_v46 = vpop.f32.mrb[29].mxu0  ;;  %4266 = vst [vmem:[#allocation6 + $0x28] sm:$0x1] %v4265_v5 }
 0x341   : > { %v4270_v12 = vld [vmem:[#allocation6 + $0x38] sm:$0x1]  ;;  %v4113_v58 = vor.u32 %v4111_v0, %v4110_v36  ;;  %v4120_v39 = vor.u32 %v4118_v22, %v4117_v50  ;;  %v8694_v16 = vadd.f32 %v3802_v46, %v10350_v30  ;;  %v8372_v29 = vpop.f32.mrb[30].mxu0  ;;  %v4267_v33 = vld [vmem:[#allocation6 + $0x30] sm:$0x1]  ;;  %v4362_v56 = vor.u32 %v10461_v37, %v4087_v18 }
 0x342   : > { %v3982_v49 = vmax.f32 %v3946_v26, 0.0  ;;  %v4271_v55 = vsel %vm9490_vm6, 0, %v4270_v12  ;;  %v3980_v32 = vmax.f32 %v3944_v11, 0.0  ;;  %v3906_v25 = vmul.f32 %v8693_v40, %v10367_v43  ;;  %v3805_v21 = vpop.f32.mrb[31].mxu0  ;;  %v4531_v18 = vld [vmem:[#allocation7 + $0x20] sm:$0x80] }
 0x343   : > { %v8695_v61 = vadd.f32 %v8372_v29, %v10352_v17  ;;  %v4268_v22 = vsel %vm9490_vm6, 0, %v4267_v33  ;;  %4272 = vst [vmem:[#allocation6 + $0x38] sm:$0x1] %v4271_v55  ;;  %v3904_v50 = vmul.f32 %v8694_v16, %v10367_v43  ;;  %v8696_v0 = vadd.f32 %v3805_v21, %v10354_v6  ;;  %v4480_v37 = vld [vmem:[#allocation7 + $0x28] sm:$0xff] }
 0x344   : > { %v4004_v30 = vpack.c.bf16 %v3982_v49, %v3981_v19  ;;  %4269 = vst [vmem:[#allocation6 + $0x30] sm:$0x1] %v4268_v22  ;;  %v4220_v57 = vsel %vm9411_vm3, %v4113_v58, %v4219_v44  ;;  %v4003_v62 = vpack.c.bf16 %v3980_v32, %v3979_v8  ;;  %v3949_v17 = vadd.f32 %v10372_v20, %v3906_v25  ;;  %v4228_v29 = vld [vmem:[#allocation6 + $0x58] sm:$0xff] }
 0x345   : > { %v10580_v38 = vld [vmem:[#allocation5 + $0x58] sm:$0xff]  ;;  %v3907_v24 = vmul.f32 %v8695_v61, %v10367_v43  ;;  %4221 = vst [vmem:[#allocation6 + $0x40] sm:$0xff] %v4220_v57  ;;  %v4223_v48 = vsel %vm9411_vm3, %v4120_v39, %v4222_v35  ;;  %v3947_v36 = vadd.f32 %v10372_v20, %v3904_v50  ;;  %v3905_v31 = vmul.f32 %v8696_v0, %v10367_v43 }
 0x346   : > { %v4129_v7 = vshrl.u32 %v10580_v38, 16  ;;  %v4132_v6 = vshll.u32 %v10580_v38, 16  ;;  %4022 = vst.msk [vmem:[#allocation5 + $0x68] sm:$0xff] %vm641_vm1, %v4004_v30  ;;  %4224 = vst [vmem:[#allocation6 + $0x48] sm:$0xff] %v4223_v48  ;;  %v10591_v23 = vld [vmem:[#allocation5 + $0x50] sm:$0xff]  ;;  %v3985_v19 = vmax.f32 %v3949_v17, 0.0  ;;  %v4481_v60 = vsel %vm9615_vm8, %v4362_v56, %v4480_v37 }
 0x347   : > { %4021 = vst.msk [vmem:[#allocation5 + $0x60] sm:$0xff] %vm641_vm1, %v4003_v62  ;;  %v3950_v8 = vadd.f32 %v10372_v20, %v3907_v24  ;;  %v4532_v26 = vsel %vm9716_vm11, 0, %v4531_v18  ;;  %v4122_v40 = vshrl.u32 %v10591_v23, 16  ;;  %v4125_v46 = vshll.u32 %v10591_v23, 16  ;;  %8399 = vmatprep.mubr.msk.bf16.mxu1 %vm641_vm1, %v10591_v23  ;;  %v8375_v12 = vpop.f32.mrb[32].mxu0  ;;  %4482 = vst [vmem:[#allocation7 + $0x28] sm:$0xff] %v4481_v60 }
 0x348   : > { %v4131_v5 = vrot.slane %v4129_v7, 7  ;;  %v10601_v11 = vrot.slane %v4132_v6, 1  ;;  %4533 = vst [vmem:[#allocation7 + $0x20] sm:$0x80] %v4532_v26  ;;  %v3983_v58 = vmax.f32 %v3947_v36, 0.0  ;;  %v3948_v39 = vadd.f32 %v10372_v20, %v3905_v31  ;;  %8400 = vmatmul.mubr.msk.bf16.gmra.mrb[36].mxu1 %vm641_vm1, %v10580_v38  ;;  %v3818_v16 = vpop.f32.mrb[33].mxu0 }
 0x349   : > { %v3986_v44 = vmax.f32 %v3950_v8, 0.0  ;;  %v8697_v49 = vadd.f32 %v8375_v12, %v10356_v41  ;;  %v4124_v33 = vrot.slane %v4122_v40, 7  ;;  %v10613_v55 = vrot.slane %v4125_v46, 1  ;;  %v8376_v56 = vpop.f32.mrb[34].mxu0 }
 0x34a   : > { %v8698_v35 = vadd.f32 %v3818_v16, %v10358_v1  ;;  %v4134_v32 = vor.u32 %v4132_v6, %v4131_v5  ;;  %v3984_v61 = vmax.f32 %v3948_v39, 0.0  ;;  %v8699_v22 = vadd.f32 %v8376_v56, %v10360_v14  ;;  %v3821_v30 = vpop.f32.mrb[35].mxu0  ;;  %v4225_v5 = vld [vmem:[#allocation6 + $0x50] sm:$0xff] }
 0x34b   : > { %v4006_v25 = vpack.c.bf16 %v3986_v44, %v3985_v19  ;;  %v3910_v21 = vmul.f32 %v8697_v49, %v10367_v43  ;;  %v8700_v50 = vadd.f32 %v3821_v30, %v10362_v10  ;;  %v4127_v57 = vor.u32 %v4125_v46, %v4124_v33  ;;  %v4234_v33 = vld [vmem:[#allocation6 + $0x68] sm:$0xff] }
 0x34c   : > { %v3908_v41 = vmul.f32 %v8698_v35, %v10367_v43  ;;  %v4273_v0 = vld [vmem:[#allocation6 + $0x40] sm:$0x1]  ;;  %v4229_v18 = vsel %vm9411_vm3, %v4134_v32, %v4228_v29  ;;  %v4005_v1 = vpack.c.bf16 %v3984_v61, %v3983_v58  ;;  %v3911_v17 = vmul.f32 %v8699_v22, %v10367_v43 }
 0x34d   : > { %v10622_v37 = vld [vmem:[#allocation5 + $0x68] sm:$0xff]  ;;  %4024 = vst.msk [vmem:[#allocation5 + $0x78] sm:$0xff] %vm641_vm1, %v4006_v25  ;;  %v3953_v62 = vadd.f32 %v10372_v20, %v3910_v21  ;;  %v4274_v14 = vsel %vm9490_vm6, 0, %v4273_v0  ;;  %4230 = vst [vmem:[#allocation6 + $0x58] sm:$0xff] %v4229_v18  ;;  %v3909_v36 = vmul.f32 %v8700_v50, %v10367_v43  ;;  %v4276_v31 = vld [vmem:[#allocation6 + $0x48] sm:$0x1]  ;;  %v4226_v56 = vsel %vm9411_vm3, %v4127_v57, %v4225_v5 }
 0x34e   : > { %v4143_v10 = vshrl.u32 %v10622_v37, 16  ;;  %v4146_v24 = vshll.u32 %v10622_v37, 16  ;;  %v10631_v48 = vld [vmem:[#allocation5 + $0x60] sm:$0xff]  ;;  %v3951_v6 = vadd.f32 %v10372_v20, %v3908_v41  ;;  %4275 = vst [vmem:[#allocation6 + $0x40] sm:$0x1] %v4274_v14  ;;  %4023 = vst.msk [vmem:[#allocation5 + $0x70] sm:$0xff] %vm641_vm1, %v4005_v1  ;;  %v3954_v60 = vadd.f32 %v10372_v20, %v3911_v17 }
 0x34f   : > { %v4136_v19 = vshrl.u32 %v10631_v48, 16  ;;  %v4139_v8 = vshll.u32 %v10631_v48, 16  ;;  %v3989_v26 = vmax.f32 %v3953_v62, 0.0  ;;  %8403 = vmatprep.mubr.msk.bf16.mxu1 %vm641_vm1, %v10631_v48  ;;  %v4534_v46 = vld [vmem:[#allocation7 + $0x28] sm:$0x80]  ;;  %v3952_v44 = vadd.f32 %v10372_v20, %v3909_v36  ;;  %v4231_v32 = vld [vmem:[#allocation6 + $0x60] sm:$0xff] }
 0x350   : > { %v4145_v12 = vrot.slane %v4143_v10, 7  ;;  %v10643_v43 = vrot.slane %v4146_v24, 1  ;;  %v3987_v58 = vmax.f32 %v3951_v6, 0.0  ;;  %v3990_v16 = vmax.f32 %v3954_v60, 0.0  ;;  %8404 = vmatmul.mubr.msk.bf16.gmra.mrb[40].mxu1 %vm641_vm1, %v10622_v37  ;;  %v4483_v61 = vld [vmem:[#allocation7 + $0x30] sm:$0xff]  ;;  %4227 = vst [vmem:[#allocation6 + $0x50] sm:$0xff] %v4226_v56 }
 0x351   : > { %v4138_v39 = vrot.slane %v4136_v19, 7  ;;  %v4410_v49 = vrot.slane %v4139_v8, 1  ;;  %v4277_v29 = vsel %vm9490_vm6, 0, %v4276_v31  ;;  %v3988_v35 = vmax.f32 %v3952_v44, 0.0  ;;  %v4486_v50 = vld [vmem:[#allocation7 + $0x38] sm:$0xff]  ;;  %v4489_v0 = vld [vmem:[#allocation7 + $0x40] sm:$0xff] }
 0x352   : > { %4278 = vst [vmem:[#allocation6 + $0x48] sm:$0x1] %v4277_v29  ;;  %v4148_v25 = vor.u32 %v4146_v24, %v4145_v12  ;;  %v4535_v20 = vsel %vm9716_vm11, 0, %v4534_v46  ;;  %v4008_v21 = vpack.c.bf16 %v3990_v16, %v3989_v26  ;;  %v4369_v30 = vor.u32 %v10505_v59, %v4094_v52  ;;  %v4492_v57 = vld [vmem:[#allocation7 + $0x48] sm:$0xff]  ;;  %v4501_v26 = vld [vmem:[#allocation7 + $0x60] sm:$0xff]  ;;  %v4510_v29 = vld [vmem:[#allocation7 + $0x78] sm:$0xff] }
 0x353   : > { %v4141_v22 = vor.u32 %v4139_v8, %v4138_v39  ;;  %4536 = vst [vmem:[#allocation7 + $0x28] sm:$0x80] %v4535_v20  ;;  %v4376_v41 = vor.u32 %v10498_v53, %v4101_v63  ;;  %v4007_v1 = vpack.c.bf16 %v3988_v35, %v3987_v58  ;;  %v4383_v13 = vor.u32 %v10555_v42, %v4108_v34  ;;  %v4495_v42 = vld [vmem:[#allocation7 + $0x50] sm:$0xff]  ;;  %v4504_v24 = vld [vmem:[#allocation7 + $0x68] sm:$0xff]  ;;  %v6357_v54 = vld [vmem:[#allocation5 + $0x60] sm:$0xff] }
 0x354   : > { %v10662_v18 = vld [vmem:[#allocation5 + $0x78] sm:$0xff]  ;;  %v4282_v62 = vld [vmem:[#allocation6 + $0x58] sm:$0x1]  ;;  %v4235_v17 = vsel %vm9411_vm3, %v4148_v25, %v4234_v33  ;;  %v4390_v15 = vor.u32 %v10541_v9, %v4115_v28  ;;  %4026 = vst.msk [vmem:[#allocation5 + $0x88] sm:$0xff] %vm641_vm1, %v4008_v21  ;;  %v4484_v51 = vsel %vm9615_vm8, %v4369_v30, %v4483_v61  ;;  %v4573_v8 = vld [vmem:[#allocation6] sm:$0xff]  ;;  %v4397_v5 = vor.u32 %v10613_v55, %v4122_v40 }
 0x355   : > { %v4157_v63 = vshrl.u32 %v10662_v18, 16  ;;  %v4160_v52 = vshll.u32 %v10662_v18, 16  ;;  %v4283_v53 = vsel %vm9490_vm6, 0, %v4282_v62  ;;  %v4232_v59 = vsel %vm9411_vm3, %v4141_v22, %v4231_v32  ;;  %4236 = vst [vmem:[#allocation6 + $0x68] sm:$0xff] %v4235_v17  ;;  %v10679_v14 = vld [vmem:[#allocation5 + $0x70] sm:$0xff]  ;;  %4032 = vst.msk [vmem:[#allocation5 + $0x88] sm:$0xff] %vm641_vm1, %v9313_v2 }
 0x356   : > { %4025 = vst.msk [vmem:[#allocation5 + $0x80] sm:$0xff] %vm641_vm1, %v4007_v1  ;;  %4284 = vst [vmem:[#allocation6 + $0x58] sm:$0x1] %v4283_v53  ;;  %v4487_v28 = vsel %vm9615_vm8, %v4376_v41, %v4486_v50  ;;  %v4490_v9 = vsel %vm9615_vm8, %v4383_v13, %v4489_v0  ;;  %v4493_v34 = vsel %vm9615_vm8, %v4390_v15, %v4492_v57  ;;  %v4150_v36 = vshrl.u32 %v10679_v14, 16  ;;  %v4240_v60 = vld [vmem:[#allocation6 + $0x78] sm:$0xff]  ;;  %v4237_v40 = vld [vmem:[#allocation6 + $0x70] sm:$0xff] }
 0x357   : > { %4233 = vst [vmem:[#allocation6 + $0x60] sm:$0xff] %v4232_v59  ;;  %v4159_v6 = vrot.slane %v4157_v63, 7  ;;  %v4431_v2 = vrot.slane %v4160_v52, 1  ;;  %v4153_v31 = vshll.u32 %v10679_v14, 16  ;;  %8407 = vmatprep.mubr.msk.bf16.mxu1 %vm641_vm1, %v10679_v14  ;;  %4485 = vst [vmem:[#allocation7 + $0x30] sm:$0xff] %v4484_v51  ;;  %v4404_v46 = vor.u32 %v10601_v11, %v4129_v7  ;;  %v10736_v50 = vld [vmem:[#allocation6 + $0x8] sm:$0xff] }
 0x358   : > { %4488 = vst [vmem:[#allocation7 + $0x38] sm:$0xff] %v4487_v28  ;;  %4491 = vst [vmem:[#allocation7 + $0x40] sm:$0xff] %v4490_v9  ;;  %v4411_v12 = vor.u32 %v4410_v49, %v4136_v19  ;;  %v4418_v58 = vor.u32 %v10643_v43, %v4143_v10  ;;  %v4152_v44 = vrot.slane %v4150_v36, 7  ;;  %8408 = vmatmul.mubr.msk.bf16.gmra.mrb[44].mxu1 %vm641_vm1, %v10662_v18  ;;  %v4279_v38 = vld [vmem:[#allocation6 + $0x50] sm:$0x1]  ;;  %v4507_v19 = vld [vmem:[#allocation7 + $0x70] sm:$0xff] }
 0x359   : > { %4494 = vst [vmem:[#allocation7 + $0x48] sm:$0xff] %v4493_v34  ;;  %v4424_v39 = vrot.slane %v4153_v31, 1  ;;  %v4162_v16 = vor.u32 %v4160_v52, %v4159_v6  ;;  %v4432_v23 = vor.u32 %v4431_v2, %v4157_v63  ;;  %8413 = vmatprep.mubr.msk.bf16.mxu1 %vm641_vm1, %v4573_v8  ;;  %v4496_v7 = vsel %vm9615_vm8, %v4397_v5, %v4495_v42  ;;  %v4243_v28 = vld [vmem:[#allocation6 + $0x80] sm:$0xff]  ;;  %v4513_v9 = vld [vmem:[#allocation7 + $0x80] sm:$0xff]  ;;  %v6358_v47 = vld [vmem:[#allocation5 + $0x68] sm:$0xff] }
 0x35a   : > { %v4499_v11 = vsel %vm9615_vm8, %v4404_v46, %v4498_v27  ;;  %v4502_v55 = vsel %vm9615_vm8, %v4411_v12, %v4501_v26  ;;  %v4505_v10 = vsel %vm9615_vm8, %v4418_v58, %v4504_v24  ;;  %v4280_v43 = vsel %vm9490_vm6, 0, %v4279_v38  ;;  %4497 = vst [vmem:[#allocation7 + $0x50] sm:$0xff] %v4496_v7  ;;  %v10753_v27 = vld [vmem:[#allocation6 + $0x10] sm:$0xff]  ;;  %v10785_v7 = vld [vmem:[#allocation6 + $0x20] sm:$0xff] }
 0x35b   : > { %v4155_v49 = vor.u32 %v4153_v31, %v4152_v44  ;;  %v4241_v33 = vsel %vm9411_vm3, %v4162_v16, %v4240_v60  ;;  %4500 = vst [vmem:[#allocation7 + $0x58] sm:$0xff] %v4499_v11  ;;  %4503 = vst [vmem:[#allocation7 + $0x60] sm:$0xff] %v4502_v55  ;;  %v4425_v35 = vor.u32 %v4424_v39, %v4150_v36  ;;  %v5099_v20 = vsel %vm1419_vm0, %v10408_v3, 0  ;;  %v10741_v3 = vld [vmem:[%s11301_s6 + $0xc] sm:$0xf] }
 0x35c   : > { %4506 = vst [vmem:[#allocation7 + $0x68] sm:$0xff] %v4505_v10  ;;  %4281 = vst [vmem:[#allocation6 + $0x50] sm:$0x1] %v4280_v43  ;;  %v4288_v56 = vld [vmem:[#allocation6 + $0x68] sm:$0x1]  ;;  %v4511_v32 = vsel %vm9615_vm8, %v4432_v23, %v4510_v29 }
 0x35d   : > { %4242 = vst [vmem:[#allocation6 + $0x78] sm:$0xff] %v4241_v33  ;;  %v10724_v25 = vld [vmem:[#allocation5 + $0x80] sm:$0xff]  ;;  %v4289_v61 = vsel %vm9490_vm6, 0, %v4288_v56  ;;  %v4238_v21 = vsel %vm9411_vm3, %v4155_v49, %v4237_v40  ;;  %v4508_v22 = vsel %vm9615_vm8, %v4425_v35, %v4507_v19  ;;  %4512 = vst [vmem:[#allocation7 + $0x78] sm:$0xff] %v4511_v32  ;;  %v10781_v40 = vld [vmem:[#allocation6 + $0x18] sm:$0xff] }
 0x35e   : > { %v4164_v30 = vshrl.u32 %v10724_v25, 16  ;;  %v4167_v41 = vshll.u32 %v10724_v25, 16  ;;  %v4285_v0 = vld [vmem:[#allocation6 + $0x60] sm:$0x1]  ;;  %4290 = vst [vmem:[#allocation6 + $0x68] sm:$0x1] %v4289_v61 }
 0x35f   : > { %4239 = vst [vmem:[#allocation6 + $0x70] sm:$0xff] %v4238_v21  ;;  %v4537_v57 = vld [vmem:[#allocation7 + $0x30] sm:$0x80]  ;;  %4509 = vst [vmem:[#allocation7 + $0x70] sm:$0xff] %v4508_v22  ;;  %v4286_v1 = vsel %vm9490_vm6, 0, %v4285_v0  ;;  %v10793_v43 = vld [vmem:[#allocation6 + $0x28] sm:$0xff] }
 0x360   : > { %v4538_v62 = vsel %vm9716_vm11, 0, %v4537_v57  ;;  %v4540_v17 = vld [vmem:[#allocation7 + $0x38] sm:$0x80]  ;;  %v4543_v13 = vld [vmem:[#allocation7 + $0x40] sm:$0x80]  ;;  %v4166_v15 = vrot.slane %v4164_v30, 7  ;;  %8414 = vmatmul.mubr.msk.bf16.vlgmr.msra.gmra.mrb[16].mxu1 %vm641_vm1, %v10736_v50 }
 0x361   : > { %v4438_v63 = vrot.slane %v4167_v41, 1  ;;  %4287 = vst [vmem:[#allocation6 + $0x60] sm:$0x1] %v4286_v1  ;;  %4539 = vst [vmem:[#allocation7 + $0x30] sm:$0x80] %v4538_v62  ;;  %v4541_v52 = vsel %vm9716_vm11, 0, %v4540_v17  ;;  %8446 = vmatpush3.bf16.msra.mxu1 %v5099_v20  ;;  %8417 = vmatprep.mubr.msk.bf16.mxu1 %vm641_vm1, %v10753_v27 }
 0x362   : > { %v4544_v53 = vsel %vm9716_vm11, 0, %v4543_v13  ;;  %v4546_v59 = vld [vmem:[#allocation7 + $0x48] sm:$0x80]  ;;  %4542 = vst [vmem:[#allocation7 + $0x38] sm:$0x80] %v4541_v52  ;;  %v4169_v6 = vor.u32 %v4167_v41, %v4166_v15  ;;  %9242 = vmatprep.subr.msk.bf16.mxu1 %vm1419_vm0, %v10741_v3  ;;  %v10797_v49 = vld [vmem:[#allocation6 + $0x30] sm:$0xff] }
 0x363   : > { %4545 = vst [vmem:[#allocation7 + $0x40] sm:$0x80] %v4544_v53  ;;  %v4547_v51 = vsel %vm9716_vm11, 0, %v4546_v59  ;;  %v4549_v34 = vld [vmem:[#allocation7 + $0x50] sm:$0x80]  ;;  %v4439_v2 = vor.u32 %v4438_v63, %v4164_v30  ;;  %v10801_v33 = vld [vmem:[#allocation6 + $0x38] sm:$0xff] }
 0x364   : > { %4548 = vst [vmem:[#allocation7 + $0x48] sm:$0x80] %v4547_v51  ;;  %v4552_v42 = vld [vmem:[#allocation7 + $0x58] sm:$0x80]  ;;  %v4555_v24 = vld [vmem:[#allocation7 + $0x60] sm:$0x80]  ;;  %v4244_v12 = vsel %vm9411_vm3, %v4169_v6, %v4243_v28 }
 0x365   : > { %v4294_v36 = vld [vmem:[#allocation6 + $0x78] sm:$0x1]  ;;  %v4550_v31 = vsel %vm9716_vm11, 0, %v4549_v34  ;;  %v4553_v8 = vsel %vm9716_vm11, 0, %v4552_v42  ;;  %v4556_v26 = vsel %vm9716_vm11, 0, %v4555_v24  ;;  %v4514_v58 = vsel %vm9615_vm8, %v4439_v2, %v4513_v9  ;;  %4245 = vst [vmem:[#allocation6 + $0x80] sm:$0xff] %v4244_v12 }
 0x366   : > { %v4295_v60 = vsel %vm9490_vm6, 0, %v4294_v36  ;;  %4551 = vst [vmem:[#allocation7 + $0x50] sm:$0x80] %v4550_v31  ;;  %4554 = vst [vmem:[#allocation7 + $0x58] sm:$0x80] %v4553_v8  ;;  %v10805_v35 = vld [vmem:[#allocation6 + $0x40] sm:$0xff] }
 0x367   : > { %4557 = vst [vmem:[#allocation7 + $0x60] sm:$0x80] %v4556_v26  ;;  %v4558_v5 = vld [vmem:[#allocation7 + $0x68] sm:$0x80]  ;;  %v4564_v46 = vld [vmem:[#allocation7 + $0x78] sm:$0x80] }
 0x368   : > { %v4291_v44 = vld [vmem:[#allocation6 + $0x70] sm:$0x1]  ;;  %4296 = vst [vmem:[#allocation6 + $0x78] sm:$0x1] %v4295_v60  ;;  %v4559_v39 = vsel %vm9716_vm11, 0, %v4558_v5  ;;  %4515 = vst [vmem:[#allocation7 + $0x80] sm:$0xff] %v4514_v58  ;;  %8418 = vmatmul.mubr.msk.bf16.gmra.mrb[20].mxu1 %vm641_vm1, %v10781_v40 }
 0x369   : > { %v4561_v16 = vld [vmem:[#allocation7 + $0x70] sm:$0x80]  ;;  %v4292_v23 = vsel %vm9490_vm6, 0, %v4291_v44  ;;  %4560 = vst [vmem:[#allocation7 + $0x68] sm:$0x80] %v4559_v39  ;;  %v4565_v38 = vsel %vm9716_vm11, 0, %v4564_v46  ;;  %8421 = vmatprep.mubr.msk.bf16.mxu1 %vm641_vm1, %v10785_v7 }
 0x36a   : > { %v4562_v29 = vsel %vm9716_vm11, 0, %v4561_v16  ;;  %4293 = vst [vmem:[#allocation6 + $0x70] sm:$0x1] %v4292_v23  ;;  %4566 = vst [vmem:[#allocation7 + $0x78] sm:$0x80] %v4565_v38  ;;  %v10809_v56 = vld [vmem:[#allocation6 + $0x48] sm:$0xff] }
 0x36b   : > { %4563 = vst [vmem:[#allocation7 + $0x70] sm:$0x80] %v4562_v29  ;;  %v10813_v32 = vld [vmem:[#allocation6 + $0x50] sm:$0xff]  ;;  %v10817_v20 = vld [vmem:[#allocation6 + $0x58] sm:$0xff]  ;;  %v10821_v61 = vld [vmem:[#allocation6 + $0x60] sm:$0xff]  ;;  %v5362_v0 = vsel %vm1419_vm0, %v10741_v3, 0 }
 0x36c   : > { %v4297_v11 = vld [vmem:[#allocation6 + $0x80] sm:$0x1]  ;;  %v10825_v21 = vld [vmem:[#allocation6 + $0x68] sm:$0xff]  ;;  %v5032_v30 = vld [vmem:[#allocation7] sm:$0xff] }
 0x36d   : > { %v4298_v10 = vsel %vm9490_vm6, 0, %v4297_v11  ;;  %v10840_v57 = vld [vmem:[#allocation7 + $0x8] sm:$0xff]  ;;  %v7553_v1 = vld [vmem:[%s11301_s6 + $0x10] sm:$0xf]  ;;  %v10852_v17 = vld [vmem:[#allocation7 + $0x18] sm:$0xff] }
 0x36e   : > { %4299 = vst [vmem:[#allocation6 + $0x80] sm:$0x1] %v4298_v10  ;;  %v10847_v62 = vld [vmem:[#allocation7 + $0x10] sm:$0xff]  ;;  %v10856_v3 = vld [vmem:[#allocation7 + $0x20] sm:$0xff]  ;;  %v10860_v13 = vld [vmem:[#allocation7 + $0x28] sm:$0xff]  ;;  %v5625_v24 = vsel %vm1419_vm0, %v7553_v1, 0 }
 0x36f   : > { %v4567_v55 = vld [vmem:[#allocation7 + $0x80] sm:$0x80]  ;;  %v10833_v41 = vld [vmem:[#allocation6 + $0x78] sm:$0xff]  ;;  %v10864_v15 = vld [vmem:[#allocation7 + $0x30] sm:$0xff] }
 0x370   : > { %v4568_v19 = vsel %vm9716_vm11, 0, %v4567_v55  ;;  %8422 = vmatmul.mubr.msk.bf16.gmra.mrb[24].mxu1 %vm641_vm1, %v10793_v43  ;;  %v10868_v63 = vld [vmem:[#allocation7 + $0x38] sm:$0xff]  ;;  %v10872_v52 = vld [vmem:[#allocation7 + $0x40] sm:$0xff]  ;;  %v10876_v53 = vld [vmem:[#allocation7 + $0x48] sm:$0xff] }
 0x371   : > { %4569 = vst [vmem:[#allocation7 + $0x80] sm:$0x80] %v4568_v19  ;;  %8425 = vmatprep.mubr.msk.bf16.mxu1 %vm641_vm1, %v10797_v49  ;;  %v10829_v22 = vld [vmem:[#allocation6 + $0x70] sm:$0xff]  ;;  %v10880_v59 = vld [vmem:[#allocation7 + $0x50] sm:$0xff]  ;;  %v10884_v51 = vld [vmem:[#allocation7 + $0x58] sm:$0xff] }
 0x372   : > { %v10888_v28 = vld [vmem:[#allocation7 + $0x60] sm:$0xff]  ;;  %v10892_v9 = vld [vmem:[#allocation7 + $0x68] sm:$0xff]  ;;  %v10896_v34 = vld [vmem:[#allocation7 + $0x70] sm:$0xff] }
 0x373   : > { %v10900_v42 = vld [vmem:[#allocation7 + $0x78] sm:$0xff]  ;;  %v7570_v6 = vld [vmem:[%s11301_s6 + $0x14] sm:$0xf]  ;;  %v5558_v2 = vld [vmem:[#allocation5 + $0x8] sm:$0xff] }
 0x374   : > { %v5888_v36 = vsel %vm1419_vm0, %v7570_v6, 0  ;;  %v10945_v31 = vld [vmem:[#allocation5 + $0x10] sm:$0xff]  ;;  %v7587_v8 = vld [vmem:[%s11301_s6 + $0x18] sm:$0xf]  ;;  %v10957_v60 = vld [vmem:[#allocation5 + $0x20] sm:$0xff] }
 0x375   : > { %v10952_v26 = vld [vmem:[#allocation5 + $0x18] sm:$0xff]  ;;  %v10961_v5 = vld [vmem:[#allocation5 + $0x28] sm:$0xff]  ;;  %v10965_v46 = vld [vmem:[#allocation5 + $0x30] sm:$0xff] }
 0x376   : > { %v10969_v12 = vld [vmem:[#allocation5 + $0x38] sm:$0xff]  ;;  %v10973_v58 = vld [vmem:[#allocation5 + $0x40] sm:$0xff]  ;;  %v10977_v44 = vld [vmem:[#allocation5 + $0x48] sm:$0xff] }
 0x377   : > { %v10981_v39 = vld [vmem:[#allocation5 + $0x50] sm:$0xff]  ;;  %v10985_v16 = vld [vmem:[#allocation5 + $0x58] sm:$0xff]  ;;  %v4050_v23 = vld [vmem:[#allocation5 + $0x88] sm:$0xff] }
 0x378   : > { %8426 = vmatmul.mubr.msk.bf16.gmra.mrb[28].mxu1 %vm641_vm1, %v10801_v33  ;;  %v4171_v29 = vshrl.u32 %v4050_v23, 16  ;;  %v4174_v38 = vshll.u32 %v4050_v23, 16  ;;  %v4246_v55 = vld [vmem:[#allocation6 + $0x88] sm:$0xff]  ;;  %v11038_v45 = vld [vmem:[#allocation7 + $0x80] sm:$0xff] }
 0x379   : > { %8429 = vmatprep.mubr.msk.bf16.mxu1 %vm641_vm1, %v10805_v35 }
 0x37a   : > { %v4173_v11 = vrot.slane %v4171_v29, 7 }
 0x37c   : > { %v4176_v10 = vor.u32 %v4174_v38, %v4173_v11 }
 0x37e   : > { %v4247_v19 = vsel %vm9411_vm3, %v4176_v10, %v4246_v55 }
 0x37f   : > { %4248 = vst [vmem:[#allocation6 + $0x88] sm:$0xff] %v4247_v19 }
 0x380   : > { %8430 = vmatmul.mubr.msk.bf16.gmra.mrb[32].mxu1 %vm641_vm1, %v10809_v56 }
 0x381   : > { %8433 = vmatprep.mubr.msk.bf16.mxu1 %vm641_vm1, %v10813_v32 }
 0x388   : > { %8434 = vmatmul.mubr.msk.bf16.gmra.mrb[36].mxu1 %vm641_vm1, %v10817_v20 }
 0x389   : > { %8437 = vmatprep.mubr.msk.bf16.mxu1 %vm641_vm1, %v10821_v61 }
 0x390   : > { %8438 = vmatmul.mubr.msk.bf16.gmra.mrb[40].mxu1 %vm641_vm1, %v10825_v21 }
 0x391   : > { %8441 = vmatprep.mubr.msk.bf16.mxu1 %vm641_vm1, %v10829_v22 }
 0x398   : > { %8442 = vmatmul.mubr.msk.bf16.gmra.mrb[44].mxu1 %vm641_vm1, %v10833_v41 }
 0x399   : > { %8447 = vmatprep.mubr.msk.bf16.mxu1 %vm641_vm1, %v5032_v30  ;;  %v7621_v30 = vld [vmem:[%s11301_s6 + $0x20] sm:$0xf] }
 0x3a0   : > { %8448 = vmatmul.mubr.msk.bf16.vlgmr.msra.gmra.mrb[16].mxu1 %vm641_vm1, %v10840_v57 }
 0x3a1   : > { %8480 = vmatpush3.bf16.msra.mxu1 %v5362_v0  ;;  %8451 = vmatprep.mubr.msk.bf16.mxu1 %vm641_vm1, %v10847_v62 }
 0x3a2   : > { %9243 = vmatprep.subr.msk.bf16.mxu1 %vm1419_vm0, %v7553_v1 }
 0x3a8   : > { %8452 = vmatmul.mubr.msk.bf16.gmra.mrb[20].mxu1 %vm641_vm1, %v10852_v17 }
 0x3a9   : > { %8455 = vmatprep.mubr.msk.bf16.mxu1 %vm641_vm1, %v10856_v3 }
 0x3b0   : > { %8456 = vmatmul.mubr.msk.bf16.gmra.mrb[24].mxu1 %vm641_vm1, %v10860_v13 }
 0x3b1   : > { %8459 = vmatprep.mubr.msk.bf16.mxu1 %vm641_vm1, %v10864_v15 }
 0x3b8   : > { %8460 = vmatmul.mubr.msk.bf16.gmra.mrb[28].mxu1 %vm641_vm1, %v10868_v63 }
 0x3b9   : > { %8463 = vmatprep.mubr.msk.bf16.mxu1 %vm641_vm1, %v10872_v52 }
 0x3c0   : > { %8464 = vmatmul.mubr.msk.bf16.gmra.mrb[32].mxu1 %vm641_vm1, %v10876_v53 }
 0x3c1   : > { %8467 = vmatprep.mubr.msk.bf16.mxu1 %vm641_vm1, %v10880_v59 }
 0x3c8   : > { %8468 = vmatmul.mubr.msk.bf16.gmra.mrb[36].mxu1 %vm641_vm1, %v10884_v51 }
 0x3c9   : > { %8471 = vmatprep.mubr.msk.bf16.mxu1 %vm641_vm1, %v10888_v28 }
 0x3d0   : > { %8472 = vmatmul.mubr.msk.bf16.gmra.mrb[40].mxu1 %vm641_vm1, %v10892_v9 }
 0x3d1   : > { %8475 = vmatprep.mubr.msk.bf16.mxu1 %vm641_vm1, %v10896_v34 }
 0x3d8   : > { %8476 = vmatmul.mubr.msk.bf16.gmra.mrb[44].mxu1 %vm641_vm1, %v10900_v42 }
 0x3d9   : > { %8481 = vmatprep.mubr.msk.bf16.mxu1 %vm641_vm1, %v10736_v50  ;;  %v10939_v50 = vld [vmem:[#allocation6 + $0x80] sm:$0xff] }
 0x3e0   : > { %8482 = vmatmul.mubr.msk.bf16.vlgmr.msra.gmra.mrb[16].mxu1 %vm641_vm1, %v10753_v27 }
 0x3e1   : > { %8514 = vmatpush3.bf16.msra.mxu1 %v5625_v24  ;;  %8485 = vmatprep.mubr.msk.bf16.mxu1 %vm641_vm1, %v10781_v40 }
 0x3e2   : > { %9244 = vmatprep.subr.msk.bf16.mxu1 %vm1419_vm0, %v7570_v6 }
 0x3e8   : > { %8486 = vmatmul.mubr.msk.bf16.gmra.mrb[20].mxu1 %vm641_vm1, %v10785_v7 }
 0x3e9   : > { %8489 = vmatprep.mubr.msk.bf16.mxu1 %vm641_vm1, %v10793_v43 }
 0x3f0   : > { %8490 = vmatmul.mubr.msk.bf16.gmra.mrb[24].mxu1 %vm641_vm1, %v10797_v49 }
 0x3f1   : > { %8493 = vmatprep.mubr.msk.bf16.mxu1 %vm641_vm1, %v10801_v33 }
 0x3f8   : > { %8494 = vmatmul.mubr.msk.bf16.gmra.mrb[28].mxu1 %vm641_vm1, %v10805_v35 }
 0x3f9   : > { %8497 = vmatprep.mubr.msk.bf16.mxu1 %vm641_vm1, %v10809_v56 }
 0x400   : > { %8498 = vmatmul.mubr.msk.bf16.gmra.mrb[32].mxu1 %vm641_vm1, %v10813_v32 }
 0x401   : > { %8501 = vmatprep.mubr.msk.bf16.mxu1 %vm641_vm1, %v10817_v20 }
 0x408   : > { %8502 = vmatmul.mubr.msk.bf16.gmra.mrb[36].mxu1 %vm641_vm1, %v10821_v61 }
 0x409   : > { %8505 = vmatprep.mubr.msk.bf16.mxu1 %vm641_vm1, %v10825_v21 }
 0x410   : > { %8506 = vmatmul.mubr.msk.bf16.gmra.mrb[40].mxu1 %vm641_vm1, %v10829_v22 }
 0x411   : > { %8509 = vmatprep.mubr.msk.bf16.mxu1 %vm641_vm1, %v10833_v41 }
 0x418   : > { %8510 = vmatmul.mubr.msk.bf16.gmra.mrb[44].mxu1 %vm641_vm1, %v10939_v50 }
 0x419   : > { %8515 = vmatprep.mubr.msk.bf16.mxu1 %vm641_vm1, %v5558_v2 }
 0x420   : > { %8516 = vmatmul.mubr.msk.bf16.vlgmr.msra.gmra.mrb[16].mxu1 %vm641_vm1, %v10945_v31 }
 0x421   : > { %8548 = vmatpush3.bf16.msra.mxu1 %v5888_v36  ;;  %8519 = vmatprep.mubr.msk.bf16.mxu1 %vm641_vm1, %v10952_v26 }
 0x422   : > { %9245 = vmatprep.subr.msk.bf16.mxu1 %vm1419_vm0, %v7587_v8 }
 0x428   : > { %8520 = vmatmul.mubr.msk.bf16.gmra.mrb[20].mxu1 %vm641_vm1, %v10957_v60 }
 0x429   : > { %8523 = vmatprep.mubr.msk.bf16.mxu1 %vm641_vm1, %v10961_v5 }
 0x430   : > { %8524 = vmatmul.mubr.msk.bf16.gmra.mrb[24].mxu1 %vm641_vm1, %v10965_v46 }
 0x431   : > { %8527 = vmatprep.mubr.msk.bf16.mxu1 %vm641_vm1, %v10969_v12 }
 0x438   : > { %8528 = vmatmul.mubr.msk.bf16.gmra.mrb[28].mxu1 %vm641_vm1, %v10973_v58 }
 0x439   : > { %8531 = vmatprep.mubr.msk.bf16.mxu1 %vm641_vm1, %v10977_v44 }
 0x440   : > { %8532 = vmatmul.mubr.msk.bf16.gmra.mrb[32].mxu1 %vm641_vm1, %v10981_v39 }
 0x441   : > { %8535 = vmatprep.mubr.msk.bf16.mxu1 %vm641_vm1, %v10985_v16 }
 0x448   : > { %8536 = vmatmul.mubr.msk.bf16.gmra.mrb[36].mxu1 %vm641_vm1, %v10631_v48  ;;  %v7604_v48 = vld [vmem:[%s11301_s6 + $0x1c] sm:$0xf] }
 0x449   : > { %8539 = vmatprep.mubr.msk.bf16.mxu1 %vm641_vm1, %v10622_v37  ;;  %v6151_v37 = vsel %vm1419_vm0, %v7587_v8, 0 }
 0x450   : > { %8540 = vmatmul.mubr.msk.bf16.gmra.mrb[40].mxu1 %vm641_vm1, %v10679_v14  ;;  %v6414_v14 = vsel %vm1419_vm0, %v7604_v48, 0 }
 0x451   : > { %8543 = vmatprep.mubr.msk.bf16.mxu1 %vm641_vm1, %v10662_v18  ;;  %v4300_v18 = vld [vmem:[#allocation6 + $0x88] sm:$0x1] }
 0x452   : > { %v4301_v4 = vsel %vm9490_vm6, 0, %v4300_v18 }
 0x453   : > { %4302 = vst [vmem:[#allocation6 + $0x88] sm:$0x1] %v4301_v4 }
 0x458   : > { %8544 = vmatmul.mubr.msk.bf16.gmra.mrb[44].mxu1 %vm641_vm1, %v10724_v25 }
 0x459   : > { %8549 = vmatprep.mubr.msk.bf16.mxu1 %vm641_vm1, %v10840_v57 }
 0x460   : > { %8550 = vmatmul.mubr.msk.bf16.vlgmr.msra.gmra.mrb[16].mxu1 %vm641_vm1, %v10847_v62 }
 0x461   : > { %8582 = vmatpush3.bf16.msra.mxu1 %v6151_v37  ;;  %8553 = vmatprep.mubr.msk.bf16.mxu1 %vm641_vm1, %v10852_v17 }
 0x462   : > { %9246 = vmatprep.subr.msk.bf16.mxu1 %vm1419_vm0, %v7604_v48 }
 0x468   : > { %8554 = vmatmul.mubr.msk.bf16.gmra.mrb[20].mxu1 %vm641_vm1, %v10856_v3 }
 0x469   : > { %8557 = vmatprep.mubr.msk.bf16.mxu1 %vm641_vm1, %v10860_v13 }
 0x470   : > { %8558 = vmatmul.mubr.msk.bf16.gmra.mrb[24].mxu1 %vm641_vm1, %v10864_v15 }
 0x471   : > { %8561 = vmatprep.mubr.msk.bf16.mxu1 %vm641_vm1, %v10868_v63 }
 0x478   : > { %8562 = vmatmul.mubr.msk.bf16.gmra.mrb[28].mxu1 %vm641_vm1, %v10872_v52 }
 0x479   : > { %8565 = vmatprep.mubr.msk.bf16.mxu1 %vm641_vm1, %v10876_v53 }
 0x480   : > { %8566 = vmatmul.mubr.msk.bf16.gmra.mrb[32].mxu1 %vm641_vm1, %v10880_v59 }
 0x481   : > { %8569 = vmatprep.mubr.msk.bf16.mxu1 %vm641_vm1, %v10884_v51 }
 0x488   : > { %8570 = vmatmul.mubr.msk.bf16.gmra.mrb[36].mxu1 %vm641_vm1, %v10888_v28 }
 0x489   : > { %8573 = vmatprep.mubr.msk.bf16.mxu1 %vm641_vm1, %v10892_v9 }
 0x490   : > { %8574 = vmatmul.mubr.msk.bf16.gmra.mrb[40].mxu1 %vm641_vm1, %v10896_v34 }
 0x491   : > { %8577 = vmatprep.mubr.msk.bf16.mxu1 %vm641_vm1, %v10900_v42 }
 0x498   : > { %8578 = vmatmul.mubr.msk.bf16.gmra.mrb[44].mxu1 %vm641_vm1, %v11038_v45 }
 0x499   : > { %8583 = vmatprep.mubr.msk.bf16.mxu1 %vm641_vm1, %v10753_v27  ;;  %v4445_v27 = vrot.slane %v4174_v38, 1 }
 0x4a0   : > { %8584 = vmatmul.mubr.msk.bf16.vlgmr.msra.gmra.mrb[16].mxu1 %vm641_vm1, %v10781_v40  ;;  %v4516_v40 = vld [vmem:[#allocation7 + $0x88] sm:$0xff] }
 0x4a1   : > { %8616 = vmatpush3.bf16.msra.mxu1 %v6414_v14  ;;  %8587 = vmatprep.mubr.msk.bf16.mxu1 %vm641_vm1, %v10785_v7  ;;  %v4446_v7 = vor.u32 %v4445_v27, %v4171_v29 }
 0x4a2   : > { %9247 = vmatprep.subr.msk.bf16.mxu1 %vm1419_vm0, %v7621_v30 }
 0x4a8   : > { %8588 = vmatmul.mubr.msk.bf16.gmra.mrb[20].mxu1 %vm641_vm1, %v10793_v43  ;;  %v6099_v43 = vld [vmem:[#allocation6 + $0x88] sm:$0xff] }
 0x4a9   : > { %8591 = vmatprep.mubr.msk.bf16.mxu1 %vm641_vm1, %v10797_v49  ;;  %v4517_v49 = vsel %vm9615_vm8, %v4446_v7, %v4516_v40 }
 0x4aa   : > { %4518 = vst [vmem:[#allocation7 + $0x88] sm:$0xff] %v4517_v49 }
 0x4b0   : > { %8592 = vmatmul.mubr.msk.bf16.gmra.mrb[24].mxu1 %vm641_vm1, %v10801_v33 }
 0x4b1   : > { %8595 = vmatprep.mubr.msk.bf16.mxu1 %vm641_vm1, %v10805_v35  ;;  %v4570_v33 = vld [vmem:[#allocation7 + $0x88] sm:$0x80]  ;;  %v6677_v35 = vsel %vm1419_vm0, %v7621_v30, 0 }
 0x4b8   : > { %8596 = vmatmul.mubr.msk.bf16.gmra.mrb[28].mxu1 %vm641_vm1, %v10809_v56  ;;  %v4571_v56 = vsel %vm9716_vm11, 0, %v4570_v33 }
 0x4b9   : > { %8599 = vmatprep.mubr.msk.bf16.mxu1 %vm641_vm1, %v10813_v32  ;;  %4572 = vst [vmem:[#allocation7 + $0x88] sm:$0x80] %v4571_v56  ;;  %v6359_v32 = vld [vmem:[#allocation5 + $0x70] sm:$0xff] }
 0x4c0   : > { %8600 = vmatmul.mubr.msk.bf16.gmra.mrb[32].mxu1 %vm641_vm1, %v10817_v20  ;;  %v6360_v20 = vld [vmem:[#allocation5 + $0x78] sm:$0xff] }
 0x4c1   : > { %8603 = vmatprep.mubr.msk.bf16.mxu1 %vm641_vm1, %v10821_v61  ;;  %v6362_v61 = vld [vmem:[#allocation5 + $0x88] sm:$0xff] }
 0x4c8   : > { %8604 = vmatmul.mubr.msk.bf16.gmra.mrb[36].mxu1 %vm641_vm1, %v10825_v21  ;;  %v11144_v21 = vld [vmem:[%s11302_s7] ss:$0 sm:$0xff] }
 0x4c9   : > { %8607 = vmatprep.mubr.msk.bf16.mxu1 %vm641_vm1, %v10829_v22 }
 0x4d0   : > { %8608 = vmatmul.mubr.msk.bf16.gmra.mrb[40].mxu1 %vm641_vm1, %v10833_v41  ;;  %v11149_v41 = vld [vmem:[%s11303_s8] ss:$0 sm:$0xff] }
 0x4d1   : > { %8611 = vmatprep.mubr.msk.bf16.mxu1 %vm641_vm1, %v10939_v50 }
 0x4d8   : > { %8612 = vmatmul.mubr.msk.bf16.gmra.mrb[44].mxu1 %vm641_vm1, %v6099_v43 }
 0x4d9   : > { %8617 = vmatprep.mubr.msk.bf16.mxu1 %vm641_vm1, %v10945_v31 }
 0x4e0   : > { %8618 = vmatmul.mubr.msk.bf16.vlgmr.msra.gmra.mrb[16].mxu1 %vm641_vm1, %v10952_v26 }
 0x4e1   : > { %8650 = vmatpush3.bf16.msra.mxu1 %v6677_v35  ;;  %8621 = vmatprep.mubr.msk.bf16.mxu1 %vm641_vm1, %v10957_v60 }
 0x4e8   : > { %8622 = vmatmul.mubr.msk.bf16.gmra.mrb[20].mxu1 %vm641_vm1, %v10961_v5 }
 0x4e9   : > { %8625 = vmatprep.mubr.msk.bf16.mxu1 %vm641_vm1, %v10965_v46 }
 0x4f0   : > { %8626 = vmatmul.mubr.msk.bf16.gmra.mrb[24].mxu1 %vm641_vm1, %v10969_v12 }
 0x4f1   : > { %8629 = vmatprep.mubr.msk.bf16.mxu1 %vm641_vm1, %v10973_v58 }
 0x4f8   : > { %8630 = vmatmul.mubr.msk.bf16.gmra.mrb[28].mxu1 %vm641_vm1, %v10977_v44 }
 0x4f9   : > { %8633 = vmatprep.mubr.msk.bf16.mxu1 %vm641_vm1, %v10981_v39 }
 0x500   : > { %8634 = vmatmul.mubr.msk.bf16.gmra.mrb[32].mxu1 %vm641_vm1, %v10985_v16 }
 0x501   : > { %8637 = vmatprep.mubr.msk.bf16.mxu1 %vm641_vm1, %v6357_v54 }
 0x508   : > { %8638 = vmatmul.mubr.msk.bf16.gmra.mrb[36].mxu1 %vm641_vm1, %v6358_v47 }
 0x509   : > { %8641 = vmatprep.mubr.msk.bf16.mxu1 %vm641_vm1, %v6359_v32 }
 0x510   : > { %8642 = vmatmul.mubr.msk.bf16.gmra.mrb[40].mxu1 %vm641_vm1, %v6360_v20 }
 0x511   : > { %8645 = vmatprep.mubr.msk.bf16.mxu1 %vm641_vm1, %v10724_v25  ;;  %v6625_v25 = vld [vmem:[#allocation7 + $0x88] sm:$0xff] }
 0x518   : > { %8646 = vmatmul.mubr.msk.bf16.gmra.mrb[44].mxu1 %vm641_vm1, %v6362_v61 }
 0x519   : > { %8651 = vmatprep.mubr.msk.bf16.mxu1 %vm641_vm1, %v10847_v62 }
 0x520   : > { %8652 = vmatmul.mubr.msk.bf16.vlgmr.msra.gmra.mrb[16].mxu1 %vm641_vm1, %v10852_v17 }
 0x521   : > { %8655 = vmatprep.mubr.msk.bf16.mxu1 %vm641_vm1, %v10856_v3 }
 0x528   : > { %8656 = vmatmul.mubr.msk.bf16.gmra.mrb[20].mxu1 %vm641_vm1, %v10860_v13 }
 0x529   : > { %8659 = vmatprep.mubr.msk.bf16.mxu1 %vm641_vm1, %v10864_v15 }
 0x530   : > { %8660 = vmatmul.mubr.msk.bf16.gmra.mrb[24].mxu1 %vm641_vm1, %v10868_v63 }
 0x531   : > { %8663 = vmatprep.mubr.msk.bf16.mxu1 %vm641_vm1, %v10872_v52 }
 0x538   : > { %8664 = vmatmul.mubr.msk.bf16.gmra.mrb[28].mxu1 %vm641_vm1, %v10876_v53 }
 0x539   : > { %8667 = vmatprep.mubr.msk.bf16.mxu1 %vm641_vm1, %v10880_v59 }
 0x540   : > { %8668 = vmatmul.mubr.msk.bf16.gmra.mrb[32].mxu1 %vm641_vm1, %v10884_v51 }
 0x541   : > { %8671 = vmatprep.mubr.msk.bf16.mxu1 %vm641_vm1, %v10888_v28 }
 0x548   : > { %8672 = vmatmul.mubr.msk.bf16.gmra.mrb[36].mxu1 %vm641_vm1, %v10892_v9 }
 0x549   : > { %8675 = vmatprep.mubr.msk.bf16.mxu1 %vm641_vm1, %v10896_v34 }
 0x550   : > { %8676 = vmatmul.mubr.msk.bf16.gmra.mrb[40].mxu1 %vm641_vm1, %v10900_v42 }
 0x551   : > { %8679 = vmatprep.mubr.msk.bf16.mxu1 %vm641_vm1, %v11038_v45 }
 0x558   : > { %8680 = vmatmul.mubr.msk.bf16.gmra.mrb[44].mxu1 %vm641_vm1, %v6625_v25 }
 0x5f3   : > { %v8653_v22 = vpop.f32.mrb[16].mxu1 }
 0x5f4   : > { %v6881_v0 = vmul.f32 %v8653_v22, %v11144_v21  ;;  %v6713_v57 = vpop.f32.mrb[17].mxu1 }
 0x5f5   : > { %v6879_v1 = vmul.f32 %v11144_v21, %v6713_v57  ;;  %v8654_v62 = vpop.f32.mrb[18].mxu1 }
 0x5f6   : > { %v6920_v17 = vadd.f32 %v11149_v41, %v6881_v0  ;;  %v6882_v3 = vmul.f32 %v8654_v62, %v11144_v21  ;;  %v6716_v13 = vpop.f32.mrb[19].mxu1 }
 0x5f7   : > { %v6918_v15 = vadd.f32 %v11149_v41, %v6879_v1  ;;  %v6880_v63 = vmul.f32 %v11144_v21, %v6716_v13 }
 0x5f8   : > { %v6952_v52 = vmax.f32 %v6920_v17, 0.0  ;;  %v6921_v53 = vadd.f32 %v11149_v41, %v6882_v3 }
 0x5f9   : > { %v6950_v59 = vmax.f32 %v6918_v15, 0.0  ;;  %v6919_v51 = vadd.f32 %v11149_v41, %v6880_v63 }
 0x5fa   : > { %v7681_v28 = vpack.c.bf16 %v6952_v52, %v6952_v52  ;;  %v6953_v9 = vmax.f32 %v6921_v53, 0.0 }
 0x5fb   : > { %v7679_v34 = vpack.c.bf16 %v6950_v59, %v6950_v59  ;;  %v6951_v42 = vmax.f32 %v6919_v51, 0.0  ;;  %v8657_v24 = vpop.f32.mrb[20].mxu1 }
 0x5fc   : > { %7113 = vst.msk [vmem:[%s11163_s25 + $0x8] sm:$0xf] %vm7110_vm12, %v7681_v28  ;;  %v7682_v6 = vpack.c.bf16 %v6953_v9, %v6953_v9  ;;  %v6885_v50 = vmul.f32 %v8657_v24, %v11144_v21  ;;  %v6729_v2 = vpop.f32.mrb[21].mxu1 }
 0x5fd   : > { %7111 = vst.msk [vmem:[%s11163_s25] sm:$0xf] %vm7110_vm12, %v7679_v34  ;;  %v7680_v36 = vpack.c.bf16 %v6951_v42, %v6951_v42  ;;  %v6883_v31 = vmul.f32 %v11144_v21, %v6729_v2  ;;  %v8658_v8 = vpop.f32.mrb[22].mxu1 }
 0x5fe   : > { %7114 = vst.msk [vmem:[%s11163_s25 + $0xc] sm:$0xf] %vm7110_vm12, %v7682_v6  ;;  %v6924_v26 = vadd.f32 %v11149_v41, %v6885_v50  ;;  %v6886_v60 = vmul.f32 %v8658_v8, %v11144_v21  ;;  %v6732_v5 = vpop.f32.mrb[23].mxu1 }
 0x5ff   : > { %7112 = vst.msk [vmem:[%s11163_s25 + $0x4] sm:$0xf] %vm7110_vm12, %v7680_v36  ;;  %v6922_v46 = vadd.f32 %v11149_v41, %v6883_v31  ;;  %v6884_v12 = vmul.f32 %v11144_v21, %v6732_v5 }
 0x600   : > { %v6956_v58 = vmax.f32 %v6924_v26, 0.0  ;;  %v6925_v44 = vadd.f32 %v11149_v41, %v6886_v60 }
 0x601   : > { %v6954_v39 = vmax.f32 %v6922_v46, 0.0  ;;  %v6923_v16 = vadd.f32 %v11149_v41, %v6884_v12 }
 0x602   : > { %v7685_v23 = vpack.c.bf16 %v6956_v58, %v6956_v58  ;;  %v6957_v29 = vmax.f32 %v6925_v44, 0.0 }
 0x603   : > { %v7683_v38 = vpack.c.bf16 %v6954_v39, %v6954_v39  ;;  %v6955_v11 = vmax.f32 %v6923_v16, 0.0  ;;  %v8661_v55 = vpop.f32.mrb[24].mxu1 }
 0x604   : > { %7117 = vst.msk [vmem:[%s11163_s25 + $0x18] sm:$0xf] %vm7110_vm12, %v7685_v23  ;;  %v7686_v10 = vpack.c.bf16 %v6957_v29, %v6957_v29  ;;  %v6889_v19 = vmul.f32 %v8661_v55, %v11144_v21  ;;  %v6745_v37 = vpop.f32.mrb[25].mxu1 }
 0x605   : > { %7115 = vst.msk [vmem:[%s11163_s25 + $0x10] sm:$0xf] %vm7110_vm12, %v7683_v38  ;;  %v7684_v48 = vpack.c.bf16 %v6955_v11, %v6955_v11  ;;  %v6887_v18 = vmul.f32 %v11144_v21, %v6745_v37  ;;  %v8662_v4 = vpop.f32.mrb[26].mxu1 }
 0x606   : > { %7118 = vst.msk [vmem:[%s11163_s25 + $0x1c] sm:$0xf] %vm7110_vm12, %v7686_v10  ;;  %v6928_v45 = vadd.f32 %v11149_v41, %v6889_v19  ;;  %v6890_v14 = vmul.f32 %v8662_v4, %v11144_v21  ;;  %v6748_v30 = vpop.f32.mrb[27].mxu1 }
 0x607   : > { %7116 = vst.msk [vmem:[%s11163_s25 + $0x14] sm:$0xf] %vm7110_vm12, %v7684_v48  ;;  %v6926_v27 = vadd.f32 %v11149_v41, %v6887_v18  ;;  %v6888_v40 = vmul.f32 %v11144_v21, %v6748_v30 }
 0x608   : > { %v6960_v7 = vmax.f32 %v6928_v45, 0.0  ;;  %v6929_v43 = vadd.f32 %v11149_v41, %v6890_v14 }
 0x609   : > { %v6958_v49 = vmax.f32 %v6926_v27, 0.0  ;;  %v6927_v33 = vadd.f32 %v11149_v41, %v6888_v40 }
 0x60a   : > { %v7689_v35 = vpack.c.bf16 %v6960_v7, %v6960_v7  ;;  %v6961_v56 = vmax.f32 %v6929_v43, 0.0 }
 0x60b   : > { %v7687_v54 = vpack.c.bf16 %v6958_v49, %v6958_v49  ;;  %v6959_v47 = vmax.f32 %v6927_v33, 0.0  ;;  %v8665_v32 = vpop.f32.mrb[28].mxu1 }
 0x60c   : > { %7121 = vst.msk [vmem:[%s11163_s25 + $0x28] sm:$0xf] %vm7110_vm12, %v7689_v35  ;;  %v7690_v20 = vpack.c.bf16 %v6961_v56, %v6961_v56  ;;  %v6893_v61 = vmul.f32 %v8665_v32, %v11144_v21  ;;  %v6761_v25 = vpop.f32.mrb[29].mxu1 }
 0x60d   : > { %7119 = vst.msk [vmem:[%s11163_s25 + $0x20] sm:$0xf] %vm7110_vm12, %v7687_v54  ;;  %v7688_v22 = vpack.c.bf16 %v6959_v47, %v6959_v47  ;;  %v6891_v0 = vmul.f32 %v11144_v21, %v6761_v25  ;;  %v8666_v57 = vpop.f32.mrb[30].mxu1 }
 0x60e   : > { %7122 = vst.msk [vmem:[%s11163_s25 + $0x2c] sm:$0xf] %vm7110_vm12, %v7690_v20  ;;  %v6932_v1 = vadd.f32 %v11149_v41, %v6893_v61  ;;  %v6894_v62 = vmul.f32 %v8666_v57, %v11144_v21  ;;  %v6764_v17 = vpop.f32.mrb[31].mxu1 }
 0x60f   : > { %7120 = vst.msk [vmem:[%s11163_s25 + $0x24] sm:$0xf] %vm7110_vm12, %v7688_v22  ;;  %v6930_v3 = vadd.f32 %v11149_v41, %v6891_v0  ;;  %v6892_v13 = vmul.f32 %v11144_v21, %v6764_v17 }
 0x610   : > { %v6964_v15 = vmax.f32 %v6932_v1, 0.0  ;;  %v6933_v63 = vadd.f32 %v11149_v41, %v6894_v62 }
 0x611   : > { %v6962_v52 = vmax.f32 %v6930_v3, 0.0  ;;  %v6931_v53 = vadd.f32 %v11149_v41, %v6892_v13 }
 0x612   : > { %v7693_v59 = vpack.c.bf16 %v6964_v15, %v6964_v15  ;;  %v6965_v51 = vmax.f32 %v6933_v63, 0.0 }
 0x613   : > { %v7691_v28 = vpack.c.bf16 %v6962_v52, %v6962_v52  ;;  %v6963_v9 = vmax.f32 %v6931_v53, 0.0  ;;  %v8669_v34 = vpop.f32.mrb[32].mxu1 }
 0x614   : > { %7125 = vst.msk [vmem:[%s11163_s25 + $0x38] sm:$0xf] %vm7110_vm12, %v7693_v59  ;;  %v7694_v42 = vpack.c.bf16 %v6965_v51, %v6965_v51  ;;  %v6897_v24 = vmul.f32 %v8669_v34, %v11144_v21  ;;  %v6777_v6 = vpop.f32.mrb[33].mxu1 }
 0x615   : > { %7123 = vst.msk [vmem:[%s11163_s25 + $0x30] sm:$0xf] %vm7110_vm12, %v7691_v28  ;;  %v7692_v50 = vpack.c.bf16 %v6963_v9, %v6963_v9  ;;  %v6895_v2 = vmul.f32 %v11144_v21, %v6777_v6  ;;  %v8670_v36 = vpop.f32.mrb[34].mxu1 }
 0x616   : > { %7126 = vst.msk [vmem:[%s11163_s25 + $0x3c] sm:$0xf] %vm7110_vm12, %v7694_v42  ;;  %v6936_v31 = vadd.f32 %v11149_v41, %v6897_v24  ;;  %v6898_v8 = vmul.f32 %v8670_v36, %v11144_v21  ;;  %v6780_v26 = vpop.f32.mrb[35].mxu1 }
 0x617   : > { %7124 = vst.msk [vmem:[%s11163_s25 + $0x34] sm:$0xf] %vm7110_vm12, %v7692_v50  ;;  %v6934_v60 = vadd.f32 %v11149_v41, %v6895_v2  ;;  %v6896_v5 = vmul.f32 %v11144_v21, %v6780_v26 }
 0x618   : > { %v6968_v46 = vmax.f32 %v6936_v31, 0.0  ;;  %v6937_v12 = vadd.f32 %v11149_v41, %v6898_v8 }
 0x619   : > { %v6966_v58 = vmax.f32 %v6934_v60, 0.0  ;;  %v6935_v44 = vadd.f32 %v11149_v41, %v6896_v5 }
 0x61a   : > { %v7697_v39 = vpack.c.bf16 %v6968_v46, %v6968_v46  ;;  %v6969_v16 = vmax.f32 %v6937_v12, 0.0 }
 0x61b   : > { %v7695_v23 = vpack.c.bf16 %v6966_v58, %v6966_v58  ;;  %v6967_v29 = vmax.f32 %v6935_v44, 0.0  ;;  %v8673_v38 = vpop.f32.mrb[36].mxu1 }
 0x61c   : > { %7129 = vst.msk [vmem:[%s11163_s25 + $0x48] sm:$0xf] %vm7110_vm12, %v7697_v39  ;;  %v7698_v11 = vpack.c.bf16 %v6969_v16, %v6969_v16  ;;  %v6901_v55 = vmul.f32 %v8673_v38, %v11144_v21  ;;  %v6793_v10 = vpop.f32.mrb[37].mxu1 }
 0x61d   : > { %7127 = vst.msk [vmem:[%s11163_s25 + $0x40] sm:$0xf] %vm7110_vm12, %v7695_v23  ;;  %v7696_v19 = vpack.c.bf16 %v6967_v29, %v6967_v29  ;;  %v6899_v37 = vmul.f32 %v11144_v21, %v6793_v10  ;;  %v8674_v48 = vpop.f32.mrb[38].mxu1 }
 0x61e   : > { %7130 = vst.msk [vmem:[%s11163_s25 + $0x4c] sm:$0xf] %vm7110_vm12, %v7698_v11  ;;  %v6940_v18 = vadd.f32 %v11149_v41, %v6901_v55  ;;  %v6902_v4 = vmul.f32 %v8674_v48, %v11144_v21  ;;  %v6796_v45 = vpop.f32.mrb[39].mxu1 }
 0x61f   : > { %7128 = vst.msk [vmem:[%s11163_s25 + $0x44] sm:$0xf] %vm7110_vm12, %v7696_v19  ;;  %v6938_v14 = vadd.f32 %v11149_v41, %v6899_v37  ;;  %v6900_v30 = vmul.f32 %v11144_v21, %v6796_v45 }
 0x620   : > { %v6972_v27 = vmax.f32 %v6940_v18, 0.0  ;;  %v6941_v40 = vadd.f32 %v11149_v41, %v6902_v4 }
 0x621   : > { %v6970_v7 = vmax.f32 %v6938_v14, 0.0  ;;  %v6939_v43 = vadd.f32 %v11149_v41, %v6900_v30 }
 0x622   : > { %v7701_v49 = vpack.c.bf16 %v6972_v27, %v6972_v27  ;;  %v6973_v33 = vmax.f32 %v6941_v40, 0.0 }
 0x623   : > { %v7699_v35 = vpack.c.bf16 %v6970_v7, %v6970_v7  ;;  %v6971_v56 = vmax.f32 %v6939_v43, 0.0  ;;  %v8677_v54 = vpop.f32.mrb[40].mxu1 }
 0x624   : > { %7133 = vst.msk [vmem:[%s11163_s25 + $0x58] sm:$0xf] %vm7110_vm12, %v7701_v49  ;;  %v7702_v47 = vpack.c.bf16 %v6973_v33, %v6973_v33  ;;  %v6905_v32 = vmul.f32 %v8677_v54, %v11144_v21  ;;  %v6809_v20 = vpop.f32.mrb[41].mxu1 }
 0x625   : > { %7131 = vst.msk [vmem:[%s11163_s25 + $0x50] sm:$0xf] %vm7110_vm12, %v7699_v35  ;;  %v7700_v61 = vpack.c.bf16 %v6971_v56, %v6971_v56  ;;  %v6903_v25 = vmul.f32 %v11144_v21, %v6809_v20  ;;  %v8678_v22 = vpop.f32.mrb[42].mxu1 }
 0x626   : > { %7134 = vst.msk [vmem:[%s11163_s25 + $0x5c] sm:$0xf] %vm7110_vm12, %v7702_v47  ;;  %v6944_v0 = vadd.f32 %v11149_v41, %v6905_v32  ;;  %v6906_v57 = vmul.f32 %v8678_v22, %v11144_v21  ;;  %v6812_v1 = vpop.f32.mrb[43].mxu1 }
 0x627   : > { %7132 = vst.msk [vmem:[%s11163_s25 + $0x54] sm:$0xf] %vm7110_vm12, %v7700_v61  ;;  %v6942_v62 = vadd.f32 %v11149_v41, %v6903_v25  ;;  %v6904_v17 = vmul.f32 %v11144_v21, %v6812_v1 }
 0x628   : > { %v6976_v3 = vmax.f32 %v6944_v0, 0.0  ;;  %v6945_v13 = vadd.f32 %v11149_v41, %v6906_v57 }
 0x629   : > { %v6974_v15 = vmax.f32 %v6942_v62, 0.0  ;;  %v6943_v63 = vadd.f32 %v11149_v41, %v6904_v17 }
 0x62a   : > { %v7705_v52 = vpack.c.bf16 %v6976_v3, %v6976_v3  ;;  %v6977_v53 = vmax.f32 %v6945_v13, 0.0 }
 0x62b   : > { %v7703_v59 = vpack.c.bf16 %v6974_v15, %v6974_v15  ;;  %v6975_v51 = vmax.f32 %v6943_v63, 0.0  ;;  %v8681_v28 = vpop.f32.mrb[44].mxu1 }
 0x62c   : > { %7137 = vst.msk [vmem:[%s11163_s25 + $0x68] sm:$0xf] %vm7110_vm12, %v7705_v52  ;;  %v7706_v9 = vpack.c.bf16 %v6977_v53, %v6977_v53  ;;  %v6909_v34 = vmul.f32 %v8681_v28, %v11144_v21  ;;  %v6825_v42 = vpop.f32.mrb[45].mxu1 }
 0x62d   : > { %7135 = vst.msk [vmem:[%s11163_s25 + $0x60] sm:$0xf] %vm7110_vm12, %v7703_v59  ;;  %v7704_v24 = vpack.c.bf16 %v6975_v51, %v6975_v51  ;;  %v6907_v6 = vmul.f32 %v11144_v21, %v6825_v42  ;;  %v8682_v50 = vpop.f32.mrb[46].mxu1 }
 0x62e   : > { %7138 = vst.msk [vmem:[%s11163_s25 + $0x6c] sm:$0xf] %vm7110_vm12, %v7706_v9  ;;  %v6948_v2 = vadd.f32 %v11149_v41, %v6909_v34  ;;  %v6910_v36 = vmul.f32 %v8682_v50, %v11144_v21  ;;  %v6828_v31 = vpop.f32.mrb[47].mxu1 }
 0x62f   : > { %7136 = vst.msk [vmem:[%s11163_s25 + $0x64] sm:$0xf] %vm7110_vm12, %v7704_v24  ;;  %v6946_v8 = vadd.f32 %v11149_v41, %v6907_v6  ;;  %v6908_v26 = vmul.f32 %v11144_v21, %v6828_v31 }
 0x630   : > { %v6980_v60 = vmax.f32 %v6948_v2, 0.0  ;;  %v6949_v5 = vadd.f32 %v11149_v41, %v6910_v36 }
 0x631   : > { %v6978_v46 = vmax.f32 %v6946_v8, 0.0  ;;  %v6947_v12 = vadd.f32 %v11149_v41, %v6908_v26 }
 0x632   : > { %v7709_v58 = vpack.c.bf16 %v6980_v60, %v6980_v60  ;;  %v6981_v44 = vmax.f32 %v6949_v5, 0.0 }
 0x633   : > { %v7707_v39 = vpack.c.bf16 %v6978_v46, %v6978_v46  ;;  %v6979_v16 = vmax.f32 %v6947_v12, 0.0 }
 0x634   : > { %7141 = vst.msk [vmem:[%s11163_s25 + $0x78] sm:$0xf] %vm7110_vm12, %v7709_v58  ;;  %v7710_v23 = vpack.c.bf16 %v6981_v44, %v6981_v44 }
 0x635   : > { %7139 = vst.msk [vmem:[%s11163_s25 + $0x70] sm:$0xf] %vm7110_vm12, %v7707_v39  ;;  %v7708_v29 = vpack.c.bf16 %v6979_v16, %v6979_v16 }
 0x636   : > { %7142 = vst.msk [vmem:[%s11163_s25 + $0x7c] sm:$0xf] %vm7110_vm12, %v7710_v23 }
 0x637   : > { %7140 = vst.msk [vmem:[%s11163_s25 + $0x74] sm:$0xf] %vm7110_vm12, %v7708_v29 }
 0x638 PF: > { %s19_s30 = sadd.s32 1, %s9311_s30   ;;  %s11313_s28 = smov %s9307_s29 }
 0x639   : > { %p16_p5 = scmp.ge.s32.totalorder %s19_s30, 4   ;;  %s11314_s29 = smov %s11316_s10 }
 0x63b   :  { %18 = sbr.rel (!%p16_p5) target bundleno = 2 (0x2), region = 143 }

</bundles_post_ra>
